<compile_context>
chip_gen: v7x
topology: tpu7x:2x2x1
jax: 0.10.0
libtpu: 0.0.40
codegen_flags: <defaults>
</compile_context>

<pallas_src>
import jax
import jax.numpy as jnp
from jax import lax
from jax.experimental import pallas as pl
from jax.experimental.pallas import tpu as pltpu


def phi_gru_kernel(x_ref, w_phi_ref, b_phi_ref, w_ih_ref, b_gi_ref,
                   w_hh_ref, b_hn_ref, w_att_ref, b_att_ref,
                   w_fc_ref, b_fc_ref, out_ref, gi_scratch, outs_scratch):
    T, F, Bt = x_ref.shape            # time-major, batch-on-lanes block
    H = w_phi_ref.shape[0]
    G = w_ih_ref.shape[0]             # 3*H (multiple of 8 -> clean sublane slices)

    w_phi = w_phi_ref[...]            # [H, F]  bf16
    w_ih = w_ih_ref[...]              # [G, H]  bf16
    w_hh = w_hh_ref[...]              # [G, H]  bf16

    # Hoisted bias broadcasts (JAX does not CSE broadcast_in_dim; do them once,
    # not once per unrolled step).
    b_phi_b = jnp.broadcast_to(b_phi_ref[...], (H, Bt))    # f32
    b_gi_b = jnp.broadcast_to(b_gi_ref[...], (G, Bt))      # f32 (b_hr/b_hz folded)
    b_hn_b = jnp.broadcast_to(b_hn_ref[...], (H, Bt))      # f32 (n-gate hidden bias)

    unroll = True if T <= 16 else 8   # full unroll only for short sequences

    # ---- phase 1: phi (Linear+ReLU) + GRU input gates for every step -------
    # Independent across t -> off the serial critical path; results land in an
    # explicit VMEM scratch so nothing huge stays live across the recurrence
    # and each step's read is one aligned vld.
    def precompute(t, carry):
        x_t = x_ref[t]                                            # [F, Bt] bf16
        f_t = jnp.dot(w_phi, x_t,
                      preferred_element_type=jnp.float32) + b_phi_b
        f_t = jnp.maximum(f_t, 0.0)                               # [H, Bt] f32
        gi_t = jnp.dot(w_ih, f_t.astype(jnp.bfloat16),
                       preferred_element_type=jnp.float32) + b_gi_b
        gi_scratch[t] = gi_t                                      # [G, Bt] f32
        return carry

    lax.fori_loop(0, T, precompute, 0, unroll=unroll)

    # ---- phase 2: serial GRU recurrence, batch on the 128-lane axis --------
    def gru_step(t, h):
        gi = gi_scratch[t]                                        # [G, Bt] f32
        gh = jnp.dot(w_hh, h.astype(jnp.bfloat16),
                     preferred_element_type=jnp.float32)          # [G, Bt] f32
        # Gate slices along sublanes at offsets 0 / H / 2H (multiples of 8).
        # sigmoid(x) = 0.5*(tanh(0.5*x)+1): one EUP push instead of exp+recip.
        r = 0.5 * (jnp.tanh(0.5 * (gi[0:H] + gh[0:H])) + 1.0)
        z = 0.5 * (jnp.tanh(0.5 * (gi[H:2 * H] + gh[H:2 * H])) + 1.0)
        n = jnp.tanh(gi[2 * H:3 * H] + r * (gh[2 * H:3 * H] + b_hn_b))
        h_new = (1.0 - z) * n + z * h                             # PyTorch GRU update
        outs_scratch[t] = h_new
        return h_new

    h0 = jnp.zeros((H, Bt), jnp.float32)
    lax.fori_loop(0, T, gru_step, h0, unroll=unroll)

    # ---- attention pooling over time (Linear(H->1) + exact softmax over T) --
    outs = outs_scratch[...]                                      # [T, H, Bt] f32
    w_att = w_att_ref[...].reshape(1, H, 1)                       # [1, H, 1] f32
    scores = jnp.sum(outs * w_att, axis=1) + b_att_ref[0, 0]      # [T, Bt]
    scores = scores - jnp.max(scores, axis=0, keepdims=True)
    e = jnp.exp(scores)
    alpha = e / jnp.sum(e, axis=0, keepdims=True)                 # exact softmax
    context = jnp.sum(alpha[:, None, :] * outs, axis=0)           # [H, Bt]

    # ---- fc2: Linear(H -> num_classes); dropout is identity in eval ---------
    logits = jnp.dot(w_fc_ref[...], context.astype(jnp.bfloat16),
                     preferred_element_type=jnp.float32) + b_fc_ref[...]
    out_ref[...] = logits.astype(out_ref.dtype)                   # [C, Bt]


def _round_up(x, m):
    return ((x + m - 1) // m) * m


def _pick_b_tile(B):
    """Lane-dense batch tiling.  For B <= 128 a single full-batch block keeps
    gate vregs as lane-dense as the batch allows; for larger B use 128-lane
    tiles (pad-and-slice) so the grid has >1 iteration and the "parallel"
    batch axis can shard across TensorCores.  (On v7x one may prefer two
    half-lane tiles even for 16 <= B <= 128 to engage both cores.)"""
    if B <= 128:
        return B, B
    b_tile = 128
    return b_tile, _round_up(B, b_tile)


def _prepare_params(params):
    """Wrapper-side layout/dtype plumbing: transpose weights to [out, in] for
    the batch-on-lanes kernel layout, cast MXU operands to bf16, and fold the
    r/z hidden biases into the input-gate bias (only the n-gate hidden bias
    must stay inside the recurrence)."""
    H = params["w_phi"].shape[1]
    C = params["w_fc"].shape[1]
    bf = jnp.bfloat16
    b_ih = params["b_ih"].reshape(-1)                  # [3H]
    b_hh = params["b_hh"].reshape(-1)                  # [3H]
    b_gi = jnp.concatenate([b_ih[:2 * H] + b_hh[:2 * H], b_ih[2 * H:]])
    return dict(
        w_phi_t=params["w_phi"].T.astype(bf),          # [H, F]
        b_phi_c=params["b_phi"].reshape(H, 1),         # [H, 1]
        w_ih_t=params["w_ih"].T.astype(bf),            # [3H, H]
        b_gi_c=b_gi.reshape(3 * H, 1),                 # [3H, 1]
        w_hh_t=params["w_hh"].T.astype(bf),            # [3H, H]
        b_hn_c=b_hh[2 * H:].reshape(H, 1),             # [H, 1]
        w_att_c=params["w_att"].reshape(H, 1),         # [H, 1]
        b_att=params["b_att"].reshape(1, 1),           # [1, 1]
        w_fc_t=params["w_fc"].T.astype(bf),            # [C, H]
        b_fc_c=params["b_fc"].reshape(C, 1),           # [C, 1]
    )


def phi_gru_forward(x, params):
    B, T, F = x.shape
    H = params["w_phi"].shape[1]
    C = params["w_fc"].shape[1]
    G = 3 * H
    p = _prepare_params(params)

    # bf16 + time-major, batch-on-lanes layout produced in the wrapper.
    # Halves the only large HBM->VMEM stream and removes the in-kernel cast;
    # XLA can fuse this into the input copy (or use allow_input_fusion).
    x_k = jnp.transpose(x.astype(jnp.bfloat16), (1, 2, 0))        # [T, F, B]

    b_tile, B_pad = _pick_b_tile(B)
    if B_pad != B:
        x_k = jnp.pad(x_k, ((0, 0), (0, 0), (0, B_pad - B)))
    grid = (B_pad // b_tile,)

    args = (x_k, p["w_phi_t"], p["b_phi_c"], p["w_ih_t"], p["b_gi_c"],
            p["w_hh_t"], p["b_hn_c"], p["w_att_c"], p["b_att"],
            p["w_fc_t"], p["b_fc_c"])

    def full_spec(a):   # small resident weights: whole array, every grid step
        return pl.BlockSpec(a.shape, lambda i: (0,) * a.ndim)

    in_specs = ([pl.BlockSpec((T, F, b_tile), lambda i: (0, 0, i))]
                + [full_spec(a) for a in args[1:]])

    # Rough per-block VMEM live set: x block (double-buffered, bf16) + gi
    # scratch + outs scratch + attention temps; raise the scoped limit as
    # needed, clamped to v7x's 64 MiB physical VMEM.  For very long T, shrink
    # b_tile / switch gi_scratch to bf16 / T-chunk the grid instead.
    est = (2 * T * F * b_tile * 2            # x block, 2 pipeline buffers
           + T * G * b_tile * 4              # gi_scratch
           + 2 * T * H * b_tile * 4          # outs_scratch + attention temp
           + 4 * T * b_tile * 4              # scores / alpha temps
           + (1 << 20))                      # weights + slack
    vmem_limit = int(min(max(2 * est, 32 << 20), 64 << 20))

    out_cb = pl.pallas_call(
        phi_gru_kernel,
        out_shape=jax.ShapeDtypeStruct((C, B_pad), jnp.float32),
        grid=grid,
        in_specs=in_specs,
        out_specs=pl.BlockSpec((C, b_tile), lambda i: (0, i)),
        scratch_shapes=[
            pltpu.VMEM((T, G, b_tile), jnp.float32),   # per-step input gates
            pltpu.VMEM((T, H, b_tile), jnp.float32),   # per-step hidden states
        ],
        compiler_params=pltpu.CompilerParams(
            dimension_semantics=("parallel",),
            vmem_limit_bytes=vmem_limit),
    )(*args)

    return out_cb.T[:B]                                           # [B, C]


def init_params(key, n_mel_bins=64, hidden_dim=32, num_classes=10):
    ks = jax.random.split(key, 8)
    s = 0.1
    return {
        "w_phi": s * jax.random.normal(ks[0], (n_mel_bins, hidden_dim), jnp.float32),
        "b_phi": jnp.zeros((1, hidden_dim), jnp.float32),
        "w_ih": s * jax.random.normal(ks[1], (hidden_dim, 3 * hidden_dim), jnp.float32),
        "b_ih": jnp.zeros((1, 3 * hidden_dim), jnp.float32),
        "w_hh": s * jax.random.normal(ks[2], (hidden_dim, 3 * hidden_dim), jnp.float32),
        "b_hh": jnp.zeros((1, 3 * hidden_dim), jnp.float32),
        "w_att": s * jax.random.normal(ks[3], (1, hidden_dim), jnp.float32),
        "b_att": jnp.zeros((1, 1), jnp.float32),
        "w_fc": s * jax.random.normal(ks[4], (hidden_dim, num_classes), jnp.float32),
        "b_fc": jnp.zeros((1, num_classes), jnp.float32),
    }


def phi_gru_reference(x, p):
    """Pure-JAX reference with the same precision policy as the kernel
    (bf16 MXU operands, f32 accumulation/elementwise, exact softmax), using
    the standard (unfolded) GRU bias formulation and jax.nn.sigmoid."""
    B, T, F = x.shape
    H = p["w_phi"].shape[1]
    bf, f32 = jnp.bfloat16, jnp.float32

    feats = jnp.einsum("btf,fh->bth", x.astype(bf), p["w_phi"].astype(bf),
                       preferred_element_type=f32) + p["b_phi"][0]
    feats = jnp.maximum(feats, 0.0)

    w_ih = p["w_ih"].astype(bf)
    w_hh = p["w_hh"].astype(bf)

    def step(h, x_t):
        gi = jnp.dot(x_t.astype(bf), w_ih, preferred_element_type=f32) + p["b_ih"]
        gh = jnp.dot(h.astype(bf), w_hh, preferred_element_type=f32) + p["b_hh"]
        r = jax.nn.sigmoid(gi[:, :H] + gh[:, :H])
        z = jax.nn.sigmoid(gi[:, H:2 * H] + gh[:, H:2 * H])
        n = jnp.tanh(gi[:, 2 * H:] + r * gh[:, 2 * H:])
        h_new = (1.0 - z) * n + z * h
        return h_new, h_new

    h0 = jnp.zeros((B, H), f32)
    _, outs = lax.scan(step, h0, jnp.transpose(feats, (1, 0, 2)))   # [T, B, H]
    scores = jnp.einsum("tbh,h->tb", outs, p["w_att"][0]) + p["b_att"][0, 0]
    alpha = jax.nn.softmax(scores, axis=0)
    context = jnp.einsum("tb,tbh->bh", alpha, outs)
    return jnp.dot(context.astype(bf), p["w_fc"].astype(bf),
                   preferred_element_type=f32) + p["b_fc"]


if __name__ == "__main__":
    B, T, F, H, C = 2, 8, 64, 32, 10
    key = jax.random.PRNGKey(0)
    kx, kp = jax.random.split(key)
    x = jax.random.normal(kx, (B, T, F), jnp.float32)
    params = init_params(kp, n_mel_bins=F, hidden_dim=H, num_classes=C)

    out = jax.block_until_ready(phi_gru_forward(x, params))
    ref = jax.block_until_ready(phi_gru_reference(x, params))

    assert out.shape == (B, C)
    max_err = float(jnp.max(jnp.abs(out - ref)))
    assert jnp.allclose(out, ref, rtol=1e-2, atol=1e-2), f"max abs err {max_err}"

    print("KERNEL_OK")
</pallas_src>

<mosaic_0001>
module attributes {stable_mosaic.version = 11 : i64} {
  func.func @phi_gru_kernel(%arg0: i32, %arg1: memref<8x64x2xbf16, #tpu.memory_space<vmem>>, %arg2: memref<32x64xbf16, #tpu.memory_space<vmem>>, %arg3: memref<32x1xf32, #tpu.memory_space<vmem>>, %arg4: memref<96x32xbf16, #tpu.memory_space<vmem>>, %arg5: memref<96x1xf32, #tpu.memory_space<vmem>>, %arg6: memref<96x32xbf16, #tpu.memory_space<vmem>>, %arg7: memref<32x1xf32, #tpu.memory_space<vmem>>, %arg8: memref<32x1xf32, #tpu.memory_space<vmem>>, %arg9: memref<1x1xf32, #tpu.memory_space<vmem>>, %arg10: memref<10x32xbf16, #tpu.memory_space<vmem>>, %arg11: memref<10x1xf32, #tpu.memory_space<vmem>>, %arg12: memref<10x2xf32, #tpu.memory_space<vmem>>, %arg13: memref<8x96x2xf32, #tpu.memory_space<vmem>>, %arg14: memref<8x32x2xf32, #tpu.memory_space<vmem>>) attributes {dimension_semantics = [#tpu.dimension_semantics<parallel>], iteration_bounds = array<i64: 1>, scalar_prefetch = 0 : i64, scratch_operands = 2 : i64, tpu.core_type = #tpu.core_type<tc>, window_params = [{transform_indices = @transform_0, window_bounds = array<i64: 8, 64, 2>}, {pipeline_mode = #tpu.pipeline_mode<synchronous>, transform_indices = @transform_1, window_bounds = array<i64: 32, 64>}, {pipeline_mode = #tpu.pipeline_mode<synchronous>, transform_indices = @transform_2, window_bounds = array<i64: 32, 1>}, {pipeline_mode = #tpu.pipeline_mode<synchronous>, transform_indices = @transform_3, window_bounds = array<i64: 96, 32>}, {pipeline_mode = #tpu.pipeline_mode<synchronous>, transform_indices = @transform_4, window_bounds = array<i64: 96, 1>}, {pipeline_mode = #tpu.pipeline_mode<synchronous>, transform_indices = @transform_5, window_bounds = array<i64: 96, 32>}, {pipeline_mode = #tpu.pipeline_mode<synchronous>, transform_indices = @transform_6, window_bounds = array<i64: 32, 1>}, {pipeline_mode = #tpu.pipeline_mode<synchronous>, transform_indices = @transform_7, window_bounds = array<i64: 32, 1>}, {pipeline_mode = #tpu.pipeline_mode<synchronous>, transform_indices = @transform_8, window_bounds = array<i64: 1, 1>}, {pipeline_mode = #tpu.pipeline_mode<synchronous>, transform_indices = @transform_9, window_bounds = array<i64: 10, 32>}, {pipeline_mode = #tpu.pipeline_mode<synchronous>, transform_indices = @transform_10, window_bounds = array<i64: 10, 1>}, {transform_indices = @transform_11, window_bounds = array<i64: 10, 2>}]} {
    %c0 = arith.constant 0 : index
    %c0_0 = arith.constant 0 : index
    %0 = vector.load %arg2[%c0, %c0_0] : memref<32x64xbf16, #tpu.memory_space<vmem>>, vector<32x64xbf16>
    %c0_1 = arith.constant 0 : index
    %c0_2 = arith.constant 0 : index
    %1 = vector.load %arg4[%c0_1, %c0_2] : memref<96x32xbf16, #tpu.memory_space<vmem>>, vector<96x32xbf16>
    %c0_3 = arith.constant 0 : index
    %c0_4 = arith.constant 0 : index
    %2 = vector.load %arg6[%c0_3, %c0_4] : memref<96x32xbf16, #tpu.memory_space<vmem>>, vector<96x32xbf16>
    %c0_5 = arith.constant 0 : index
    %c0_6 = arith.constant 0 : index
    %3 = vector.load %arg3[%c0_5, %c0_6] : memref<32x1xf32, #tpu.memory_space<vmem>>, vector<32x1xf32>
    %4 = vector.shape_cast %3 : vector<32x1xf32> to vector<32x1xf32>
    %5 = vector.broadcast %4 : vector<32x1xf32> to vector<32x2xf32>
    %c0_7 = arith.constant 0 : index
    %c0_8 = arith.constant 0 : index
    %6 = vector.load %arg5[%c0_7, %c0_8] : memref<96x1xf32, #tpu.memory_space<vmem>>, vector<96x1xf32>
    %7 = vector.shape_cast %6 : vector<96x1xf32> to vector<96x1xf32>
    %8 = vector.broadcast %7 : vector<96x1xf32> to vector<96x2xf32>
    %c0_9 = arith.constant 0 : index
    %c0_10 = arith.constant 0 : index
    %9 = vector.load %arg7[%c0_9, %c0_10] : memref<32x1xf32, #tpu.memory_space<vmem>>, vector<32x1xf32>
    %10 = vector.shape_cast %9 : vector<32x1xf32> to vector<32x1xf32>
    %11 = vector.broadcast %10 : vector<32x1xf32> to vector<32x2xf32>
    %c0_i32 = arith.constant 0 : i32
    %12 = arith.index_cast %c0_i32 : i32 to index
    %c0_11 = arith.constant 0 : index
    %c0_12 = arith.constant 0 : index
    %13 = vector.load %arg1[%12, %c0_11, %c0_12] : memref<8x64x2xbf16, #tpu.memory_space<vmem>>, vector<1x64x2xbf16>
    %14 = vector.shape_cast %13 : vector<1x64x2xbf16> to vector<64x2xbf16>
    %cst = arith.constant dense<0.000000e+00> : vector<32x2xf32>
    %15 = tpu.matmul %0, %14, %cst {dimension_numbers = #tpu.dot_dimension_numbers<[1], [0], [0], [1], [0, 0, 1, 1], [], []>} : vector<32x64xbf16>, vector<64x2xbf16>, vector<32x2xf32> -> vector<32x2xf32>
    %16 = arith.addf %15, %5 : vector<32x2xf32>
    %cst_13 = arith.constant 0.000000e+00 : f32
    %17 = vector.broadcast %cst_13 : f32 to vector<32x2xf32>
    %18 = arith.maximumf %16, %17 : vector<32x2xf32>
    %19 = arith.truncf %18 : vector<32x2xf32> to vector<32x2xbf16>
    %cst_14 = arith.constant dense<0.000000e+00> : vector<96x2xf32>
    %20 = tpu.matmul %1, %19, %cst_14 {dimension_numbers = #tpu.dot_dimension_numbers<[1], [0], [0], [1], [0, 0, 1, 1], [], []>} : vector<96x32xbf16>, vector<32x2xbf16>, vector<96x2xf32> -> vector<96x2xf32>
    %21 = arith.addf %20, %8 : vector<96x2xf32>
    %22 = arith.index_cast %c0_i32 : i32 to index
    %c0_15 = arith.constant 0 : index
    %c0_16 = arith.constant 0 : index
    %23 = vector.load %arg13[%22, %c0_15, %c0_16] : memref<8x96x2xf32, #tpu.memory_space<vmem>>, vector<1x96x2xf32>
    %24 = vector.shape_cast %23 : vector<1x96x2xf32> to vector<96x2xf32>
    %25 = vector.shape_cast %21 : vector<96x2xf32> to vector<1x96x2xf32>
    tpu.vector_store %arg13[%22, %c0_15, %c0_16], %25 {strides = array<i32>} : memref<8x96x2xf32, #tpu.memory_space<vmem>>, vector<1x96x2xf32>,
    %c1_i32 = arith.constant 1 : i32
    %26 = arith.index_cast %c1_i32 : i32 to index
    %c0_17 = arith.constant 0 : index
    %c0_18 = arith.constant 0 : index
    %27 = vector.load %arg1[%26, %c0_17, %c0_18] : memref<8x64x2xbf16, #tpu.memory_space<vmem>>, vector<1x64x2xbf16>
    %28 = vector.shape_cast %27 : vector<1x64x2xbf16> to vector<64x2xbf16>
    %cst_19 = arith.constant dense<0.000000e+00> : vector<32x2xf32>
    %29 = tpu.matmul %0, %28, %cst_19 {dimension_numbers = #tpu.dot_dimension_numbers<[1], [0], [0], [1], [0, 0, 1, 1], [], []>} : vector<32x64xbf16>, vector<64x2xbf16>, vector<32x2xf32> -> vector<32x2xf32>
    %30 = arith.addf %29, %5 : vector<32x2xf32>
    %cst_20 = arith.constant 0.000000e+00 : f32
    %31 = vector.broadcast %cst_20 : f32 to vector<32x2xf32>
    %32 = arith.maximumf %30, %31 : vector<32x2xf32>
    %33 = arith.truncf %32 : vector<32x2xf32> to vector<32x2xbf16>
    %cst_21 = arith.constant dense<0.000000e+00> : vector<96x2xf32>
    %34 = tpu.matmul %1, %33, %cst_21 {dimension_numbers = #tpu.dot_dimension_numbers<[1], [0], [0], [1], [0, 0, 1, 1], [], []>} : vector<96x32xbf16>, vector<32x2xbf16>, vector<96x2xf32> -> vector<96x2xf32>
    %35 = arith.addf %34, %8 : vector<96x2xf32>
    %36 = arith.index_cast %c1_i32 : i32 to index
    %c0_22 = arith.constant 0 : index
    %c0_23 = arith.constant 0 : index
    %37 = vector.load %arg13[%36, %c0_22, %c0_23] : memref<8x96x2xf32, #tpu.memory_space<vmem>>, vector<1x96x2xf32>
    %38 = vector.shape_cast %37 : vector<1x96x2xf32> to vector<96x2xf32>
    %39 = vector.shape_cast %35 : vector<96x2xf32> to vector<1x96x2xf32>
    tpu.vector_store %arg13[%36, %c0_22, %c0_23], %39 {strides = array<i32>} : memref<8x96x2xf32, #tpu.memory_space<vmem>>, vector<1x96x2xf32>,
    %c2_i32 = arith.constant 2 : i32
    %40 = arith.index_cast %c2_i32 : i32 to index
    %c0_24 = arith.constant 0 : index
    %c0_25 = arith.constant 0 : index
    %41 = vector.load %arg1[%40, %c0_24, %c0_25] : memref<8x64x2xbf16, #tpu.memory_space<vmem>>, vector<1x64x2xbf16>
    %42 = vector.shape_cast %41 : vector<1x64x2xbf16> to vector<64x2xbf16>
    %cst_26 = arith.constant dense<0.000000e+00> : vector<32x2xf32>
    %43 = tpu.matmul %0, %42, %cst_26 {dimension_numbers = #tpu.dot_dimension_numbers<[1], [0], [0], [1], [0, 0, 1, 1], [], []>} : vector<32x64xbf16>, vector<64x2xbf16>, vector<32x2xf32> -> vector<32x2xf32>
    %44 = arith.addf %43, %5 : vector<32x2xf32>
    %cst_27 = arith.constant 0.000000e+00 : f32
    %45 = vector.broadcast %cst_27 : f32 to vector<32x2xf32>
    %46 = arith.maximumf %44, %45 : vector<32x2xf32>
    %47 = arith.truncf %46 : vector<32x2xf32> to vector<32x2xbf16>
    %cst_28 = arith.constant dense<0.000000e+00> : vector<96x2xf32>
    %48 = tpu.matmul %1, %47, %cst_28 {dimension_numbers = #tpu.dot_dimension_numbers<[1], [0], [0], [1], [0, 0, 1, 1], [], []>} : vector<96x32xbf16>, vector<32x2xbf16>, vector<96x2xf32> -> vector<96x2xf32>
    %49 = arith.addf %48, %8 : vector<96x2xf32>
    %50 = arith.index_cast %c2_i32 : i32 to index
    %c0_29 = arith.constant 0 : index
    %c0_30 = arith.constant 0 : index
    %51 = vector.load %arg13[%50, %c0_29, %c0_30] : memref<8x96x2xf32, #tpu.memory_space<vmem>>, vector<1x96x2xf32>
    %52 = vector.shape_cast %51 : vector<1x96x2xf32> to vector<96x2xf32>
    %53 = vector.shape_cast %49 : vector<96x2xf32> to vector<1x96x2xf32>
    tpu.vector_store %arg13[%50, %c0_29, %c0_30], %53 {strides = array<i32>} : memref<8x96x2xf32, #tpu.memory_space<vmem>>, vector<1x96x2xf32>,
    %c3_i32 = arith.constant 3 : i32
    %54 = arith.index_cast %c3_i32 : i32 to index
    %c0_31 = arith.constant 0 : index
    %c0_32 = arith.constant 0 : index
    %55 = vector.load %arg1[%54, %c0_31, %c0_32] : memref<8x64x2xbf16, #tpu.memory_space<vmem>>, vector<1x64x2xbf16>
    %56 = vector.shape_cast %55 : vector<1x64x2xbf16> to vector<64x2xbf16>
    %cst_33 = arith.constant dense<0.000000e+00> : vector<32x2xf32>
    %57 = tpu.matmul %0, %56, %cst_33 {dimension_numbers = #tpu.dot_dimension_numbers<[1], [0], [0], [1], [0, 0, 1, 1], [], []>} : vector<32x64xbf16>, vector<64x2xbf16>, vector<32x2xf32> -> vector<32x2xf32>
    %58 = arith.addf %57, %5 : vector<32x2xf32>
    %cst_34 = arith.constant 0.000000e+00 : f32
    %59 = vector.broadcast %cst_34 : f32 to vector<32x2xf32>
    %60 = arith.maximumf %58, %59 : vector<32x2xf32>
    %61 = arith.truncf %60 : vector<32x2xf32> to vector<32x2xbf16>
    %cst_35 = arith.constant dense<0.000000e+00> : vector<96x2xf32>
    %62 = tpu.matmul %1, %61, %cst_35 {dimension_numbers = #tpu.dot_dimension_numbers<[1], [0], [0], [1], [0, 0, 1, 1], [], []>} : vector<96x32xbf16>, vector<32x2xbf16>, vector<96x2xf32> -> vector<96x2xf32>
    %63 = arith.addf %62, %8 : vector<96x2xf32>
    %64 = arith.index_cast %c3_i32 : i32 to index
    %c0_36 = arith.constant 0 : index
    %c0_37 = arith.constant 0 : index
    %65 = vector.load %arg13[%64, %c0_36, %c0_37] : memref<8x96x2xf32, #tpu.memory_space<vmem>>, vector<1x96x2xf32>
    %66 = vector.shape_cast %65 : vector<1x96x2xf32> to vector<96x2xf32>
    %67 = vector.shape_cast %63 : vector<96x2xf32> to vector<1x96x2xf32>
    tpu.vector_store %arg13[%64, %c0_36, %c0_37], %67 {strides = array<i32>} : memref<8x96x2xf32, #tpu.memory_space<vmem>>, vector<1x96x2xf32>,
    %c4_i32 = arith.constant 4 : i32
    %68 = arith.index_cast %c4_i32 : i32 to index
    %c0_38 = arith.constant 0 : index
    %c0_39 = arith.constant 0 : index
    %69 = vector.load %arg1[%68, %c0_38, %c0_39] : memref<8x64x2xbf16, #tpu.memory_space<vmem>>, vector<1x64x2xbf16>
    %70 = vector.shape_cast %69 : vector<1x64x2xbf16> to vector<64x2xbf16>
    %cst_40 = arith.constant dense<0.000000e+00> : vector<32x2xf32>
    %71 = tpu.matmul %0, %70, %cst_40 {dimension_numbers = #tpu.dot_dimension_numbers<[1], [0], [0], [1], [0, 0, 1, 1], [], []>} : vector<32x64xbf16>, vector<64x2xbf16>, vector<32x2xf32> -> vector<32x2xf32>
    %72 = arith.addf %71, %5 : vector<32x2xf32>
    %cst_41 = arith.constant 0.000000e+00 : f32
    %73 = vector.broadcast %cst_41 : f32 to vector<32x2xf32>
    %74 = arith.maximumf %72, %73 : vector<32x2xf32>
    %75 = arith.truncf %74 : vector<32x2xf32> to vector<32x2xbf16>
    %cst_42 = arith.constant dense<0.000000e+00> : vector<96x2xf32>
    %76 = tpu.matmul %1, %75, %cst_42 {dimension_numbers = #tpu.dot_dimension_numbers<[1], [0], [0], [1], [0, 0, 1, 1], [], []>} : vector<96x32xbf16>, vector<32x2xbf16>, vector<96x2xf32> -> vector<96x2xf32>
    %77 = arith.addf %76, %8 : vector<96x2xf32>
    %78 = arith.index_cast %c4_i32 : i32 to index
    %c0_43 = arith.constant 0 : index
    %c0_44 = arith.constant 0 : index
    %79 = vector.load %arg13[%78, %c0_43, %c0_44] : memref<8x96x2xf32, #tpu.memory_space<vmem>>, vector<1x96x2xf32>
    %80 = vector.shape_cast %79 : vector<1x96x2xf32> to vector<96x2xf32>
    %81 = vector.shape_cast %77 : vector<96x2xf32> to vector<1x96x2xf32>
    tpu.vector_store %arg13[%78, %c0_43, %c0_44], %81 {strides = array<i32>} : memref<8x96x2xf32, #tpu.memory_space<vmem>>, vector<1x96x2xf32>,
    %c5_i32 = arith.constant 5 : i32
    %82 = arith.index_cast %c5_i32 : i32 to index
    %c0_45 = arith.constant 0 : index
    %c0_46 = arith.constant 0 : index
    %83 = vector.load %arg1[%82, %c0_45, %c0_46] : memref<8x64x2xbf16, #tpu.memory_space<vmem>>, vector<1x64x2xbf16>
    %84 = vector.shape_cast %83 : vector<1x64x2xbf16> to vector<64x2xbf16>
    %cst_47 = arith.constant dense<0.000000e+00> : vector<32x2xf32>
    %85 = tpu.matmul %0, %84, %cst_47 {dimension_numbers = #tpu.dot_dimension_numbers<[1], [0], [0], [1], [0, 0, 1, 1], [], []>} : vector<32x64xbf16>, vector<64x2xbf16>, vector<32x2xf32> -> vector<32x2xf32>
    %86 = arith.addf %85, %5 : vector<32x2xf32>
    %cst_48 = arith.constant 0.000000e+00 : f32
    %87 = vector.broadcast %cst_48 : f32 to vector<32x2xf32>
    %88 = arith.maximumf %86, %87 : vector<32x2xf32>
    %89 = arith.truncf %88 : vector<32x2xf32> to vector<32x2xbf16>
    %cst_49 = arith.constant dense<0.000000e+00> : vector<96x2xf32>
    %90 = tpu.matmul %1, %89, %cst_49 {dimension_numbers = #tpu.dot_dimension_numbers<[1], [0], [0], [1], [0, 0, 1, 1], [], []>} : vector<96x32xbf16>, vector<32x2xbf16>, vector<96x2xf32> -> vector<96x2xf32>
    %91 = arith.addf %90, %8 : vector<96x2xf32>
    %92 = arith.index_cast %c5_i32 : i32 to index
    %c0_50 = arith.constant 0 : index
    %c0_51 = arith.constant 0 : index
    %93 = vector.load %arg13[%92, %c0_50, %c0_51] : memref<8x96x2xf32, #tpu.memory_space<vmem>>, vector<1x96x2xf32>
    %94 = vector.shape_cast %93 : vector<1x96x2xf32> to vector<96x2xf32>
    %95 = vector.shape_cast %91 : vector<96x2xf32> to vector<1x96x2xf32>
    tpu.vector_store %arg13[%92, %c0_50, %c0_51], %95 {strides = array<i32>} : memref<8x96x2xf32, #tpu.memory_space<vmem>>, vector<1x96x2xf32>,
    %c6_i32 = arith.constant 6 : i32
    %96 = arith.index_cast %c6_i32 : i32 to index
    %c0_52 = arith.constant 0 : index
    %c0_53 = arith.constant 0 : index
    %97 = vector.load %arg1[%96, %c0_52, %c0_53] : memref<8x64x2xbf16, #tpu.memory_space<vmem>>, vector<1x64x2xbf16>
    %98 = vector.shape_cast %97 : vector<1x64x2xbf16> to vector<64x2xbf16>
    %cst_54 = arith.constant dense<0.000000e+00> : vector<32x2xf32>
    %99 = tpu.matmul %0, %98, %cst_54 {dimension_numbers = #tpu.dot_dimension_numbers<[1], [0], [0], [1], [0, 0, 1, 1], [], []>} : vector<32x64xbf16>, vector<64x2xbf16>, vector<32x2xf32> -> vector<32x2xf32>
    %100 = arith.addf %99, %5 : vector<32x2xf32>
    %cst_55 = arith.constant 0.000000e+00 : f32
    %101 = vector.broadcast %cst_55 : f32 to vector<32x2xf32>
    %102 = arith.maximumf %100, %101 : vector<32x2xf32>
    %103 = arith.truncf %102 : vector<32x2xf32> to vector<32x2xbf16>
    %cst_56 = arith.constant dense<0.000000e+00> : vector<96x2xf32>
    %104 = tpu.matmul %1, %103, %cst_56 {dimension_numbers = #tpu.dot_dimension_numbers<[1], [0], [0], [1], [0, 0, 1, 1], [], []>} : vector<96x32xbf16>, vector<32x2xbf16>, vector<96x2xf32> -> vector<96x2xf32>
    %105 = arith.addf %104, %8 : vector<96x2xf32>
    %106 = arith.index_cast %c6_i32 : i32 to index
    %c0_57 = arith.constant 0 : index
    %c0_58 = arith.constant 0 : index
    %107 = vector.load %arg13[%106, %c0_57, %c0_58] : memref<8x96x2xf32, #tpu.memory_space<vmem>>, vector<1x96x2xf32>
    %108 = vector.shape_cast %107 : vector<1x96x2xf32> to vector<96x2xf32>
    %109 = vector.shape_cast %105 : vector<96x2xf32> to vector<1x96x2xf32>
    tpu.vector_store %arg13[%106, %c0_57, %c0_58], %109 {strides = array<i32>} : memref<8x96x2xf32, #tpu.memory_space<vmem>>, vector<1x96x2xf32>,
    %c7_i32 = arith.constant 7 : i32
    %110 = arith.index_cast %c7_i32 : i32 to index
    %c0_59 = arith.constant 0 : index
    %c0_60 = arith.constant 0 : index
    %111 = vector.load %arg1[%110, %c0_59, %c0_60] : memref<8x64x2xbf16, #tpu.memory_space<vmem>>, vector<1x64x2xbf16>
    %112 = vector.shape_cast %111 : vector<1x64x2xbf16> to vector<64x2xbf16>
    %cst_61 = arith.constant dense<0.000000e+00> : vector<32x2xf32>
    %113 = tpu.matmul %0, %112, %cst_61 {dimension_numbers = #tpu.dot_dimension_numbers<[1], [0], [0], [1], [0, 0, 1, 1], [], []>} : vector<32x64xbf16>, vector<64x2xbf16>, vector<32x2xf32> -> vector<32x2xf32>
    %114 = arith.addf %113, %5 : vector<32x2xf32>
    %cst_62 = arith.constant 0.000000e+00 : f32
    %115 = vector.broadcast %cst_62 : f32 to vector<32x2xf32>
    %116 = arith.maximumf %114, %115 : vector<32x2xf32>
    %117 = arith.truncf %116 : vector<32x2xf32> to vector<32x2xbf16>
    %cst_63 = arith.constant dense<0.000000e+00> : vector<96x2xf32>
    %118 = tpu.matmul %1, %117, %cst_63 {dimension_numbers = #tpu.dot_dimension_numbers<[1], [0], [0], [1], [0, 0, 1, 1], [], []>} : vector<96x32xbf16>, vector<32x2xbf16>, vector<96x2xf32> -> vector<96x2xf32>
    %119 = arith.addf %118, %8 : vector<96x2xf32>
    %120 = arith.index_cast %c7_i32 : i32 to index
    %c0_64 = arith.constant 0 : index
    %c0_65 = arith.constant 0 : index
    %121 = vector.load %arg13[%120, %c0_64, %c0_65] : memref<8x96x2xf32, #tpu.memory_space<vmem>>, vector<1x96x2xf32>
    %122 = vector.shape_cast %121 : vector<1x96x2xf32> to vector<96x2xf32>
    %123 = vector.shape_cast %119 : vector<96x2xf32> to vector<1x96x2xf32>
    tpu.vector_store %arg13[%120, %c0_64, %c0_65], %123 {strides = array<i32>} : memref<8x96x2xf32, #tpu.memory_space<vmem>>, vector<1x96x2xf32>,
    %c8_i32 = arith.constant 8 : i32
    %cst_66 = arith.constant 0.000000e+00 : f32
    %124 = vector.broadcast %cst_66 : f32 to vector<32x2xf32>
    %c0_i32_67 = arith.constant 0 : i32
    %125 = arith.index_cast %c0_i32_67 : i32 to index
    %c0_68 = arith.constant 0 : index
    %c0_69 = arith.constant 0 : index
    %126 = vector.load %arg13[%125, %c0_68, %c0_69] : memref<8x96x2xf32, #tpu.memory_space<vmem>>, vector<1x96x2xf32>
    %127 = vector.shape_cast %126 : vector<1x96x2xf32> to vector<96x2xf32>
    %128 = arith.truncf %124 : vector<32x2xf32> to vector<32x2xbf16>
    %cst_70 = arith.constant dense<0.000000e+00> : vector<96x2xf32>
    %129 = tpu.matmul %2, %128, %cst_70 {dimension_numbers = #tpu.dot_dimension_numbers<[1], [0], [0], [1], [0, 0, 1, 1], [], []>} : vector<96x32xbf16>, vector<32x2xbf16>, vector<96x2xf32> -> vector<96x2xf32>
    %130 = vector.extract_strided_slice %127 {offsets = [0, 0], sizes = [32, 2], strides = [1, 1]} : vector<96x2xf32> to vector<32x2xf32>
    %131 = vector.extract_strided_slice %129 {offsets = [0, 0], sizes = [32, 2], strides = [1, 1]} : vector<96x2xf32> to vector<32x2xf32>
    %132 = arith.addf %130, %131 : vector<32x2xf32>
    %cst_71 = arith.constant 5.000000e-01 : f32
    %133 = vector.broadcast %cst_71 : f32 to vector<32x2xf32>
    %134 = arith.mulf %133, %132 : vector<32x2xf32>
    %135 = math.tanh %134 : vector<32x2xf32>
    %cst_72 = arith.constant 1.000000e+00 : f32
    %136 = vector.broadcast %cst_72 : f32 to vector<32x2xf32>
    %137 = arith.addf %135, %136 : vector<32x2xf32>
    %cst_73 = arith.constant 5.000000e-01 : f32
    %138 = vector.broadcast %cst_73 : f32 to vector<32x2xf32>
    %139 = arith.mulf %138, %137 : vector<32x2xf32>
    %140 = vector.extract_strided_slice %127 {offsets = [32, 0], sizes = [32, 2], strides = [1, 1]} : vector<96x2xf32> to vector<32x2xf32>
    %141 = vector.extract_strided_slice %129 {offsets = [32, 0], sizes = [32, 2], strides = [1, 1]} : vector<96x2xf32> to vector<32x2xf32>
    %142 = arith.addf %140, %141 : vector<32x2xf32>
    %cst_74 = arith.constant 5.000000e-01 : f32
    %143 = vector.broadcast %cst_74 : f32 to vector<32x2xf32>
    %144 = arith.mulf %143, %142 : vector<32x2xf32>
    %145 = math.tanh %144 : vector<32x2xf32>
    %cst_75 = arith.constant 1.000000e+00 : f32
    %146 = vector.broadcast %cst_75 : f32 to vector<32x2xf32>
    %147 = arith.addf %145, %146 : vector<32x2xf32>
    %cst_76 = arith.constant 5.000000e-01 : f32
    %148 = vector.broadcast %cst_76 : f32 to vector<32x2xf32>
    %149 = arith.mulf %148, %147 : vector<32x2xf32>
    %150 = vector.extract_strided_slice %127 {offsets = [64, 0], sizes = [32, 2], strides = [1, 1]} : vector<96x2xf32> to vector<32x2xf32>
    %151 = vector.extract_strided_slice %129 {offsets = [64, 0], sizes = [32, 2], strides = [1, 1]} : vector<96x2xf32> to vector<32x2xf32>
    %152 = arith.addf %151, %11 : vector<32x2xf32>
    %153 = arith.mulf %139, %152 : vector<32x2xf32>
    %154 = arith.addf %150, %153 : vector<32x2xf32>
    %155 = math.tanh %154 : vector<32x2xf32>
    %cst_77 = arith.constant 1.000000e+00 : f32
    %156 = vector.broadcast %cst_77 : f32 to vector<32x2xf32>
    %157 = arith.subf %156, %149 : vector<32x2xf32>
    %158 = arith.mulf %157, %155 : vector<32x2xf32>
    %159 = arith.mulf %149, %124 : vector<32x2xf32>
    %160 = arith.addf %158, %159 : vector<32x2xf32>
    %161 = arith.index_cast %c0_i32_67 : i32 to index
    %c0_78 = arith.constant 0 : index
    %c0_79 = arith.constant 0 : index
    %162 = vector.load %arg14[%161, %c0_78, %c0_79] : memref<8x32x2xf32, #tpu.memory_space<vmem>>, vector<1x32x2xf32>
    %163 = vector.shape_cast %162 : vector<1x32x2xf32> to vector<32x2xf32>
    %164 = vector.shape_cast %160 : vector<32x2xf32> to vector<1x32x2xf32>
    tpu.vector_store %arg14[%161, %c0_78, %c0_79], %164 {strides = array<i32>} : memref<8x32x2xf32, #tpu.memory_space<vmem>>, vector<1x32x2xf32>,
    %c1_i32_80 = arith.constant 1 : i32
    %165 = arith.index_cast %c1_i32_80 : i32 to index
    %c0_81 = arith.constant 0 : index
    %c0_82 = arith.constant 0 : index
    %166 = vector.load %arg13[%165, %c0_81, %c0_82] : memref<8x96x2xf32, #tpu.memory_space<vmem>>, vector<1x96x2xf32>
    %167 = vector.shape_cast %166 : vector<1x96x2xf32> to vector<96x2xf32>
    %168 = arith.truncf %160 : vector<32x2xf32> to vector<32x2xbf16>
    %cst_83 = arith.constant dense<0.000000e+00> : vector<96x2xf32>
    %169 = tpu.matmul %2, %168, %cst_83 {dimension_numbers = #tpu.dot_dimension_numbers<[1], [0], [0], [1], [0, 0, 1, 1], [], []>} : vector<96x32xbf16>, vector<32x2xbf16>, vector<96x2xf32> -> vector<96x2xf32>
    %170 = vector.extract_strided_slice %167 {offsets = [0, 0], sizes = [32, 2], strides = [1, 1]} : vector<96x2xf32> to vector<32x2xf32>
    %171 = vector.extract_strided_slice %169 {offsets = [0, 0], sizes = [32, 2], strides = [1, 1]} : vector<96x2xf32> to vector<32x2xf32>
    %172 = arith.addf %170, %171 : vector<32x2xf32>
    %cst_84 = arith.constant 5.000000e-01 : f32
    %173 = vector.broadcast %cst_84 : f32 to vector<32x2xf32>
    %174 = arith.mulf %173, %172 : vector<32x2xf32>
    %175 = math.tanh %174 : vector<32x2xf32>
    %cst_85 = arith.constant 1.000000e+00 : f32
    %176 = vector.broadcast %cst_85 : f32 to vector<32x2xf32>
    %177 = arith.addf %175, %176 : vector<32x2xf32>
    %cst_86 = arith.constant 5.000000e-01 : f32
    %178 = vector.broadcast %cst_86 : f32 to vector<32x2xf32>
    %179 = arith.mulf %178, %177 : vector<32x2xf32>
    %180 = vector.extract_strided_slice %167 {offsets = [32, 0], sizes = [32, 2], strides = [1, 1]} : vector<96x2xf32> to vector<32x2xf32>
    %181 = vector.extract_strided_slice %169 {offsets = [32, 0], sizes = [32, 2], strides = [1, 1]} : vector<96x2xf32> to vector<32x2xf32>
    %182 = arith.addf %180, %181 : vector<32x2xf32>
    %cst_87 = arith.constant 5.000000e-01 : f32
    %183 = vector.broadcast %cst_87 : f32 to vector<32x2xf32>
    %184 = arith.mulf %183, %182 : vector<32x2xf32>
    %185 = math.tanh %184 : vector<32x2xf32>
    %cst_88 = arith.constant 1.000000e+00 : f32
    %186 = vector.broadcast %cst_88 : f32 to vector<32x2xf32>
    %187 = arith.addf %185, %186 : vector<32x2xf32>
    %cst_89 = arith.constant 5.000000e-01 : f32
    %188 = vector.broadcast %cst_89 : f32 to vector<32x2xf32>
    %189 = arith.mulf %188, %187 : vector<32x2xf32>
    %190 = vector.extract_strided_slice %167 {offsets = [64, 0], sizes = [32, 2], strides = [1, 1]} : vector<96x2xf32> to vector<32x2xf32>
    %191 = vector.extract_strided_slice %169 {offsets = [64, 0], sizes = [32, 2], strides = [1, 1]} : vector<96x2xf32> to vector<32x2xf32>
    %192 = arith.addf %191, %11 : vector<32x2xf32>
    %193 = arith.mulf %179, %192 : vector<32x2xf32>
    %194 = arith.addf %190, %193 : vector<32x2xf32>
    %195 = math.tanh %194 : vector<32x2xf32>
    %cst_90 = arith.constant 1.000000e+00 : f32
    %196 = vector.broadcast %cst_90 : f32 to vector<32x2xf32>
    %197 = arith.subf %196, %189 : vector<32x2xf32>
    %198 = arith.mulf %197, %195 : vector<32x2xf32>
    %199 = arith.mulf %189, %160 : vector<32x2xf32>
    %200 = arith.addf %198, %199 : vector<32x2xf32>
    %201 = arith.index_cast %c1_i32_80 : i32 to index
    %c0_91 = arith.constant 0 : index
    %c0_92 = arith.constant 0 : index
    %202 = vector.load %arg14[%201, %c0_91, %c0_92] : memref<8x32x2xf32, #tpu.memory_space<vmem>>, vector<1x32x2xf32>
    %203 = vector.shape_cast %202 : vector<1x32x2xf32> to vector<32x2xf32>
    %204 = vector.shape_cast %200 : vector<32x2xf32> to vector<1x32x2xf32>
    tpu.vector_store %arg14[%201, %c0_91, %c0_92], %204 {strides = array<i32>} : memref<8x32x2xf32, #tpu.memory_space<vmem>>, vector<1x32x2xf32>,
    %c2_i32_93 = arith.constant 2 : i32
    %205 = arith.index_cast %c2_i32_93 : i32 to index
    %c0_94 = arith.constant 0 : index
    %c0_95 = arith.constant 0 : index
    %206 = vector.load %arg13[%205, %c0_94, %c0_95] : memref<8x96x2xf32, #tpu.memory_space<vmem>>, vector<1x96x2xf32>
    %207 = vector.shape_cast %206 : vector<1x96x2xf32> to vector<96x2xf32>
    %208 = arith.truncf %200 : vector<32x2xf32> to vector<32x2xbf16>
    %cst_96 = arith.constant dense<0.000000e+00> : vector<96x2xf32>
    %209 = tpu.matmul %2, %208, %cst_96 {dimension_numbers = #tpu.dot_dimension_numbers<[1], [0], [0], [1], [0, 0, 1, 1], [], []>} : vector<96x32xbf16>, vector<32x2xbf16>, vector<96x2xf32> -> vector<96x2xf32>
    %210 = vector.extract_strided_slice %207 {offsets = [0, 0], sizes = [32, 2], strides = [1, 1]} : vector<96x2xf32> to vector<32x2xf32>
    %211 = vector.extract_strided_slice %209 {offsets = [0, 0], sizes = [32, 2], strides = [1, 1]} : vector<96x2xf32> to vector<32x2xf32>
    %212 = arith.addf %210, %211 : vector<32x2xf32>
    %cst_97 = arith.constant 5.000000e-01 : f32
    %213 = vector.broadcast %cst_97 : f32 to vector<32x2xf32>
    %214 = arith.mulf %213, %212 : vector<32x2xf32>
    %215 = math.tanh %214 : vector<32x2xf32>
    %cst_98 = arith.constant 1.000000e+00 : f32
    %216 = vector.broadcast %cst_98 : f32 to vector<32x2xf32>
    %217 = arith.addf %215, %216 : vector<32x2xf32>
    %cst_99 = arith.constant 5.000000e-01 : f32
    %218 = vector.broadcast %cst_99 : f32 to vector<32x2xf32>
    %219 = arith.mulf %218, %217 : vector<32x2xf32>
    %220 = vector.extract_strided_slice %207 {offsets = [32, 0], sizes = [32, 2], strides = [1, 1]} : vector<96x2xf32> to vector<32x2xf32>
    %221 = vector.extract_strided_slice %209 {offsets = [32, 0], sizes = [32, 2], strides = [1, 1]} : vector<96x2xf32> to vector<32x2xf32>
    %222 = arith.addf %220, %221 : vector<32x2xf32>
    %cst_100 = arith.constant 5.000000e-01 : f32
    %223 = vector.broadcast %cst_100 : f32 to vector<32x2xf32>
    %224 = arith.mulf %223, %222 : vector<32x2xf32>
    %225 = math.tanh %224 : vector<32x2xf32>
    %cst_101 = arith.constant 1.000000e+00 : f32
    %226 = vector.broadcast %cst_101 : f32 to vector<32x2xf32>
    %227 = arith.addf %225, %226 : vector<32x2xf32>
    %cst_102 = arith.constant 5.000000e-01 : f32
    %228 = vector.broadcast %cst_102 : f32 to vector<32x2xf32>
    %229 = arith.mulf %228, %227 : vector<32x2xf32>
    %230 = vector.extract_strided_slice %207 {offsets = [64, 0], sizes = [32, 2], strides = [1, 1]} : vector<96x2xf32> to vector<32x2xf32>
    %231 = vector.extract_strided_slice %209 {offsets = [64, 0], sizes = [32, 2], strides = [1, 1]} : vector<96x2xf32> to vector<32x2xf32>
    %232 = arith.addf %231, %11 : vector<32x2xf32>
    %233 = arith.mulf %219, %232 : vector<32x2xf32>
    %234 = arith.addf %230, %233 : vector<32x2xf32>
    %235 = math.tanh %234 : vector<32x2xf32>
    %cst_103 = arith.constant 1.000000e+00 : f32
    %236 = vector.broadcast %cst_103 : f32 to vector<32x2xf32>
    %237 = arith.subf %236, %229 : vector<32x2xf32>
    %238 = arith.mulf %237, %235 : vector<32x2xf32>
    %239 = arith.mulf %229, %200 : vector<32x2xf32>
    %240 = arith.addf %238, %239 : vector<32x2xf32>
    %241 = arith.index_cast %c2_i32_93 : i32 to index
    %c0_104 = arith.constant 0 : index
    %c0_105 = arith.constant 0 : index
    %242 = vector.load %arg14[%241, %c0_104, %c0_105] : memref<8x32x2xf32, #tpu.memory_space<vmem>>, vector<1x32x2xf32>
    %243 = vector.shape_cast %242 : vector<1x32x2xf32> to vector<32x2xf32>
    %244 = vector.shape_cast %240 : vector<32x2xf32> to vector<1x32x2xf32>
    tpu.vector_store %arg14[%241, %c0_104, %c0_105], %244 {strides = array<i32>} : memref<8x32x2xf32, #tpu.memory_space<vmem>>, vector<1x32x2xf32>,
    %c3_i32_106 = arith.constant 3 : i32
    %245 = arith.index_cast %c3_i32_106 : i32 to index
    %c0_107 = arith.constant 0 : index
    %c0_108 = arith.constant 0 : index
    %246 = vector.load %arg13[%245, %c0_107, %c0_108] : memref<8x96x2xf32, #tpu.memory_space<vmem>>, vector<1x96x2xf32>
    %247 = vector.shape_cast %246 : vector<1x96x2xf32> to vector<96x2xf32>
    %248 = arith.truncf %240 : vector<32x2xf32> to vector<32x2xbf16>
    %cst_109 = arith.constant dense<0.000000e+00> : vector<96x2xf32>
    %249 = tpu.matmul %2, %248, %cst_109 {dimension_numbers = #tpu.dot_dimension_numbers<[1], [0], [0], [1], [0, 0, 1, 1], [], []>} : vector<96x32xbf16>, vector<32x2xbf16>, vector<96x2xf32> -> vector<96x2xf32>
    %250 = vector.extract_strided_slice %247 {offsets = [0, 0], sizes = [32, 2], strides = [1, 1]} : vector<96x2xf32> to vector<32x2xf32>
    %251 = vector.extract_strided_slice %249 {offsets = [0, 0], sizes = [32, 2], strides = [1, 1]} : vector<96x2xf32> to vector<32x2xf32>
    %252 = arith.addf %250, %251 : vector<32x2xf32>
    %cst_110 = arith.constant 5.000000e-01 : f32
    %253 = vector.broadcast %cst_110 : f32 to vector<32x2xf32>
    %254 = arith.mulf %253, %252 : vector<32x2xf32>
    %255 = math.tanh %254 : vector<32x2xf32>
    %cst_111 = arith.constant 1.000000e+00 : f32
    %256 = vector.broadcast %cst_111 : f32 to vector<32x2xf32>
    %257 = arith.addf %255, %256 : vector<32x2xf32>
    %cst_112 = arith.constant 5.000000e-01 : f32
    %258 = vector.broadcast %cst_112 : f32 to vector<32x2xf32>
    %259 = arith.mulf %258, %257 : vector<32x2xf32>
    %260 = vector.extract_strided_slice %247 {offsets = [32, 0], sizes = [32, 2], strides = [1, 1]} : vector<96x2xf32> to vector<32x2xf32>
    %261 = vector.extract_strided_slice %249 {offsets = [32, 0], sizes = [32, 2], strides = [1, 1]} : vector<96x2xf32> to vector<32x2xf32>
    %262 = arith.addf %260, %261 : vector<32x2xf32>
    %cst_113 = arith.constant 5.000000e-01 : f32
    %263 = vector.broadcast %cst_113 : f32 to vector<32x2xf32>
    %264 = arith.mulf %263, %262 : vector<32x2xf32>
    %265 = math.tanh %264 : vector<32x2xf32>
    %cst_114 = arith.constant 1.000000e+00 : f32
    %266 = vector.broadcast %cst_114 : f32 to vector<32x2xf32>
    %267 = arith.addf %265, %266 : vector<32x2xf32>
    %cst_115 = arith.constant 5.000000e-01 : f32
    %268 = vector.broadcast %cst_115 : f32 to vector<32x2xf32>
    %269 = arith.mulf %268, %267 : vector<32x2xf32>
    %270 = vector.extract_strided_slice %247 {offsets = [64, 0], sizes = [32, 2], strides = [1, 1]} : vector<96x2xf32> to vector<32x2xf32>
    %271 = vector.extract_strided_slice %249 {offsets = [64, 0], sizes = [32, 2], strides = [1, 1]} : vector<96x2xf32> to vector<32x2xf32>
    %272 = arith.addf %271, %11 : vector<32x2xf32>
    %273 = arith.mulf %259, %272 : vector<32x2xf32>
    %274 = arith.addf %270, %273 : vector<32x2xf32>
    %275 = math.tanh %274 : vector<32x2xf32>
    %cst_116 = arith.constant 1.000000e+00 : f32
    %276 = vector.broadcast %cst_116 : f32 to vector<32x2xf32>
    %277 = arith.subf %276, %269 : vector<32x2xf32>
    %278 = arith.mulf %277, %275 : vector<32x2xf32>
    %279 = arith.mulf %269, %240 : vector<32x2xf32>
    %280 = arith.addf %278, %279 : vector<32x2xf32>
    %281 = arith.index_cast %c3_i32_106 : i32 to index
    %c0_117 = arith.constant 0 : index
    %c0_118 = arith.constant 0 : index
    %282 = vector.load %arg14[%281, %c0_117, %c0_118] : memref<8x32x2xf32, #tpu.memory_space<vmem>>, vector<1x32x2xf32>
    %283 = vector.shape_cast %282 : vector<1x32x2xf32> to vector<32x2xf32>
    %284 = vector.shape_cast %280 : vector<32x2xf32> to vector<1x32x2xf32>
    tpu.vector_store %arg14[%281, %c0_117, %c0_118], %284 {strides = array<i32>} : memref<8x32x2xf32, #tpu.memory_space<vmem>>, vector<1x32x2xf32>,
    %c4_i32_119 = arith.constant 4 : i32
    %285 = arith.index_cast %c4_i32_119 : i32 to index
    %c0_120 = arith.constant 0 : index
    %c0_121 = arith.constant 0 : index
    %286 = vector.load %arg13[%285, %c0_120, %c0_121] : memref<8x96x2xf32, #tpu.memory_space<vmem>>, vector<1x96x2xf32>
    %287 = vector.shape_cast %286 : vector<1x96x2xf32> to vector<96x2xf32>
    %288 = arith.truncf %280 : vector<32x2xf32> to vector<32x2xbf16>
    %cst_122 = arith.constant dense<0.000000e+00> : vector<96x2xf32>
    %289 = tpu.matmul %2, %288, %cst_122 {dimension_numbers = #tpu.dot_dimension_numbers<[1], [0], [0], [1], [0, 0, 1, 1], [], []>} : vector<96x32xbf16>, vector<32x2xbf16>, vector<96x2xf32> -> vector<96x2xf32>
    %290 = vector.extract_strided_slice %287 {offsets = [0, 0], sizes = [32, 2], strides = [1, 1]} : vector<96x2xf32> to vector<32x2xf32>
    %291 = vector.extract_strided_slice %289 {offsets = [0, 0], sizes = [32, 2], strides = [1, 1]} : vector<96x2xf32> to vector<32x2xf32>
    %292 = arith.addf %290, %291 : vector<32x2xf32>
    %cst_123 = arith.constant 5.000000e-01 : f32
    %293 = vector.broadcast %cst_123 : f32 to vector<32x2xf32>
    %294 = arith.mulf %293, %292 : vector<32x2xf32>
    %295 = math.tanh %294 : vector<32x2xf32>
    %cst_124 = arith.constant 1.000000e+00 : f32
    %296 = vector.broadcast %cst_124 : f32 to vector<32x2xf32>
    %297 = arith.addf %295, %296 : vector<32x2xf32>
    %cst_125 = arith.constant 5.000000e-01 : f32
    %298 = vector.broadcast %cst_125 : f32 to vector<32x2xf32>
    %299 = arith.mulf %298, %297 : vector<32x2xf32>
    %300 = vector.extract_strided_slice %287 {offsets = [32, 0], sizes = [32, 2], strides = [1, 1]} : vector<96x2xf32> to vector<32x2xf32>
    %301 = vector.extract_strided_slice %289 {offsets = [32, 0], sizes = [32, 2], strides = [1, 1]} : vector<96x2xf32> to vector<32x2xf32>
    %302 = arith.addf %300, %301 : vector<32x2xf32>
    %cst_126 = arith.constant 5.000000e-01 : f32
    %303 = vector.broadcast %cst_126 : f32 to vector<32x2xf32>
    %304 = arith.mulf %303, %302 : vector<32x2xf32>
    %305 = math.tanh %304 : vector<32x2xf32>
    %cst_127 = arith.constant 1.000000e+00 : f32
    %306 = vector.broadcast %cst_127 : f32 to vector<32x2xf32>
    %307 = arith.addf %305, %306 : vector<32x2xf32>
    %cst_128 = arith.constant 5.000000e-01 : f32
    %308 = vector.broadcast %cst_128 : f32 to vector<32x2xf32>
    %309 = arith.mulf %308, %307 : vector<32x2xf32>
    %310 = vector.extract_strided_slice %287 {offsets = [64, 0], sizes = [32, 2], strides = [1, 1]} : vector<96x2xf32> to vector<32x2xf32>
    %311 = vector.extract_strided_slice %289 {offsets = [64, 0], sizes = [32, 2], strides = [1, 1]} : vector<96x2xf32> to vector<32x2xf32>
    %312 = arith.addf %311, %11 : vector<32x2xf32>
    %313 = arith.mulf %299, %312 : vector<32x2xf32>
    %314 = arith.addf %310, %313 : vector<32x2xf32>
    %315 = math.tanh %314 : vector<32x2xf32>
    %cst_129 = arith.constant 1.000000e+00 : f32
    %316 = vector.broadcast %cst_129 : f32 to vector<32x2xf32>
    %317 = arith.subf %316, %309 : vector<32x2xf32>
    %318 = arith.mulf %317, %315 : vector<32x2xf32>
    %319 = arith.mulf %309, %280 : vector<32x2xf32>
    %320 = arith.addf %318, %319 : vector<32x2xf32>
    %321 = arith.index_cast %c4_i32_119 : i32 to index
    %c0_130 = arith.constant 0 : index
    %c0_131 = arith.constant 0 : index
    %322 = vector.load %arg14[%321, %c0_130, %c0_131] : memref<8x32x2xf32, #tpu.memory_space<vmem>>, vector<1x32x2xf32>
    %323 = vector.shape_cast %322 : vector<1x32x2xf32> to vector<32x2xf32>
    %324 = vector.shape_cast %320 : vector<32x2xf32> to vector<1x32x2xf32>
    tpu.vector_store %arg14[%321, %c0_130, %c0_131], %324 {strides = array<i32>} : memref<8x32x2xf32, #tpu.memory_space<vmem>>, vector<1x32x2xf32>,
    %c5_i32_132 = arith.constant 5 : i32
    %325 = arith.index_cast %c5_i32_132 : i32 to index
    %c0_133 = arith.constant 0 : index
    %c0_134 = arith.constant 0 : index
    %326 = vector.load %arg13[%325, %c0_133, %c0_134] : memref<8x96x2xf32, #tpu.memory_space<vmem>>, vector<1x96x2xf32>
    %327 = vector.shape_cast %326 : vector<1x96x2xf32> to vector<96x2xf32>
    %328 = arith.truncf %320 : vector<32x2xf32> to vector<32x2xbf16>
    %cst_135 = arith.constant dense<0.000000e+00> : vector<96x2xf32>
    %329 = tpu.matmul %2, %328, %cst_135 {dimension_numbers = #tpu.dot_dimension_numbers<[1], [0], [0], [1], [0, 0, 1, 1], [], []>} : vector<96x32xbf16>, vector<32x2xbf16>, vector<96x2xf32> -> vector<96x2xf32>
    %330 = vector.extract_strided_slice %327 {offsets = [0, 0], sizes = [32, 2], strides = [1, 1]} : vector<96x2xf32> to vector<32x2xf32>
    %331 = vector.extract_strided_slice %329 {offsets = [0, 0], sizes = [32, 2], strides = [1, 1]} : vector<96x2xf32> to vector<32x2xf32>
    %332 = arith.addf %330, %331 : vector<32x2xf32>
    %cst_136 = arith.constant 5.000000e-01 : f32
    %333 = vector.broadcast %cst_136 : f32 to vector<32x2xf32>
    %334 = arith.mulf %333, %332 : vector<32x2xf32>
    %335 = math.tanh %334 : vector<32x2xf32>
    %cst_137 = arith.constant 1.000000e+00 : f32
    %336 = vector.broadcast %cst_137 : f32 to vector<32x2xf32>
    %337 = arith.addf %335, %336 : vector<32x2xf32>
    %cst_138 = arith.constant 5.000000e-01 : f32
    %338 = vector.broadcast %cst_138 : f32 to vector<32x2xf32>
    %339 = arith.mulf %338, %337 : vector<32x2xf32>
    %340 = vector.extract_strided_slice %327 {offsets = [32, 0], sizes = [32, 2], strides = [1, 1]} : vector<96x2xf32> to vector<32x2xf32>
    %341 = vector.extract_strided_slice %329 {offsets = [32, 0], sizes = [32, 2], strides = [1, 1]} : vector<96x2xf32> to vector<32x2xf32>
    %342 = arith.addf %340, %341 : vector<32x2xf32>
    %cst_139 = arith.constant 5.000000e-01 : f32
    %343 = vector.broadcast %cst_139 : f32 to vector<32x2xf32>
    %344 = arith.mulf %343, %342 : vector<32x2xf32>
    %345 = math.tanh %344 : vector<32x2xf32>
    %cst_140 = arith.constant 1.000000e+00 : f32
    %346 = vector.broadcast %cst_140 : f32 to vector<32x2xf32>
    %347 = arith.addf %345, %346 : vector<32x2xf32>
    %cst_141 = arith.constant 5.000000e-01 : f32
    %348 = vector.broadcast %cst_141 : f32 to vector<32x2xf32>
    %349 = arith.mulf %348, %347 : vector<32x2xf32>
    %350 = vector.extract_strided_slice %327 {offsets = [64, 0], sizes = [32, 2], strides = [1, 1]} : vector<96x2xf32> to vector<32x2xf32>
    %351 = vector.extract_strided_slice %329 {offsets = [64, 0], sizes = [32, 2], strides = [1, 1]} : vector<96x2xf32> to vector<32x2xf32>
    %352 = arith.addf %351, %11 : vector<32x2xf32>
    %353 = arith.mulf %339, %352 : vector<32x2xf32>
    %354 = arith.addf %350, %353 : vector<32x2xf32>
    %355 = math.tanh %354 : vector<32x2xf32>
    %cst_142 = arith.constant 1.000000e+00 : f32
    %356 = vector.broadcast %cst_142 : f32 to vector<32x2xf32>
    %357 = arith.subf %356, %349 : vector<32x2xf32>
    %358 = arith.mulf %357, %355 : vector<32x2xf32>
    %359 = arith.mulf %349, %320 : vector<32x2xf32>
    %360 = arith.addf %358, %359 : vector<32x2xf32>
    %361 = arith.index_cast %c5_i32_132 : i32 to index
    %c0_143 = arith.constant 0 : index
    %c0_144 = arith.constant 0 : index
    %362 = vector.load %arg14[%361, %c0_143, %c0_144] : memref<8x32x2xf32, #tpu.memory_space<vmem>>, vector<1x32x2xf32>
    %363 = vector.shape_cast %362 : vector<1x32x2xf32> to vector<32x2xf32>
    %364 = vector.shape_cast %360 : vector<32x2xf32> to vector<1x32x2xf32>
    tpu.vector_store %arg14[%361, %c0_143, %c0_144], %364 {strides = array<i32>} : memref<8x32x2xf32, #tpu.memory_space<vmem>>, vector<1x32x2xf32>,
    %c6_i32_145 = arith.constant 6 : i32
    %365 = arith.index_cast %c6_i32_145 : i32 to index
    %c0_146 = arith.constant 0 : index
    %c0_147 = arith.constant 0 : index
    %366 = vector.load %arg13[%365, %c0_146, %c0_147] : memref<8x96x2xf32, #tpu.memory_space<vmem>>, vector<1x96x2xf32>
    %367 = vector.shape_cast %366 : vector<1x96x2xf32> to vector<96x2xf32>
    %368 = arith.truncf %360 : vector<32x2xf32> to vector<32x2xbf16>
    %cst_148 = arith.constant dense<0.000000e+00> : vector<96x2xf32>
    %369 = tpu.matmul %2, %368, %cst_148 {dimension_numbers = #tpu.dot_dimension_numbers<[1], [0], [0], [1], [0, 0, 1, 1], [], []>} : vector<96x32xbf16>, vector<32x2xbf16>, vector<96x2xf32> -> vector<96x2xf32>
    %370 = vector.extract_strided_slice %367 {offsets = [0, 0], sizes = [32, 2], strides = [1, 1]} : vector<96x2xf32> to vector<32x2xf32>
    %371 = vector.extract_strided_slice %369 {offsets = [0, 0], sizes = [32, 2], strides = [1, 1]} : vector<96x2xf32> to vector<32x2xf32>
    %372 = arith.addf %370, %371 : vector<32x2xf32>
    %cst_149 = arith.constant 5.000000e-01 : f32
    %373 = vector.broadcast %cst_149 : f32 to vector<32x2xf32>
    %374 = arith.mulf %373, %372 : vector<32x2xf32>
    %375 = math.tanh %374 : vector<32x2xf32>
    %cst_150 = arith.constant 1.000000e+00 : f32
    %376 = vector.broadcast %cst_150 : f32 to vector<32x2xf32>
    %377 = arith.addf %375, %376 : vector<32x2xf32>
    %cst_151 = arith.constant 5.000000e-01 : f32
    %378 = vector.broadcast %cst_151 : f32 to vector<32x2xf32>
    %379 = arith.mulf %378, %377 : vector<32x2xf32>
    %380 = vector.extract_strided_slice %367 {offsets = [32, 0], sizes = [32, 2], strides = [1, 1]} : vector<96x2xf32> to vector<32x2xf32>
    %381 = vector.extract_strided_slice %369 {offsets = [32, 0], sizes = [32, 2], strides = [1, 1]} : vector<96x2xf32> to vector<32x2xf32>
    %382 = arith.addf %380, %381 : vector<32x2xf32>
    %cst_152 = arith.constant 5.000000e-01 : f32
    %383 = vector.broadcast %cst_152 : f32 to vector<32x2xf32>
    %384 = arith.mulf %383, %382 : vector<32x2xf32>
    %385 = math.tanh %384 : vector<32x2xf32>
    %cst_153 = arith.constant 1.000000e+00 : f32
    %386 = vector.broadcast %cst_153 : f32 to vector<32x2xf32>
    %387 = arith.addf %385, %386 : vector<32x2xf32>
    %cst_154 = arith.constant 5.000000e-01 : f32
    %388 = vector.broadcast %cst_154 : f32 to vector<32x2xf32>
    %389 = arith.mulf %388, %387 : vector<32x2xf32>
    %390 = vector.extract_strided_slice %367 {offsets = [64, 0], sizes = [32, 2], strides = [1, 1]} : vector<96x2xf32> to vector<32x2xf32>
    %391 = vector.extract_strided_slice %369 {offsets = [64, 0], sizes = [32, 2], strides = [1, 1]} : vector<96x2xf32> to vector<32x2xf32>
    %392 = arith.addf %391, %11 : vector<32x2xf32>
    %393 = arith.mulf %379, %392 : vector<32x2xf32>
    %394 = arith.addf %390, %393 : vector<32x2xf32>
    %395 = math.tanh %394 : vector<32x2xf32>
    %cst_155 = arith.constant 1.000000e+00 : f32
    %396 = vector.broadcast %cst_155 : f32 to vector<32x2xf32>
    %397 = arith.subf %396, %389 : vector<32x2xf32>
    %398 = arith.mulf %397, %395 : vector<32x2xf32>
    %399 = arith.mulf %389, %360 : vector<32x2xf32>
    %400 = arith.addf %398, %399 : vector<32x2xf32>
    %401 = arith.index_cast %c6_i32_145 : i32 to index
    %c0_156 = arith.constant 0 : index
    %c0_157 = arith.constant 0 : index
    %402 = vector.load %arg14[%401, %c0_156, %c0_157] : memref<8x32x2xf32, #tpu.memory_space<vmem>>, vector<1x32x2xf32>
    %403 = vector.shape_cast %402 : vector<1x32x2xf32> to vector<32x2xf32>
    %404 = vector.shape_cast %400 : vector<32x2xf32> to vector<1x32x2xf32>
    tpu.vector_store %arg14[%401, %c0_156, %c0_157], %404 {strides = array<i32>} : memref<8x32x2xf32, #tpu.memory_space<vmem>>, vector<1x32x2xf32>,
    %c7_i32_158 = arith.constant 7 : i32
    %405 = arith.index_cast %c7_i32_158 : i32 to index
    %c0_159 = arith.constant 0 : index
    %c0_160 = arith.constant 0 : index
    %406 = vector.load %arg13[%405, %c0_159, %c0_160] : memref<8x96x2xf32, #tpu.memory_space<vmem>>, vector<1x96x2xf32>
    %407 = vector.shape_cast %406 : vector<1x96x2xf32> to vector<96x2xf32>
    %408 = arith.truncf %400 : vector<32x2xf32> to vector<32x2xbf16>
    %cst_161 = arith.constant dense<0.000000e+00> : vector<96x2xf32>
    %409 = tpu.matmul %2, %408, %cst_161 {dimension_numbers = #tpu.dot_dimension_numbers<[1], [0], [0], [1], [0, 0, 1, 1], [], []>} : vector<96x32xbf16>, vector<32x2xbf16>, vector<96x2xf32> -> vector<96x2xf32>
    %410 = vector.extract_strided_slice %407 {offsets = [0, 0], sizes = [32, 2], strides = [1, 1]} : vector<96x2xf32> to vector<32x2xf32>
    %411 = vector.extract_strided_slice %409 {offsets = [0, 0], sizes = [32, 2], strides = [1, 1]} : vector<96x2xf32> to vector<32x2xf32>
    %412 = arith.addf %410, %411 : vector<32x2xf32>
    %cst_162 = arith.constant 5.000000e-01 : f32
    %413 = vector.broadcast %cst_162 : f32 to vector<32x2xf32>
    %414 = arith.mulf %413, %412 : vector<32x2xf32>
    %415 = math.tanh %414 : vector<32x2xf32>
    %cst_163 = arith.constant 1.000000e+00 : f32
    %416 = vector.broadcast %cst_163 : f32 to vector<32x2xf32>
    %417 = arith.addf %415, %416 : vector<32x2xf32>
    %cst_164 = arith.constant 5.000000e-01 : f32
    %418 = vector.broadcast %cst_164 : f32 to vector<32x2xf32>
    %419 = arith.mulf %418, %417 : vector<32x2xf32>
    %420 = vector.extract_strided_slice %407 {offsets = [32, 0], sizes = [32, 2], strides = [1, 1]} : vector<96x2xf32> to vector<32x2xf32>
    %421 = vector.extract_strided_slice %409 {offsets = [32, 0], sizes = [32, 2], strides = [1, 1]} : vector<96x2xf32> to vector<32x2xf32>
    %422 = arith.addf %420, %421 : vector<32x2xf32>
    %cst_165 = arith.constant 5.000000e-01 : f32
    %423 = vector.broadcast %cst_165 : f32 to vector<32x2xf32>
    %424 = arith.mulf %423, %422 : vector<32x2xf32>
    %425 = math.tanh %424 : vector<32x2xf32>
    %cst_166 = arith.constant 1.000000e+00 : f32
    %426 = vector.broadcast %cst_166 : f32 to vector<32x2xf32>
    %427 = arith.addf %425, %426 : vector<32x2xf32>
    %cst_167 = arith.constant 5.000000e-01 : f32
    %428 = vector.broadcast %cst_167 : f32 to vector<32x2xf32>
    %429 = arith.mulf %428, %427 : vector<32x2xf32>
    %430 = vector.extract_strided_slice %407 {offsets = [64, 0], sizes = [32, 2], strides = [1, 1]} : vector<96x2xf32> to vector<32x2xf32>
    %431 = vector.extract_strided_slice %409 {offsets = [64, 0], sizes = [32, 2], strides = [1, 1]} : vector<96x2xf32> to vector<32x2xf32>
    %432 = arith.addf %431, %11 : vector<32x2xf32>
    %433 = arith.mulf %419, %432 : vector<32x2xf32>
    %434 = arith.addf %430, %433 : vector<32x2xf32>
    %435 = math.tanh %434 : vector<32x2xf32>
    %cst_168 = arith.constant 1.000000e+00 : f32
    %436 = vector.broadcast %cst_168 : f32 to vector<32x2xf32>
    %437 = arith.subf %436, %429 : vector<32x2xf32>
    %438 = arith.mulf %437, %435 : vector<32x2xf32>
    %439 = arith.mulf %429, %400 : vector<32x2xf32>
    %440 = arith.addf %438, %439 : vector<32x2xf32>
    %441 = arith.index_cast %c7_i32_158 : i32 to index
    %c0_169 = arith.constant 0 : index
    %c0_170 = arith.constant 0 : index
    %442 = vector.load %arg14[%441, %c0_169, %c0_170] : memref<8x32x2xf32, #tpu.memory_space<vmem>>, vector<1x32x2xf32>
    %443 = vector.shape_cast %442 : vector<1x32x2xf32> to vector<32x2xf32>
    %444 = vector.shape_cast %440 : vector<32x2xf32> to vector<1x32x2xf32>
    tpu.vector_store %arg14[%441, %c0_169, %c0_170], %444 {strides = array<i32>} : memref<8x32x2xf32, #tpu.memory_space<vmem>>, vector<1x32x2xf32>,
    %c8_i32_171 = arith.constant 8 : i32
    %c0_172 = arith.constant 0 : index
    %c0_173 = arith.constant 0 : index
    %c0_174 = arith.constant 0 : index
    %445 = vector.load %arg14[%c0_172, %c0_173, %c0_174] : memref<8x32x2xf32, #tpu.memory_space<vmem>>, vector<8x32x2xf32>
    %c0_175 = arith.constant 0 : index
    %c0_176 = arith.constant 0 : index
    %446 = vector.load %arg8[%c0_175, %c0_176] : memref<32x1xf32, #tpu.memory_space<vmem>>, vector<32x1xf32>
    %447 = vector.shape_cast %446 : vector<32x1xf32> to vector<1x32x1xf32>
    %448 = vector.broadcast %447 : vector<1x32x1xf32> to vector<8x32x2xf32>
    %449 = arith.mulf %445, %448 : vector<8x32x2xf32>
    %cst_177 = arith.constant dense<0.000000e+00> : vector<8x2xf32>
    %450 = vector.multi_reduction <add>, %449, %cst_177 [1] : vector<8x32x2xf32> to vector<8x2xf32>
    %c0_178 = arith.constant 0 : index
    %c0_179 = arith.constant 0 : index
    %451 = vector.load %arg9[%c0_178, %c0_179] : memref<1x1xf32, #tpu.memory_space<vmem>>, vector<1x1xf32>
    %452 = vector.extract %451[0, 0] : f32 from vector<1x1xf32>
    %453 = vector.broadcast %452 : f32 to vector<8x2xf32>
    %454 = arith.addf %450, %453 : vector<8x2xf32>
    %cst_180 = arith.constant dense<0xFF800000> : vector<2xf32>
    %455 = vector.multi_reduction <maximumf>, %454, %cst_180 [0] : vector<8x2xf32> to vector<2xf32>
    %456 = vector.shape_cast %455 : vector<2xf32> to vector<1x2xf32>
    %457 = vector.broadcast %456 : vector<1x2xf32> to vector<8x2xf32>
    %458 = arith.subf %454, %457 : vector<8x2xf32>
    %459 = math.exp %458 : vector<8x2xf32>
    %cst_181 = arith.constant dense<0.000000e+00> : vector<2xf32>
    %460 = vector.multi_reduction <add>, %459, %cst_181 [0] : vector<8x2xf32> to vector<2xf32>
    %461 = vector.shape_cast %460 : vector<2xf32> to vector<1x2xf32>
    %462 = vector.broadcast %461 : vector<1x2xf32> to vector<8x2xf32>
    %463 = arith.divf %459, %462 : vector<8x2xf32>
    %464 = vector.shape_cast %463 : vector<8x2xf32> to vector<8x1x2xf32>
    %465 = vector.broadcast %464 : vector<8x1x2xf32> to vector<8x32x2xf32>
    %466 = arith.mulf %465, %445 : vector<8x32x2xf32>
    %cst_182 = arith.constant dense<0.000000e+00> : vector<32x2xf32>
    %467 = vector.multi_reduction <add>, %466, %cst_182 [0] : vector<8x32x2xf32> to vector<32x2xf32>
    %c0_183 = arith.constant 0 : index
    %c0_184 = arith.constant 0 : index
    %468 = vector.load %arg10[%c0_183, %c0_184] : memref<10x32xbf16, #tpu.memory_space<vmem>>, vector<10x32xbf16>
    %469 = arith.truncf %467 : vector<32x2xf32> to vector<32x2xbf16>
    %cst_185 = arith.constant dense<0.000000e+00> : vector<10x2xf32>
    %470 = tpu.matmul %468, %469, %cst_185 {dimension_numbers = #tpu.dot_dimension_numbers<[1], [0], [0], [1], [0, 0, 1, 1], [], []>} : vector<10x32xbf16>, vector<32x2xbf16>, vector<10x2xf32> -> vector<10x2xf32>
    %c0_186 = arith.constant 0 : index
    %c0_187 = arith.constant 0 : index
    %471 = vector.load %arg11[%c0_186, %c0_187] : memref<10x1xf32, #tpu.memory_space<vmem>>, vector<10x1xf32>
    %472 = vector.broadcast %471 : vector<10x1xf32> to vector<10x2xf32>
    %473 = arith.addf %470, %472 : vector<10x2xf32>
    %c0_188 = arith.constant 0 : index
    %c0_189 = arith.constant 0 : index
    %474 = vector.load %arg12[%c0_188, %c0_189] : memref<10x2xf32, #tpu.memory_space<vmem>>, vector<10x2xf32>
    tpu.vector_store %arg12[%c0_188, %c0_189], %473 {strides = array<i32>} : memref<10x2xf32, #tpu.memory_space<vmem>>, vector<10x2xf32>,
    return
  }
  func.func @transform_0(%arg0: i32) -> (i32, i32, i32) {
    %c0_i32 = arith.constant 0 : i32
    %c0_i32_0 = arith.constant 0 : i32
    %c0_i32_1 = arith.constant 0 : i32
    return %c0_i32, %c0_i32_0, %arg0 : i32, i32, i32
  }
  func.func @transform_1(%arg0: i32) -> (i32, i32) {
    %c0_i32 = arith.constant 0 : i32
    %c0_i32_0 = arith.constant 0 : i32
    %c0_i32_1 = arith.constant 0 : i32
    return %c0_i32, %c0_i32_0 : i32, i32
  }
  func.func @transform_2(%arg0: i32) -> (i32, i32) {
    %c0_i32 = arith.constant 0 : i32
    %c0_i32_0 = arith.constant 0 : i32
    %c0_i32_1 = arith.constant 0 : i32
    return %c0_i32, %c0_i32_0 : i32, i32
  }
  func.func @transform_3(%arg0: i32) -> (i32, i32) {
    %c0_i32 = arith.constant 0 : i32
    %c0_i32_0 = arith.constant 0 : i32
    %c0_i32_1 = arith.constant 0 : i32
    return %c0_i32, %c0_i32_0 : i32, i32
  }
  func.func @transform_4(%arg0: i32) -> (i32, i32) {
    %c0_i32 = arith.constant 0 : i32
    %c0_i32_0 = arith.constant 0 : i32
    %c0_i32_1 = arith.constant 0 : i32
    return %c0_i32, %c0_i32_0 : i32, i32
  }
  func.func @transform_5(%arg0: i32) -> (i32, i32) {
    %c0_i32 = arith.constant 0 : i32
    %c0_i32_0 = arith.constant 0 : i32
    %c0_i32_1 = arith.constant 0 : i32
    return %c0_i32, %c0_i32_0 : i32, i32
  }
  func.func @transform_6(%arg0: i32) -> (i32, i32) {
    %c0_i32 = arith.constant 0 : i32
    %c0_i32_0 = arith.constant 0 : i32
    %c0_i32_1 = arith.constant 0 : i32
    return %c0_i32, %c0_i32_0 : i32, i32
  }
  func.func @transform_7(%arg0: i32) -> (i32, i32) {
    %c0_i32 = arith.constant 0 : i32
    %c0_i32_0 = arith.constant 0 : i32
    %c0_i32_1 = arith.constant 0 : i32
    return %c0_i32, %c0_i32_0 : i32, i32
  }
  func.func @transform_8(%arg0: i32) -> (i32, i32) {
    %c0_i32 = arith.constant 0 : i32
    %c0_i32_0 = arith.constant 0 : i32
    %c0_i32_1 = arith.constant 0 : i32
    return %c0_i32, %c0_i32_0 : i32, i32
  }
  func.func @transform_9(%arg0: i32) -> (i32, i32) {
    %c0_i32 = arith.constant 0 : i32
    %c0_i32_0 = arith.constant 0 : i32
    %c0_i32_1 = arith.constant 0 : i32
    return %c0_i32, %c0_i32_0 : i32, i32
  }
  func.func @transform_10(%arg0: i32) -> (i32, i32) {
    %c0_i32 = arith.constant 0 : i32
    %c0_i32_0 = arith.constant 0 : i32
    %c0_i32_1 = arith.constant 0 : i32
    return %c0_i32, %c0_i32_0 : i32, i32
  }
  func.func @transform_11(%arg0: i32) -> (i32, i32) {
    %c0_i32 = arith.constant 0 : i32
    %c0_i32_0 = arith.constant 0 : i32
    return %c0_i32, %arg0 : i32, i32
  }
}

</mosaic_0001>

<bundles_post_ra>
// kernel: tpu_custom_call.1
= control target key start
LH: loop header
LB: loop body
LE: loop exit
PB: predicated region body
PF: predicated region fallthrough
CT: control target
= control target key end

     0   :  { %v4648_v1 = vmov 0   ;;  %vm231_vm0 = vcmask 523264   ;;  %vm323_vm1 = vcmask 261120   ;;  %vm423_vm2 = vcmask 15360   ;;  %s5999_s0 = inlined_call_operand.vmem [shape: bf16[8,64,2], index: 0, kind: input, shape index: {}]   ;;  %s6000_s1 = inlined_call_operand.vmem [shape: bf16[32,64], index: 1, kind: input, shape index: {}]   ;;  %s6001_s2 = inlined_call_operand.vmem [shape: f32[32,1], index: 2, kind: input, shape index: {}]   ;;  %s6002_s4 = inlined_call_operand.vmem [shape: f32[96,1], index: 4, kind: input, shape index: {}]   ;;  %s6003_s6 = inlined_call_operand.vmem [shape: f32[32,1], index: 6, kind: input, shape index: {}]   ;;  %s6004_s7 = inlined_call_operand.vmem [shape: f32[32,1], index: 7, kind: input, shape index: {}]   ;;  %s6005_s10 = inlined_call_operand.vmem [shape: f32[10,1], index: 10, kind: input, shape index: {}]   ;;  %s6006_s3 = inlined_call_operand.vmem [shape: bf16[96,32], index: 3, kind: input, shape index: {}]   ;;  %s6007_s5 = inlined_call_operand.vmem [shape: bf16[96,32], index: 5, kind: input, shape index: {}]   ;;  %s6008_s8 = inlined_call_operand.<no memory space> [shape: f32[1,1], index: 8, kind: input, shape index: {}]   ;;  %s6009_s9 = inlined_call_operand.vmem [shape: bf16[10,32], index: 9, kind: input, shape index: {}]   ;;  %s6010_s11 = inlined_call_operand.vmem [shape: f32[10,2], index: 11, kind: output, shape index: {}]  }
   0x1   :  { %v4378_v0 = vld [vmem:[%s5999_s0] sm:$0xff]   ;;  %4376 = vset.pattern.permute.xlu0 %v4648_v1  ;;  %4377 = vset.pattern.permute.xlu1 %v4648_v1  ;;  %v4379_v2 = vld [vmem:[%s5999_s0 + $0x8] sm:$0xff]   ;;  %v4380_v3 = vld [vmem:[%s5999_s0 + $0x10] sm:$0xff]   ;;  %vm4650_vm3 = vmmov 0   ;;  %vm3382_vm4 = vcmask 1041409   ;;  %vm3385_vm5 = vcmask 1042434  }
   0x2   :  { %4013 = vmatprep.subr.bf16.mxu0 %v4378_v0  ;;  %v4725_v4 = vld [vmem:[%s6000_s1] sm:$0xff]   ;;  %v4381_v5 = vld [vmem:[%s5999_s0 + $0x18] sm:$0xff]   ;;  %v4738_v7 = vld [vmem:[%s6000_s1 + $0x8] sm:$0xff]   ;;  %vm3388_vm6 = vcmask 1043459   ;;  %vm3391_vm7 = vcmask 1044484   ;;  %vm3394_vm8 = vcmask 1045509  }
   0x3   :  { %4014 = vmatpush3.bf16.msra.mxu0 %v4378_v0  ;;  %4021 = vmatprep.mubr.msk.bf16.mxu0 %vm231_vm0, %v4725_v4  ;;  %v4384_v6 = vld [vmem:[%s5999_s0 + $0x20] sm:$0xff]   ;;  %v71_v9 = vld [vmem:[%s6001_s2 + $0x10] sm:$0xff]  ;;  %v4385_v10 = vld [vmem:[%s5999_s0 + $0x28] sm:$0xff]   ;;  %vm3397_vm9 = vcmask 1046534   ;;  %vm3400_vm10 = vcmask 1047559   ;;  %vm3613_vm11 = vcmask 9216  }
   0x4   :  { %4015 = vmatprep.subr.bf16.mxu0 %v4379_v2  ;;  %v69_v8 = vld [vmem:[%s6001_s2] sm:$0xff]  ;;  %85 = vperm.xlu1 %4377, %v71_v9   ;;  %v70_v11 = vld [vmem:[%s6001_s2 + $0x8] sm:$0xff]  ;;  %v72_v12 = vld [vmem:[%s6001_s2 + $0x18] sm:$0xff] }
   0x5   :  { %75 = vperm.xlu0 %4376, %v69_v8   ;;  %v4386_v13 = vld [vmem:[%s5999_s0 + $0x30] sm:$0xff]   ;;  %v93_v14 = vld [vmem:[%s6002_s4] sm:$0xff]  ;;  %v4387_v15 = vld [vmem:[%s5999_s0 + $0x38] sm:$0xff]  }
   0x6   :  { %v94_v16 = vld [vmem:[%s6002_s4 + $0x8] sm:$0xff]  ;;  %v95_v17 = vld [vmem:[%s6002_s4 + $0x10] sm:$0xff]  ;;  %v96_v18 = vld [vmem:[%s6002_s4 + $0x18] sm:$0xff] }
   0x7   :  { %4016 = vmatpush3.bf16.msra.mxu0 %v4379_v2  ;;  %v4388_v19 = vld [vmem:[%s5999_s0 + $0x40] sm:$0xff]   ;;  %v98_v21 = vld [vmem:[%s6002_s4 + $0x28] sm:$0xff]  ;;  %v99_v23 = vld [vmem:[%s6002_s4 + $0x30] sm:$0xff] }
   0x8   :  { %4017 = vmatprep.subr.bf16.mxu0 %v4380_v3  ;;  %90 = vperm.xlu1 %4377, %v72_v12   ;;  %v97_v20 = vld [vmem:[%s6002_s4 + $0x20] sm:$0xff]  ;;  %v4389_v22 = vld [vmem:[%s5999_s0 + $0x48] sm:$0xff]   ;;  %v100_v24 = vld [vmem:[%s6002_s4 + $0x38] sm:$0xff] }
   0x9   :  { %80 = vperm.xlu0 %4376, %v70_v11   ;;  %v4390_v25 = vld [vmem:[%s5999_s0 + $0x50] sm:$0xff]   ;;  %v101_v26 = vld [vmem:[%s6002_s4 + $0x40] sm:$0xff]  ;;  %v102_v27 = vld [vmem:[%s6002_s4 + $0x48] sm:$0xff] }
   0xa   :  { %v4391_v28 = vld [vmem:[%s5999_s0 + $0x58] sm:$0xff]   ;;  %v103_v29 = vld [vmem:[%s6002_s4 + $0x50] sm:$0xff]  ;;  %v165_v31 = vld [vmem:[%s6003_s6] sm:$0xff] }
   0xb   :  { %4018 = vmatpush3.bf16.msra.mxu0 %v4380_v3  ;;  %v104_v30 = vld [vmem:[%s6002_s4 + $0x58] sm:$0xff]  ;;  %v166_v32 = vld [vmem:[%s6003_s6 + $0x8] sm:$0xff]  ;;  %v167_v33 = vld [vmem:[%s6003_s6 + $0x10] sm:$0xff] }
   0xc   :  { %4019 = vmatprep.subr.bf16.mxu0 %v4381_v5  ;;  %112 = vperm.xlu1 %4377, %v94_v16   ;;  %v168_v34 = vld [vmem:[%s6003_s6 + $0x18] sm:$0xff]  ;;  %v3163_v35 = vld [vmem:[%s6004_s7] sm:$0xff]  ;;  %v3164_v36 = vld [vmem:[%s6004_s7 + $0x8] sm:$0xff] }
   0xd   :  { %107 = vperm.xlu0 %4376, %v93_v14   ;;  %v3165_v37 = vld [vmem:[%s6004_s7 + $0x10] sm:$0xff]  ;;  %v3166_v38 = vld [vmem:[%s6004_s7 + $0x18] sm:$0xff]  ;;  %v3551_v39 = vld [vmem:[%s6005_s10] sm:$0xff] }
   0xe   :  { %v3552_v40 = vld [vmem:[%s6005_s10 + $0x8] sm:$0x3]  ;;  %v4852_v41 = vld [vmem:[%s6006_s3] sm:$0xff]   ;;  %v4878_v61 = vld [vmem:[%s6006_s3 + $0x10] sm:$0xff]  }
   0xf   :  { %4020 = vmatpush3.bf16.msra.mxu0 %v4381_v5  ;;  %4029 = vmatprep.mubr.msk.bf16.mxu1 %vm323_vm1, %v4852_v41  ;;  %v4873_v60 = vld [vmem:[%s6006_s3 + $0x8] sm:$0xff]  }
  0x10   :  { %4041 = vmatprep.subr.bf16.mxu0 %v4384_v6  ;;  %122 = vperm.xlu1 %4377, %v96_v18   ;;  %v4908_v18 = vld [vmem:[%s6006_s3 + $0x28] sm:$0xff]  }
  0x11   :  { %117 = vperm.xlu0 %4376, %v95_v17   ;;  %v4398_v17 = vld [vmem:[%s5999_s0 + $0x60] sm:$0xff]  }
  0x12   :  { %4022 = vmatmul.mubr.msk.bf16.vlgmr.msra.gmra.mrb[0].mxu0 %vm231_vm0, %v4738_v7 }
  0x13   :  { %4042 = vmatpush3.bf16.msra.mxu0 %v4384_v6  ;;  %4049 = vmatprep.mubr.msk.bf16.mxu0 %vm231_vm0, %v4725_v4 }
  0x14   :  { %4043 = vmatprep.subr.bf16.mxu0 %v4385_v10  ;;  %132 = vperm.xlu1 %4377, %v98_v21  }
  0x15   :  { %127 = vperm.xlu0 %4376, %v97_v20  }
  0x17   :  { %4044 = vmatpush3.bf16.msra.mxu0 %v4385_v10 }
  0x18   :  { %4045 = vmatprep.subr.bf16.mxu0 %v4386_v13  ;;  %142 = vperm.xlu1 %4377, %v100_v24  }
  0x19   :  { %137 = vperm.xlu0 %4376, %v99_v23  }
  0x1b   :  { %4046 = vmatpush3.bf16.msra.mxu0 %v4386_v13  ;;  %v4891_v13 = vld [vmem:[%s6006_s3 + $0x18] sm:$0xff]  }
  0x1c   :  { %4047 = vmatprep.subr.bf16.mxu0 %v4387_v15  ;;  %152 = vperm.xlu1 %4377, %v102_v27  }
  0x1d   :  { %147 = vperm.xlu0 %4376, %v101_v26  }
  0x1f   :  { %4048 = vmatpush3.bf16.msra.mxu0 %v4387_v15  ;;  %v4896_v15 = vld [vmem:[%s6006_s3 + $0x20] sm:$0xff]  }
  0x20   :  { %4069 = vmatprep.subr.bf16.mxu0 %v4388_v19  ;;  %162 = vperm.xlu1 %4377, %v104_v30  }
  0x21   :  { %157 = vperm.xlu0 %4376, %v103_v29  }
  0x22   :  { %4050 = vmatmul.mubr.msk.bf16.vlgmr.msra.gmra.mrb[4].mxu0 %vm231_vm0, %v4738_v7 }
  0x23   :  { %4070 = vmatpush3.bf16.msra.mxu0 %v4388_v19  ;;  %4077 = vmatprep.mubr.msk.bf16.mxu0 %vm231_vm0, %v4725_v4 }
  0x24   :  { %4071 = vmatprep.subr.bf16.mxu0 %v4389_v22  ;;  %176 = vperm.xlu1 %4377, %v166_v32  }
  0x25   :  { %171 = vperm.xlu0 %4376, %v165_v31  }
  0x27   :  { %4072 = vmatpush3.bf16.msra.mxu0 %v4389_v22 }
  0x28   :  { %4073 = vmatprep.subr.bf16.mxu0 %v4390_v25  ;;  %186 = vperm.xlu1 %4377, %v168_v34   ;;  %v4401_v34 = vld [vmem:[%s5999_s0 + $0x80] sm:$0xff]  }
  0x29   :  { %181 = vperm.xlu0 %4376, %v167_v33   ;;  %v4399_v33 = vld [vmem:[%s5999_s0 + $0x68] sm:$0xff]  }
  0x2b   :  { %4074 = vmatpush3.bf16.msra.mxu0 %v4390_v25 }
  0x2c   :  { %4075 = vmatprep.subr.bf16.mxu0 %v4391_v28  ;;  %3174 = vperm.xlu1 %4377, %v3164_v36   ;;  %v4402_v36 = vld [vmem:[%s5999_s0 + $0x78] sm:$0xff]  }
  0x2d   :  { %3169 = vperm.xlu0 %4376, %v3163_v35   ;;  %v4400_v35 = vld [vmem:[%s5999_s0 + $0x70] sm:$0xff]  }
  0x2f   :  { %4076 = vmatpush3.bf16.msra.mxu0 %v4391_v28 }
  0x30   :  { %3184 = vperm.xlu1 %4377, %v3166_v38   ;;  %v4404_v38 = vld [vmem:[%s5999_s0 + $0x90] sm:$0xff]  }
  0x31   :  { %3179 = vperm.xlu0 %4376, %v3165_v37   ;;  %v4403_v37 = vld [vmem:[%s5999_s0 + $0x88] sm:$0xff]  }
  0x32   :  { %4078 = vmatmul.mubr.msk.bf16.vlgmr.msra.gmra.mrb[8].mxu0 %vm231_vm0, %v4738_v7 }
  0x33   :  { %4085 = vmatprep.mubr.msk.bf16.mxu0 %vm323_vm1, %v4852_v41 }
  0x34   :  { %3560 = vperm.xlu1 %4377, %v3552_v40  }
  0x35   :  { %3555 = vperm.xlu0 %4376, %v3551_v39   ;;  %v4405_v39 = vld [vmem:[%s5999_s0 + $0x98] sm:$0xff]  }
  0x83   :  { %v4858_v42 = vpop.permute.xlu1 %85 }
  0x84   :  { %v4860_v43 = vpop.permute.xlu0 %75 }
  0x87   :  { %v4863_v47 = vpop.permute.xlu1 %90 }
  0x88   :  { %v4866_v50 = vpop.permute.xlu0 %80 }
  0x8c   :  { %v4971_v40 = vpop.permute.xlu0 %107 }
  0xe5   :  { %v4023_v44 = vpop.f32.mrb[0].mxu0 }
  0xe6   :  { %v281_v45 = vadd.f32 %v4023_v44, %v4858_v42  ;;  %v272_v46 = vpop.f32.mrb[1].mxu0  ;;  %v4973_v44 = vpop.permute.xlu1 %112 }
  0xe7   :  { %v273_v48 = vadd.f32 %v272_v46, %v4860_v43  ;;  %v4024_v49 = vpop.f32.mrb[2].mxu0 }
  0xe8   :  { %v289_v51 = vmax.f32 %v281_v45, 0.0  ;;  %v284_v52 = vadd.f32 %v4024_v49, %v4863_v47  ;;  %v275_v53 = vpop.f32.mrb[3].mxu0  ;;  %v4975_v45 = vpop.permute.xlu0 %117 }
  0xe9   :  { %v276_v54 = vadd.f32 %v275_v53, %v4866_v50  ;;  %v287_v56 = vmax.f32 %v273_v48, 0.0 }
  0xea   :  { %v290_v55 = vmax.f32 %v284_v52, 0.0  ;;  %v4977_v46 = vpop.permute.xlu1 %122 }
  0xeb   :  { %v288_v57 = vmax.f32 %v276_v54, 0.0 }
  0xec   :  { %v292_v58 = vpack.c.bf16 %v290_v55, %v289_v51  ;;  %v4979_v48 = vpop.permute.xlu0 %127 }
  0xed   :  { %v291_v59 = vpack.c.bf16 %v288_v57, %v287_v56 }
  0xee   :  { %v4981_v49 = vpop.permute.xlu1 %132 }
  0xef   :  { %4025 = vmatprep.subr.bf16.mxu1 %v291_v59 }
  0xf0   :  { %4026 = vmatpush3.bf16.msra.mxu1 %v291_v59 }
  0xf1   :  { %4027 = vmatprep.subr.bf16.mxu1 %v292_v58 }
  0xf4   :  { %4028 = vmatpush3.bf16.msra.mxu1 %v292_v58  ;;  %v4987_v58 = vpop.permute.xlu0 %137 }
  0xf5   :  { %v4051_v62 = vpop.f32.mrb[4].mxu0 }
  0xf6   :  { %v512_v63 = vadd.f32 %v4051_v62, %v4858_v42  ;;  %v503_v0 = vpop.f32.mrb[5].mxu0  ;;  %v4992_v62 = vpop.permute.xlu1 %142 }
  0xf7   :  { %v504_v2 = vadd.f32 %v503_v0, %v4860_v43  ;;  %4030 = vmatmul.mubr.msk.bf16.vlgmr.msra.gmra.mrb[0].mxu1 %vm323_vm1, %v4873_v60  ;;  %v4052_v3 = vpop.f32.mrb[6].mxu0 }
  0xf8   :  { %v520_v5 = vmax.f32 %v512_v63, 0.0  ;;  %v515_v6 = vadd.f32 %v4052_v3, %v4863_v47  ;;  %v506_v8 = vpop.f32.mrb[7].mxu0  ;;  %4033 = vmatprep.mubr.msk.bf16.mxu1 %vm323_vm1, %v4878_v61  ;;  %v4996_v3 = vpop.permute.xlu0 %147 }
  0xf9   :  { %v507_v9 = vadd.f32 %v506_v8, %v4866_v50  ;;  %v518_v11 = vmax.f32 %v504_v2, 0.0 }
  0xfa   :  { %v521_v10 = vmax.f32 %v515_v6, 0.0 }
  0xfb   :  { %v519_v12 = vmax.f32 %v507_v9, 0.0 }
  0xfc   :  { %v523_v14 = vpack.c.bf16 %v521_v10, %v520_v5  ;;  %v5001_v10 = vpop.permute.xlu1 %152 }
  0xfd   :  { %v522_v16 = vpack.c.bf16 %v519_v12, %v518_v11  ;;  %v5007_v12 = vpop.permute.xlu0 %157 }
  0xff   :  { %4034 = vmatmul.mubr.msk.bf16.gmra.mrb[4].mxu1 %vm323_vm1, %v4891_v13  ;;  %4053 = vmatprep.subr.bf16.mxu1 %v522_v16 }
 0x100   :  { %4054 = vmatpush3.bf16.msra.mxu1 %v522_v16  ;;  %4037 = vmatprep.mubr.msk.bf16.mxu1 %vm323_vm1, %v4896_v15 }
 0x101   :  { %4055 = vmatprep.subr.bf16.mxu1 %v523_v14 }
 0x104   :  { %4056 = vmatpush3.bf16.msra.mxu1 %v523_v14 }
 0x105   :  { %v4079_v19 = vpop.f32.mrb[8].mxu0  ;;  %4097 = vmatprep.subr.bf16.mxu1 %v4398_v17 }
 0x106   :  { %v694_v20 = vadd.f32 %v4079_v19, %v4858_v42  ;;  %v685_v21 = vpop.f32.mrb[9].mxu0  ;;  %v5010_v19 = vpop.permute.xlu1 %162 }
 0x107   :  { %v686_v22 = vadd.f32 %v685_v21, %v4860_v43  ;;  %4038 = vmatmul.mubr.msk.bf16.gmra.mrb[8].mxu1 %vm323_vm1, %v4908_v18  ;;  %v4080_v23 = vpop.f32.mrb[10].mxu0 }
 0x108   :  { %v697_v24 = vadd.f32 %v4080_v23, %v4863_v47  ;;  %v688_v25 = vpop.f32.mrb[11].mxu0  ;;  %4057 = vmatprep.mubr.msk.bf16.mxu1 %vm323_vm1, %v4852_v41  ;;  %v702_v27 = vmax.f32 %v694_v20, 0.0 }
 0x109   :  { %v689_v26 = vadd.f32 %v688_v25, %v4866_v50  ;;  %v700_v29 = vmax.f32 %v686_v22, 0.0 }
 0x10a   :  { %v703_v28 = vmax.f32 %v697_v24, 0.0 }
 0x10b   :  { %v701_v30 = vmax.f32 %v689_v26, 0.0 }
 0x10c   :  { %v705_v31 = vpack.c.bf16 %v703_v28, %v702_v27 }
 0x10d   :  { %v704_v32 = vpack.c.bf16 %v701_v30, %v700_v29 }
 0x10f   :  { %4058 = vmatmul.mubr.msk.bf16.vlgmr.msra.gmra.mrb[12].mxu1 %vm323_vm1, %v4873_v60  ;;  %4081 = vmatprep.subr.bf16.mxu0 %v704_v32 }
 0x110   :  { %4082 = vmatpush3.bf16.msra.mxu0 %v704_v32  ;;  %4061 = vmatprep.mubr.msk.bf16.mxu1 %vm323_vm1, %v4878_v61 }
 0x111   :  { %4083 = vmatprep.subr.bf16.mxu0 %v705_v31  ;;  %4098 = vmatpush3.bf16.msra.mxu1 %v4398_v17 }
 0x112   :  { %4099 = vmatprep.subr.bf16.mxu1 %v4399_v33 }
 0x114   :  { %4084 = vmatpush3.bf16.msra.mxu0 %v705_v31 }
 0x115   :  { %4100 = vmatpush3.bf16.msra.mxu1 %v4399_v33  ;;  %4125 = vmatprep.subr.bf16.mxu0 %v4401_v34 }
 0x116   :  { %4101 = vmatprep.subr.bf16.mxu1 %v4400_v35 }
 0x117   :  { %4062 = vmatmul.mubr.msk.bf16.gmra.mrb[16].mxu1 %vm323_vm1, %v4891_v13  ;;  %4086 = vmatmul.mubr.msk.bf16.vlgmr.msra.gmra.mrb[12].mxu0 %vm323_vm1, %v4873_v60 }
 0x118   :  { %4065 = vmatprep.mubr.msk.bf16.mxu1 %vm323_vm1, %v4896_v15  ;;  %4089 = vmatprep.mubr.msk.bf16.mxu0 %vm323_vm1, %v4878_v61 }
 0x119   :  { %4102 = vmatpush3.bf16.msra.mxu1 %v4400_v35  ;;  %4126 = vmatpush3.bf16.msra.mxu0 %v4401_v34 }
 0x11a   :  { %4103 = vmatprep.subr.bf16.mxu1 %v4402_v36  ;;  %4127 = vmatprep.subr.bf16.mxu0 %v4403_v37 }
 0x11d   :  { %4104 = vmatpush3.bf16.msra.mxu1 %v4402_v36  ;;  %4128 = vmatpush3.bf16.msra.mxu0 %v4403_v37 }
 0x11e   :  { %4129 = vmatprep.subr.bf16.mxu0 %v4404_v38 }
 0x11f   :  { %4066 = vmatmul.mubr.msk.bf16.gmra.mrb[20].mxu1 %vm323_vm1, %v4908_v18  ;;  %4090 = vmatmul.mubr.msk.bf16.gmra.mrb[16].mxu0 %vm323_vm1, %v4891_v13 }
 0x120   :  { %4093 = vmatprep.mubr.msk.bf16.mxu0 %vm323_vm1, %v4896_v15  ;;  %4105 = vmatprep.mubr.msk.bf16.mxu1 %vm231_vm0, %v4725_v4 }
 0x121   :  { %4130 = vmatpush3.bf16.msra.mxu0 %v4404_v38 }
 0x122   :  { %4131 = vmatprep.subr.bf16.mxu0 %v4405_v39 }
 0x125   :  { %4132 = vmatpush3.bf16.msra.mxu0 %v4405_v39 }
 0x127   :  { %4094 = vmatmul.mubr.msk.bf16.gmra.mrb[20].mxu0 %vm323_vm1, %v4908_v18  ;;  %4106 = vmatmul.mubr.msk.bf16.vlgmr.msra.gmra.mrb[24].mxu1 %vm231_vm0, %v4738_v7 }
 0x128   :  { %4133 = vmatprep.mubr.msk.bf16.mxu0 %vm231_vm0, %v4725_v4  ;;  %4113 = vmatprep.mubr.msk.bf16.mxu1 %vm323_vm1, %v4852_v41 }
 0x12f   :  { %4134 = vmatmul.mubr.msk.bf16.vlgmr.msra.gmra.mrb[24].mxu0 %vm231_vm0, %v4738_v7 }
 0x130   :  { %4141 = vmatprep.mubr.msk.bf16.mxu0 %vm323_vm1, %v4852_v41 }
 0x1ca   :  { %v4031_v51 = vpop.f32.mrb[0].mxu1 }
 0x1cb   :  { %v385_v52 = vadd.f32 %v4031_v51, %v4975_v45  ;;  %v376_v53 = vpop.f32.mrb[1].mxu1 }
 0x1cc   :  { %v377_v54 = vadd.f32 %v376_v53, %v4971_v40  ;;  %v4032_v55 = vpop.f32.mrb[2].mxu1 }
 0x1cd   :  { %426 = vst.msk [vmem:[#allocation2 + $0x10] sm:$0xff] %vm423_vm2, %v385_v52  ;;  %v388_v56 = vadd.f32 %v4032_v55, %v4977_v46  ;;  %v379_v57 = vpop.f32.mrb[3].mxu1 }
 0x1ce   :  { %424 = vst.msk [vmem:[#allocation2] sm:$0xff] %vm423_vm2, %v377_v54  ;;  %v380_v59 = vadd.f32 %v379_v57, %v4973_v44 }
 0x1cf   :  { %427 = vst.msk [vmem:[#allocation2 + $0x18] sm:$0xff] %vm423_vm2, %v388_v56 }
 0x1d0   :  { %425 = vst.msk [vmem:[#allocation2 + $0x8] sm:$0xff] %vm423_vm2, %v380_v59 }
 0x1d2   :  { %v4035_v63 = vpop.f32.mrb[4].mxu1 }
 0x1d3   :  { %v401_v0 = vadd.f32 %v4035_v63, %v4987_v58  ;;  %v392_v2 = vpop.f32.mrb[5].mxu1 }
 0x1d4   :  { %v393_v5 = vadd.f32 %v392_v2, %v4979_v48  ;;  %v4036_v6 = vpop.f32.mrb[6].mxu1 }
 0x1d5   :  { %430 = vst.msk [vmem:[#allocation2 + $0x30] sm:$0xff] %vm423_vm2, %v401_v0  ;;  %v404_v8 = vadd.f32 %v4036_v6, %v4992_v62  ;;  %v395_v9 = vpop.f32.mrb[7].mxu1 }
 0x1d6   :  { %428 = vst.msk [vmem:[#allocation2 + $0x20] sm:$0xff] %vm423_vm2, %v393_v5  ;;  %v396_v11 = vadd.f32 %v395_v9, %v4981_v49 }
 0x1d7   :  { %431 = vst.msk [vmem:[#allocation2 + $0x38] sm:$0xff] %vm423_vm2, %v404_v8 }
 0x1d8   :  { %429 = vst.msk [vmem:[#allocation2 + $0x28] sm:$0xff] %vm423_vm2, %v396_v11 }
 0x1da   :  { %v4039_v14 = vpop.f32.mrb[8].mxu1 }
 0x1db   :  { %v417_v16 = vadd.f32 %v4039_v14, %v5007_v12  ;;  %v408_v17 = vpop.f32.mrb[9].mxu1 }
 0x1dc   :  { %v409_v20 = vadd.f32 %v408_v17, %v4996_v3  ;;  %v4040_v21 = vpop.f32.mrb[10].mxu1 }
 0x1dd   :  { %434 = vst.msk [vmem:[#allocation2 + $0x50] sm:$0xff] %vm423_vm2, %v417_v16  ;;  %v420_v22 = vadd.f32 %v4040_v21, %v5010_v19  ;;  %v411_v23 = vpop.f32.mrb[11].mxu1 }
 0x1de   :  { %432 = vst.msk [vmem:[#allocation2 + $0x40] sm:$0xff] %vm423_vm2, %v409_v20  ;;  %v412_v24 = vadd.f32 %v411_v23, %v5001_v10 }
 0x1df   :  { %435 = vst.msk [vmem:[#allocation2 + $0x58] sm:$0xff] %vm423_vm2, %v420_v22 }
 0x1e0   :  { %433 = vst.msk [vmem:[#allocation2 + $0x48] sm:$0xff] %vm423_vm2, %v412_v24 }
 0x1e2   :  { %v4059_v25 = vpop.f32.mrb[12].mxu1 }
 0x1e3   :  { %v567_v26 = vadd.f32 %v4059_v25, %v4975_v45  ;;  %v558_v27 = vpop.f32.mrb[13].mxu1 }
 0x1e4   :  { %v559_v28 = vadd.f32 %v558_v27, %v4971_v40  ;;  %v4060_v29 = vpop.f32.mrb[14].mxu1 }
 0x1e5   :  { %608 = vst.msk [vmem:[#allocation2 + $0x70] sm:$0xff] %vm423_vm2, %v567_v26  ;;  %v570_v30 = vadd.f32 %v4060_v29, %v4977_v46  ;;  %v561_v31 = vpop.f32.mrb[15].mxu1 }
 0x1e6   :  { %606 = vst.msk [vmem:[#allocation2 + $0x60] sm:$0xff] %vm423_vm2, %v559_v28  ;;  %v562_v32 = vadd.f32 %v561_v31, %v4973_v44 }
 0x1e7   :  { %609 = vst.msk [vmem:[#allocation2 + $0x78] sm:$0xff] %vm423_vm2, %v570_v30 }
 0x1e8   :  { %607 = vst.msk [vmem:[#allocation2 + $0x68] sm:$0xff] %vm423_vm2, %v562_v32 }
 0x1ea   :  { %v4063_v33 = vpop.f32.mrb[16].mxu1  ;;  %v4087_v34 = vpop.f32.mrb[12].mxu0 }
 0x1eb   :  { %v583_v35 = vadd.f32 %v4063_v33, %v4987_v58  ;;  %v749_v36 = vadd.f32 %v4087_v34, %v4975_v45  ;;  %v574_v37 = vpop.f32.mrb[17].mxu1  ;;  %v740_v38 = vpop.f32.mrb[13].mxu0 }
 0x1ec   :  { %v575_v39 = vadd.f32 %v574_v37, %v4979_v48  ;;  %v741_v51 = vadd.f32 %v740_v38, %v4971_v40  ;;  %v4064_v52 = vpop.f32.mrb[18].mxu1  ;;  %v4088_v53 = vpop.f32.mrb[14].mxu0 }
 0x1ed   :  { %612 = vst.msk [vmem:[#allocation2 + $0x90] sm:$0xff] %vm423_vm2, %v583_v35  ;;  %790 = vst.msk [vmem:[#allocation2 + $0xd0] sm:$0xff] %vm423_vm2, %v749_v36  ;;  %v586_v54 = vadd.f32 %v4064_v52, %v4992_v62  ;;  %v752_v55 = vadd.f32 %v4088_v53, %v4977_v46  ;;  %v577_v56 = vpop.f32.mrb[19].mxu1  ;;  %v743_v57 = vpop.f32.mrb[15].mxu0 }
 0x1ee   :  { %610 = vst.msk [vmem:[#allocation2 + $0x80] sm:$0xff] %vm423_vm2, %v575_v39  ;;  %788 = vst.msk [vmem:[#allocation2 + $0xc0] sm:$0xff] %vm423_vm2, %v741_v51  ;;  %v578_v59 = vadd.f32 %v577_v56, %v4981_v49  ;;  %v744_v63 = vadd.f32 %v743_v57, %v4973_v44 }
 0x1ef   :  { %613 = vst.msk [vmem:[#allocation2 + $0x98] sm:$0xff] %vm423_vm2, %v586_v54  ;;  %791 = vst.msk [vmem:[#allocation2 + $0xd8] sm:$0xff] %vm423_vm2, %v752_v55 }
 0x1f0   :  { %611 = vst.msk [vmem:[#allocation2 + $0x88] sm:$0xff] %vm423_vm2, %v578_v59  ;;  %789 = vst.msk [vmem:[#allocation2 + $0xc8] sm:$0xff] %vm423_vm2, %v744_v63 }
 0x1f2   :  { %v4067_v0 = vpop.f32.mrb[20].mxu1  ;;  %v4091_v2 = vpop.f32.mrb[16].mxu0 }
 0x1f3   :  { %v599_v5 = vadd.f32 %v4067_v0, %v5007_v12  ;;  %v765_v6 = vadd.f32 %v4091_v2, %v4987_v58  ;;  %v590_v8 = vpop.f32.mrb[21].mxu1  ;;  %v756_v9 = vpop.f32.mrb[17].mxu0 }
 0x1f4   :  { %v591_v11 = vadd.f32 %v590_v8, %v4996_v3  ;;  %v757_v14 = vadd.f32 %v756_v9, %v4979_v48  ;;  %v4068_v16 = vpop.f32.mrb[22].mxu1  ;;  %v4092_v17 = vpop.f32.mrb[18].mxu0 }
 0x1f5   :  { %616 = vst.msk [vmem:[#allocation2 + $0xb0] sm:$0xff] %vm423_vm2, %v599_v5  ;;  %794 = vst.msk [vmem:[#allocation2 + $0xf0] sm:$0xff] %vm423_vm2, %v765_v6  ;;  %v602_v20 = vadd.f32 %v4068_v16, %v5010_v19  ;;  %v768_v21 = vadd.f32 %v4092_v17, %v4992_v62  ;;  %v593_v22 = vpop.f32.mrb[23].mxu1  ;;  %v759_v23 = vpop.f32.mrb[19].mxu0 }
 0x1f6   :  { %614 = vst.msk [vmem:[#allocation2 + $0xa0] sm:$0xff] %vm423_vm2, %v591_v11  ;;  %792 = vst.msk [vmem:[#allocation2 + $0xe0] sm:$0xff] %vm423_vm2, %v757_v14  ;;  %v594_v24 = vadd.f32 %v593_v22, %v5001_v10  ;;  %v760_v25 = vadd.f32 %v759_v23, %v4981_v49  ;;  %v4406_v14 = vld [vmem:[%s5999_s0 + $0xa0] sm:$0xff]  }
 0x1f7   :  { %617 = vst.msk [vmem:[#allocation2 + $0xb8] sm:$0xff] %vm423_vm2, %v602_v20  ;;  %795 = vst.msk [vmem:[#allocation2 + $0xf8] sm:$0xff] %vm423_vm2, %v768_v21 }
 0x1f8   :  { %615 = vst.msk [vmem:[#allocation2 + $0xa8] sm:$0xff] %vm423_vm2, %v594_v24  ;;  %793 = vst.msk [vmem:[#allocation2 + $0xe8] sm:$0xff] %vm423_vm2, %v760_v25  ;;  %v4407_v24 = vld [vmem:[%s5999_s0 + $0xa8] sm:$0xff]   ;;  %v4409_v25 = vld [vmem:[%s5999_s0 + $0xc0] sm:$0xff]  }
 0x1fa   :  { %v4095_v26 = vpop.f32.mrb[20].mxu0  ;;  %v4107_v27 = vpop.f32.mrb[24].mxu1 }
 0x1fb   :  { %v781_v28 = vadd.f32 %v4095_v26, %v5007_v12  ;;  %v876_v29 = vadd.f32 %v4107_v27, %v4858_v42  ;;  %v772_v30 = vpop.f32.mrb[21].mxu0  ;;  %v867_v31 = vpop.f32.mrb[25].mxu1  ;;  %v4408_v26 = vld [vmem:[%s5999_s0 + $0xb0] sm:$0xff]   ;;  %v4410_v27 = vld [vmem:[%s5999_s0 + $0xb8] sm:$0xff]  }
 0x1fc   :  { %v773_v32 = vadd.f32 %v772_v30, %v4996_v3  ;;  %v868_v33 = vadd.f32 %v867_v31, %v4860_v43  ;;  %v4096_v34 = vpop.f32.mrb[22].mxu0  ;;  %v4108_v35 = vpop.f32.mrb[26].mxu1  ;;  %v4413_v30 = vld [vmem:[%s5999_s0 + $0xd8] sm:$0xff]  }
 0x1fd   :  { %798 = vst.msk [vmem:[#allocation2 + $0x110] sm:$0xff] %vm423_vm2, %v781_v28  ;;  %v784_v36 = vadd.f32 %v4096_v34, %v5010_v19  ;;  %v879_v37 = vadd.f32 %v4108_v35, %v4863_v47  ;;  %v775_v38 = vpop.f32.mrb[23].mxu0  ;;  %v870_v39 = vpop.f32.mrb[27].mxu1  ;;  %v884_v53 = vmax.f32 %v876_v29, 0.0  ;;  %v4411_v28 = vld [vmem:[%s5999_s0 + $0xc8] sm:$0xff]   ;;  %v4412_v29 = vld [vmem:[%s5999_s0 + $0xd0] sm:$0xff]  }
 0x1fe   :  { %796 = vst.msk [vmem:[#allocation2 + $0x100] sm:$0xff] %vm423_vm2, %v773_v32  ;;  %v776_v51 = vadd.f32 %v775_v38, %v5001_v10  ;;  %v871_v52 = vadd.f32 %v870_v39, %v4866_v50  ;;  %v882_v55 = vmax.f32 %v868_v33, 0.0 }
 0x1ff   :  { %799 = vst.msk [vmem:[#allocation2 + $0x118] sm:$0xff] %vm423_vm2, %v784_v36  ;;  %v885_v54 = vmax.f32 %v879_v37, 0.0 }
 0x200   :  { %797 = vst.msk [vmem:[#allocation2 + $0x108] sm:$0xff] %vm423_vm2, %v776_v51  ;;  %v883_v56 = vmax.f32 %v871_v52, 0.0 }
 0x201   :  { %v887_v57 = vpack.c.bf16 %v885_v54, %v884_v53 }
 0x202   :  { %v886_v59 = vpack.c.bf16 %v883_v56, %v882_v55  ;;  %v4135_v63 = vpop.f32.mrb[24].mxu0 }
 0x203   :  { %v1058_v0 = vadd.f32 %v4135_v63, %v4858_v42  ;;  %v1049_v2 = vpop.f32.mrb[25].mxu0 }
 0x204   :  { %v1050_v5 = vadd.f32 %v1049_v2, %v4860_v43  ;;  %4109 = vmatprep.subr.bf16.mxu1 %v886_v59  ;;  %v4136_v6 = vpop.f32.mrb[26].mxu0 }
 0x205   :  { %v1061_v8 = vadd.f32 %v4136_v6, %v4863_v47  ;;  %4110 = vmatpush3.bf16.msra.mxu1 %v886_v59  ;;  %v1052_v9 = vpop.f32.mrb[27].mxu0  ;;  %v1066_v16 = vmax.f32 %v1058_v0, 0.0 }
 0x206   :  { %v1053_v11 = vadd.f32 %v1052_v9, %v4866_v50  ;;  %4111 = vmatprep.subr.bf16.mxu1 %v887_v57  ;;  %v1064_v20 = vmax.f32 %v1050_v5, 0.0 }
 0x207   :  { %v1067_v17 = vmax.f32 %v1061_v8, 0.0 }
 0x208   :  { %v1065_v21 = vmax.f32 %v1053_v11, 0.0 }
 0x209   :  { %v1069_v22 = vpack.c.bf16 %v1067_v17, %v1066_v16  ;;  %4112 = vmatpush3.bf16.msra.mxu1 %v887_v57 }
 0x20a   :  { %v1068_v23 = vpack.c.bf16 %v1065_v21, %v1064_v20  ;;  %4153 = vmatprep.subr.bf16.mxu1 %v4406_v14 }
 0x20c   :  { %4114 = vmatmul.mubr.msk.bf16.vlgmr.msra.gmra.mrb[28].mxu1 %vm323_vm1, %v4873_v60  ;;  %4137 = vmatprep.subr.bf16.mxu0 %v1068_v23 }
 0x20d   :  { %4138 = vmatpush3.bf16.msra.mxu0 %v1068_v23  ;;  %4117 = vmatprep.mubr.msk.bf16.mxu1 %vm323_vm1, %v4878_v61 }
 0x20e   :  { %4139 = vmatprep.subr.bf16.mxu0 %v1069_v22  ;;  %4154 = vmatpush3.bf16.msra.mxu1 %v4406_v14 }
 0x20f   :  { %4155 = vmatprep.subr.bf16.mxu1 %v4407_v24 }
 0x211   :  { %4140 = vmatpush3.bf16.msra.mxu0 %v1069_v22 }
 0x212   :  { %4156 = vmatpush3.bf16.msra.mxu1 %v4407_v24  ;;  %4181 = vmatprep.subr.bf16.mxu0 %v4409_v25 }
 0x213   :  { %4157 = vmatprep.subr.bf16.mxu1 %v4408_v26 }
 0x214   :  { %4118 = vmatmul.mubr.msk.bf16.gmra.mrb[32].mxu1 %vm323_vm1, %v4891_v13  ;;  %4142 = vmatmul.mubr.msk.bf16.vlgmr.msra.gmra.mrb[28].mxu0 %vm323_vm1, %v4873_v60 }
 0x215   :  { %4121 = vmatprep.mubr.msk.bf16.mxu1 %vm323_vm1, %v4896_v15  ;;  %4145 = vmatprep.mubr.msk.bf16.mxu0 %vm323_vm1, %v4878_v61 }
 0x216   :  { %4158 = vmatpush3.bf16.msra.mxu1 %v4408_v26  ;;  %4182 = vmatpush3.bf16.msra.mxu0 %v4409_v25 }
 0x217   :  { %4159 = vmatprep.subr.bf16.mxu1 %v4410_v27  ;;  %4183 = vmatprep.subr.bf16.mxu0 %v4411_v28 }
 0x21a   :  { %4160 = vmatpush3.bf16.msra.mxu1 %v4410_v27  ;;  %4184 = vmatpush3.bf16.msra.mxu0 %v4411_v28 }
 0x21b   :  { %4185 = vmatprep.subr.bf16.mxu0 %v4412_v29 }
 0x21c   :  { %4122 = vmatmul.mubr.msk.bf16.gmra.mrb[36].mxu1 %vm323_vm1, %v4908_v18  ;;  %4146 = vmatmul.mubr.msk.bf16.gmra.mrb[32].mxu0 %vm323_vm1, %v4891_v13 }
 0x21d   :  { %4149 = vmatprep.mubr.msk.bf16.mxu0 %vm323_vm1, %v4896_v15  ;;  %4161 = vmatprep.mubr.msk.bf16.mxu1 %vm231_vm0, %v4725_v4 }
 0x21e   :  { %4186 = vmatpush3.bf16.msra.mxu0 %v4412_v29 }
 0x21f   :  { %4187 = vmatprep.subr.bf16.mxu0 %v4413_v30 }
 0x222   :  { %4188 = vmatpush3.bf16.msra.mxu0 %v4413_v30 }
 0x224   :  { %4150 = vmatmul.mubr.msk.bf16.gmra.mrb[36].mxu0 %vm323_vm1, %v4908_v18  ;;  %4162 = vmatmul.mubr.msk.bf16.vlgmr.msra.gmra.mrb[40].mxu1 %vm231_vm0, %v4738_v7 }
 0x225   :  { %4189 = vmatprep.mubr.msk.bf16.mxu0 %vm231_vm0, %v4725_v4  ;;  %4169 = vmatprep.mubr.msk.bf16.mxu1 %vm323_vm1, %v4852_v41 }
 0x22c   :  { %4190 = vmatmul.mubr.msk.bf16.vlgmr.msra.gmra.mrb[40].mxu0 %vm231_vm0, %v4738_v7 }
 0x22d   :  { %4197 = vmatprep.mubr.msk.bf16.mxu0 %vm323_vm1, %v4852_v41 }
 0x2df   :  { %v4115_v31 = vpop.f32.mrb[28].mxu1 }
 0x2e0   :  { %v931_v32 = vadd.f32 %v4115_v31, %v4975_v45  ;;  %v922_v33 = vpop.f32.mrb[29].mxu1 }
 0x2e1   :  { %v923_v34 = vadd.f32 %v922_v33, %v4971_v40  ;;  %v4116_v35 = vpop.f32.mrb[30].mxu1 }
 0x2e2   :  { %972 = vst.msk [vmem:[#allocation2 + $0x130] sm:$0xff] %vm423_vm2, %v931_v32  ;;  %v934_v4 = vadd.f32 %v4116_v35, %v4977_v46  ;;  %v925_v36 = vpop.f32.mrb[31].mxu1 }
 0x2e3   :  { %970 = vst.msk [vmem:[#allocation2 + $0x120] sm:$0xff] %vm423_vm2, %v923_v34  ;;  %v926_v37 = vadd.f32 %v925_v36, %v4973_v44 }
 0x2e4   :  { %973 = vst.msk [vmem:[#allocation2 + $0x138] sm:$0xff] %vm423_vm2, %v934_v4 }
 0x2e5   :  { %971 = vst.msk [vmem:[#allocation2 + $0x128] sm:$0xff] %vm423_vm2, %v926_v37 }
 0x2e7   :  { %v4119_v7 = vpop.f32.mrb[32].mxu1  ;;  %v4143_v38 = vpop.f32.mrb[28].mxu0 }
 0x2e8   :  { %v947_v39 = vadd.f32 %v4119_v7, %v4987_v58  ;;  %v1113_v51 = vadd.f32 %v4143_v38, %v4975_v45  ;;  %v938_v52 = vpop.f32.mrb[33].mxu1  ;;  %v1104_v53 = vpop.f32.mrb[29].mxu0 }
 0x2e9   :  { %v939_v54 = vadd.f32 %v938_v52, %v4979_v48  ;;  %v1105_v55 = vadd.f32 %v1104_v53, %v4971_v40  ;;  %v4120_v56 = vpop.f32.mrb[34].mxu1  ;;  %v4144_v57 = vpop.f32.mrb[30].mxu0 }
 0x2ea   :  { %976 = vst.msk [vmem:[#allocation2 + $0x150] sm:$0xff] %vm423_vm2, %v947_v39  ;;  %1154 = vst.msk [vmem:[#allocation2 + $0x190] sm:$0xff] %vm423_vm2, %v1113_v51  ;;  %v950_v59 = vadd.f32 %v4120_v56, %v4992_v62  ;;  %v1116_v63 = vadd.f32 %v4144_v57, %v4977_v46  ;;  %v941_v0 = vpop.f32.mrb[35].mxu1  ;;  %v1107_v2 = vpop.f32.mrb[31].mxu0 }
 0x2eb   :  { %974 = vst.msk [vmem:[#allocation2 + $0x140] sm:$0xff] %vm423_vm2, %v939_v54  ;;  %1152 = vst.msk [vmem:[#allocation2 + $0x180] sm:$0xff] %vm423_vm2, %v1105_v55  ;;  %v942_v5 = vadd.f32 %v941_v0, %v4981_v49  ;;  %v1108_v6 = vadd.f32 %v1107_v2, %v4973_v44 }
 0x2ec   :  { %977 = vst.msk [vmem:[#allocation2 + $0x158] sm:$0xff] %vm423_vm2, %v950_v59  ;;  %1155 = vst.msk [vmem:[#allocation2 + $0x198] sm:$0xff] %vm423_vm2, %v1116_v63 }
 0x2ed   :  { %975 = vst.msk [vmem:[#allocation2 + $0x148] sm:$0xff] %vm423_vm2, %v942_v5  ;;  %1153 = vst.msk [vmem:[#allocation2 + $0x188] sm:$0xff] %vm423_vm2, %v1108_v6 }
 0x2ef   :  { %v4123_v8 = vpop.f32.mrb[36].mxu1  ;;  %v4147_v9 = vpop.f32.mrb[32].mxu0 }
 0x2f0   :  { %v963_v11 = vadd.f32 %v4123_v8, %v5007_v12  ;;  %v1129_v14 = vadd.f32 %v4147_v9, %v4987_v58  ;;  %v954_v16 = vpop.f32.mrb[37].mxu1  ;;  %v1120_v17 = vpop.f32.mrb[33].mxu0 }
 0x2f1   :  { %v955_v20 = vadd.f32 %v954_v16, %v4996_v3  ;;  %v1121_v21 = vadd.f32 %v1120_v17, %v4979_v48  ;;  %v4124_v22 = vpop.f32.mrb[38].mxu1  ;;  %v4148_v23 = vpop.f32.mrb[34].mxu0  ;;  %v4414_v17 = vld [vmem:[%s5999_s0 + $0xe0] sm:$0xff]  }
 0x2f2   :  { %980 = vst.msk [vmem:[#allocation2 + $0x170] sm:$0xff] %vm423_vm2, %v963_v11  ;;  %1158 = vst.msk [vmem:[#allocation2 + $0x1b0] sm:$0xff] %vm423_vm2, %v1129_v14  ;;  %v966_v24 = vadd.f32 %v4124_v22, %v5010_v19  ;;  %v1132_v25 = vadd.f32 %v4148_v23, %v4992_v62  ;;  %v957_v26 = vpop.f32.mrb[39].mxu1  ;;  %v1123_v27 = vpop.f32.mrb[35].mxu0 }
 0x2f3   :  { %978 = vst.msk [vmem:[#allocation2 + $0x160] sm:$0xff] %vm423_vm2, %v955_v20  ;;  %1156 = vst.msk [vmem:[#allocation2 + $0x1a0] sm:$0xff] %vm423_vm2, %v1121_v21  ;;  %v958_v28 = vadd.f32 %v957_v26, %v5001_v10  ;;  %v1124_v29 = vadd.f32 %v1123_v27, %v4981_v49  ;;  %v4415_v26 = vld [vmem:[%s5999_s0 + $0xe8] sm:$0xff]   ;;  %v4416_v27 = vld [vmem:[%s5999_s0 + $0xf0] sm:$0xff]  }
 0x2f4   :  { %981 = vst.msk [vmem:[#allocation2 + $0x178] sm:$0xff] %vm423_vm2, %v966_v24  ;;  %1159 = vst.msk [vmem:[#allocation2 + $0x1b8] sm:$0xff] %vm423_vm2, %v1132_v25 }
 0x2f5   :  { %979 = vst.msk [vmem:[#allocation2 + $0x168] sm:$0xff] %vm423_vm2, %v958_v28  ;;  %1157 = vst.msk [vmem:[#allocation2 + $0x1a8] sm:$0xff] %vm423_vm2, %v1124_v29  ;;  %v4417_v28 = vld [vmem:[%s5999_s0 + $0xf8] sm:$0xff]   ;;  %v5269_v29 = vld [vmem:[%s6007_s5 + $0x28] sm:$0xff]  }
 0x2f7   :  { %v4151_v30 = vpop.f32.mrb[36].mxu0  ;;  %v4163_v31 = vpop.f32.mrb[40].mxu1 }
 0x2f8   :  { %v1145_v32 = vadd.f32 %v4151_v30, %v5007_v12  ;;  %v1240_v33 = vadd.f32 %v4163_v31, %v4858_v42  ;;  %v1136_v34 = vpop.f32.mrb[37].mxu0  ;;  %v1231_v35 = vpop.f32.mrb[41].mxu1  ;;  %v16_v30 = vstv %s6008_s8 }
 0x2f9   :  { %v1137_v4 = vadd.f32 %v1136_v34, %v4996_v3  ;;  %v1232_v36 = vadd.f32 %v1231_v35, %v4860_v43  ;;  %v4152_v37 = vpop.f32.mrb[38].mxu0  ;;  %v4164_v7 = vpop.f32.mrb[42].mxu1  ;;  %17 = vst [vmem:[#allocation4] sm:$0x1] %v16_v30 }
 0x2fa   :  { %1162 = vst.msk [vmem:[#allocation2 + $0x1d0] sm:$0xff] %vm423_vm2, %v1145_v32  ;;  %v1148_v38 = vadd.f32 %v4152_v37, %v5010_v19  ;;  %v1243_v39 = vadd.f32 %v4164_v7, %v4863_v47  ;;  %v1139_v51 = vpop.f32.mrb[39].mxu0  ;;  %v1234_v52 = vpop.f32.mrb[43].mxu1  ;;  %v1248_v55 = vmax.f32 %v1240_v33, 0.0 }
 0x2fb   :  { %1160 = vst.msk [vmem:[#allocation2 + $0x1c0] sm:$0xff] %vm423_vm2, %v1137_v4  ;;  %v1140_v53 = vadd.f32 %v1139_v51, %v5001_v10  ;;  %v1235_v54 = vadd.f32 %v1234_v52, %v4866_v50  ;;  %v1246_v57 = vmax.f32 %v1232_v36, 0.0 }
 0x2fc   :  { %1163 = vst.msk [vmem:[#allocation2 + $0x1d8] sm:$0xff] %vm423_vm2, %v1148_v38  ;;  %v1249_v56 = vmax.f32 %v1243_v39, 0.0 }
 0x2fd   :  { %1161 = vst.msk [vmem:[#allocation2 + $0x1c8] sm:$0xff] %vm423_vm2, %v1140_v53  ;;  %v1247_v59 = vmax.f32 %v1235_v54, 0.0 }
 0x2fe   :  { %v1251_v63 = vpack.c.bf16 %v1249_v56, %v1248_v55 }
 0x2ff   :  { %v1250_v0 = vpack.c.bf16 %v1247_v59, %v1246_v57  ;;  %v4191_v2 = vpop.f32.mrb[40].mxu0 }
 0x300   :  { %v1422_v5 = vadd.f32 %v4191_v2, %v4858_v42  ;;  %v1413_v6 = vpop.f32.mrb[41].mxu0  ;;  %v3323_v31 = vld [vmem:[#allocation4] sm:$0x1] }
 0x301   :  { %v1414_v8 = vadd.f32 %v1413_v6, %v4860_v43  ;;  %4165 = vmatprep.subr.bf16.mxu1 %v1250_v0  ;;  %v4192_v9 = vpop.f32.mrb[42].mxu0  ;;  %4371 = vpush %v3323_v31 }
 0x302   :  { %v1425_v11 = vadd.f32 %v4192_v9, %v4863_v47  ;;  %4166 = vmatpush3.bf16.msra.mxu1 %v1250_v0  ;;  %v1416_v14 = vpop.f32.mrb[43].mxu0  ;;  %v1430_v20 = vmax.f32 %v1422_v5, 0.0 }
 0x303   :  { %v1417_v16 = vadd.f32 %v1416_v14, %v4866_v50  ;;  %4167 = vmatprep.subr.bf16.mxu1 %v1251_v63  ;;  %v1428_v22 = vmax.f32 %v1414_v8, 0.0 }
 0x304   :  { %v1431_v21 = vmax.f32 %v1425_v11, 0.0 }
 0x305   :  { %v1429_v23 = vmax.f32 %v1417_v16, 0.0 }
 0x306   :  { %v1433_v24 = vpack.c.bf16 %v1431_v21, %v1430_v20  ;;  %4168 = vmatpush3.bf16.msra.mxu1 %v1251_v63 }
 0x307   :  { %v1432_v25 = vpack.c.bf16 %v1429_v23, %v1428_v22  ;;  %4209 = vmatprep.subr.bf16.mxu1 %v4414_v17 }
 0x309   :  { %4170 = vmatmul.mubr.msk.bf16.vlgmr.msra.gmra.mrb[44].mxu1 %vm323_vm1, %v4873_v60  ;;  %4193 = vmatprep.subr.bf16.mxu0 %v1432_v25 }
 0x30a   :  { %4194 = vmatpush3.bf16.msra.mxu0 %v1432_v25  ;;  %4173 = vmatprep.mubr.msk.bf16.mxu1 %vm323_vm1, %v4878_v61 }
 0x30b   :  { %4195 = vmatprep.subr.bf16.mxu0 %v1433_v24  ;;  %4210 = vmatpush3.bf16.msra.mxu1 %v4414_v17 }
 0x30c   :  { %4211 = vmatprep.subr.bf16.mxu1 %v4415_v26 }
 0x30e   :  { %4196 = vmatpush3.bf16.msra.mxu0 %v1433_v24 }
 0x30f   :  { %4212 = vmatpush3.bf16.msra.mxu1 %v4415_v26  ;;  %4237 = vmatprep.subr.bf16.mxu0 %v4648_v1 }
 0x310   :  { %4213 = vmatprep.subr.bf16.mxu1 %v4416_v27 }
 0x311   :  { %4174 = vmatmul.mubr.msk.bf16.gmra.mrb[48].mxu1 %vm323_vm1, %v4891_v13  ;;  %4198 = vmatmul.mubr.msk.bf16.vlgmr.msra.gmra.mrb[44].mxu0 %vm323_vm1, %v4873_v60  ;;  %v4635_v60 = vld [vmem:[%s6000_s1] sm:$0xff]  }
 0x312   :  { %4177 = vmatprep.mubr.msk.bf16.mxu1 %vm323_vm1, %v4896_v15  ;;  %4201 = vmatprep.mubr.msk.bf16.mxu0 %vm323_vm1, %v4878_v61  ;;  %v4636_v61 = vld [vmem:[%s6000_s1 + $0x8] sm:$0xff]  }
 0x313   :  { %4214 = vmatpush3.bf16.msra.mxu1 %v4416_v27  ;;  %4238 = vmatpush3.bf16.msra.mxu0 %v4648_v1  ;;  %v5226_v1 = vld [vmem:[%s6007_s5] sm:$0xff]  }
 0x314   :  { %4215 = vmatprep.subr.bf16.mxu1 %v4417_v28 }
 0x317   :  { %4216 = vmatpush3.bf16.msra.mxu1 %v4417_v28 }
 0x319   :  { %4178 = vmatmul.mubr.msk.bf16.gmra.mrb[52].mxu1 %vm323_vm1, %v4908_v18  ;;  %4202 = vmatmul.mubr.msk.bf16.gmra.mrb[48].mxu0 %vm323_vm1, %v4891_v13  ;;  %v5241_v13 = vld [vmem:[%s6007_s5 + $0x8] sm:$0xff]  }
 0x31a   :  { %4205 = vmatprep.mubr.msk.bf16.mxu0 %vm323_vm1, %v4896_v15  ;;  %4217 = vmatprep.mubr.msk.bf16.mxu1 %vm231_vm0, %v4635_v60  ;;  %v5246_v15 = vld [vmem:[%s6007_s5 + $0x10] sm:$0xff]  }
 0x321   :  { %4206 = vmatmul.mubr.msk.bf16.gmra.mrb[52].mxu0 %vm323_vm1, %v4908_v18  ;;  %4218 = vmatmul.mubr.msk.bf16.vlgmr.msra.gmra.mrb[56].mxu1 %vm231_vm0, %v4636_v61  ;;  %v5260_v18 = vld [vmem:[%s6007_s5 + $0x20] sm:$0xff]  }
 0x322   :  { %4239 = vmatprep.mubr.msk.bf16.mxu0 %vm323_vm1, %v5226_v1  ;;  %4225 = vmatprep.mubr.msk.bf16.mxu1 %vm323_vm1, %v4852_v41  ;;  %v5255_v41 = vld [vmem:[%s6007_s5 + $0x18] sm:$0xff]  }
 0x329   :  { %4240 = vmatmul.mubr.msk.bf16.vlgmr.msra.gmra.mrb[56].mxu0 %vm323_vm1, %v5241_v13 }
 0x32a   :  { %4243 = vmatprep.mubr.msk.bf16.mxu0 %vm323_vm1, %v5246_v15 }
 0x331   :  { %4244 = vmatmul.mubr.msk.bf16.gmra.mrb[60].mxu0 %vm323_vm1, %v5255_v41 }
 0x332   :  { %4247 = vmatprep.mubr.msk.bf16.mxu0 %vm323_vm1, %v5260_v18 }
 0x339   :  { %4248 = vmatmul.mubr.msk.bf16.gmra.mrb[64].mxu0 %vm323_vm1, %v5269_v29 }
 0x33a   :  { %4271 = vmatprep.mubr.msk.bf16.mxu0 %vm323_vm1, %v5226_v1 }
 0x3dc   :  { %v4171_v32 = vpop.f32.mrb[44].mxu1 }
 0x3dd   :  { %v1295_v33 = vadd.f32 %v4171_v32, %v4975_v45  ;;  %v1286_v34 = vpop.f32.mrb[45].mxu1 }
 0x3de   :  { %v1287_v35 = vadd.f32 %v1286_v34, %v4971_v40  ;;  %v4172_v4 = vpop.f32.mrb[46].mxu1 }
 0x3df   :  { %1336 = vst.msk [vmem:[#allocation2 + $0x1f0] sm:$0xff] %vm423_vm2, %v1295_v33  ;;  %v1298_v36 = vadd.f32 %v4172_v4, %v4977_v46  ;;  %v1289_v37 = vpop.f32.mrb[47].mxu1 }
 0x3e0   :  { %1334 = vst.msk [vmem:[#allocation2 + $0x1e0] sm:$0xff] %vm423_vm2, %v1287_v35  ;;  %v1290_v7 = vadd.f32 %v1289_v37, %v4973_v44 }
 0x3e1   :  { %1337 = vst.msk [vmem:[#allocation2 + $0x1f8] sm:$0xff] %vm423_vm2, %v1298_v36 }
 0x3e2   :  { %1335 = vst.msk [vmem:[#allocation2 + $0x1e8] sm:$0xff] %vm423_vm2, %v1290_v7 }
 0x3e4   :  { %v4175_v38 = vpop.f32.mrb[48].mxu1  ;;  %v4199_v39 = vpop.f32.mrb[44].mxu0 }
 0x3e5   :  { %v1311_v51 = vadd.f32 %v4175_v38, %v4987_v58  ;;  %v1477_v52 = vadd.f32 %v4199_v39, %v4975_v45  ;;  %v1302_v53 = vpop.f32.mrb[49].mxu1  ;;  %v1468_v54 = vpop.f32.mrb[45].mxu0 }
 0x3e6   :  { %v1303_v55 = vadd.f32 %v1302_v53, %v4979_v48  ;;  %v1469_v56 = vadd.f32 %v1468_v54, %v4971_v40  ;;  %v4176_v57 = vpop.f32.mrb[50].mxu1  ;;  %v4200_v59 = vpop.f32.mrb[46].mxu0 }
 0x3e7   :  { %1340 = vst.msk [vmem:[#allocation2 + $0x210] sm:$0xff] %vm423_vm2, %v1311_v51  ;;  %1518 = vst.msk [vmem:[#allocation2 + $0x250] sm:$0xff] %vm423_vm2, %v1477_v52  ;;  %v1314_v63 = vadd.f32 %v4176_v57, %v4992_v62  ;;  %v1480_v0 = vadd.f32 %v4200_v59, %v4977_v46  ;;  %v1305_v2 = vpop.f32.mrb[51].mxu1  ;;  %v1471_v5 = vpop.f32.mrb[47].mxu0 }
 0x3e8   :  { %1338 = vst.msk [vmem:[#allocation2 + $0x200] sm:$0xff] %vm423_vm2, %v1303_v55  ;;  %1516 = vst.msk [vmem:[#allocation2 + $0x240] sm:$0xff] %vm423_vm2, %v1469_v56  ;;  %v1306_v6 = vadd.f32 %v1305_v2, %v4981_v49  ;;  %v1472_v8 = vadd.f32 %v1471_v5, %v4973_v44  ;;  %v1710_v2 = vld [vmem:[#allocation2] sm:$0xff] }
 0x3e9   :  { %1341 = vst.msk [vmem:[#allocation2 + $0x218] sm:$0xff] %vm423_vm2, %v1314_v63  ;;  %1519 = vst.msk [vmem:[#allocation2 + $0x258] sm:$0xff] %vm423_vm2, %v1480_v0  ;;  %v1712_v63 = vld [vmem:[#allocation2 + $0x10] sm:$0xff] }
 0x3ea   :  { %1339 = vst.msk [vmem:[#allocation2 + $0x208] sm:$0xff] %vm423_vm2, %v1306_v6  ;;  %1517 = vst.msk [vmem:[#allocation2 + $0x248] sm:$0xff] %vm423_vm2, %v1472_v8  ;;  %v1713_v8 = vld [vmem:[#allocation2 + $0x18] sm:$0xff] }
 0x3ec   :  { %v4179_v9 = vpop.f32.mrb[52].mxu1  ;;  %v4203_v11 = vpop.f32.mrb[48].mxu0 }
 0x3ed   :  { %v1327_v14 = vadd.f32 %v4179_v9, %v5007_v12  ;;  %v1493_v16 = vadd.f32 %v4203_v11, %v4987_v58  ;;  %v1318_v17 = vpop.f32.mrb[53].mxu1  ;;  %v1484_v20 = vpop.f32.mrb[49].mxu0 }
 0x3ee   :  { %v1319_v21 = vadd.f32 %v1318_v17, %v4996_v3  ;;  %v1485_v22 = vadd.f32 %v1484_v20, %v4979_v48  ;;  %v4180_v23 = vpop.f32.mrb[54].mxu1  ;;  %v4204_v24 = vpop.f32.mrb[50].mxu0 }
 0x3ef   :  { %1344 = vst.msk [vmem:[#allocation2 + $0x230] sm:$0xff] %vm423_vm2, %v1327_v14  ;;  %1522 = vst.msk [vmem:[#allocation2 + $0x270] sm:$0xff] %vm423_vm2, %v1493_v16  ;;  %v1330_v25 = vadd.f32 %v4180_v23, %v5010_v19  ;;  %v1496_v26 = vadd.f32 %v4204_v24, %v4992_v62  ;;  %v1321_v27 = vpop.f32.mrb[55].mxu1  ;;  %v1487_v28 = vpop.f32.mrb[51].mxu0  ;;  %v1711_v14 = vld [vmem:[#allocation2 + $0x8] sm:$0xff]  ;;  %v1716_v23 = vld [vmem:[#allocation2 + $0x30] sm:$0xff] }
 0x3f0   :  { %1342 = vst.msk [vmem:[#allocation2 + $0x220] sm:$0xff] %vm423_vm2, %v1319_v21  ;;  %1520 = vst.msk [vmem:[#allocation2 + $0x260] sm:$0xff] %vm423_vm2, %v1485_v22  ;;  %v1322_v60 = vadd.f32 %v1321_v27, %v5001_v10  ;;  %v1488_v61 = vadd.f32 %v1487_v28, %v4981_v49  ;;  %v5330_v28 = vpop.permute.xlu0 %171 }
 0x3f1   :  { %1345 = vst.msk [vmem:[#allocation2 + $0x238] sm:$0xff] %vm423_vm2, %v1330_v25  ;;  %1523 = vst.msk [vmem:[#allocation2 + $0x278] sm:$0xff] %vm423_vm2, %v1496_v26  ;;  %v1714_v26 = vld [vmem:[#allocation2 + $0x20] sm:$0xff] }
 0x3f2   :  { %1343 = vst.msk [vmem:[#allocation2 + $0x228] sm:$0xff] %vm423_vm2, %v1322_v60  ;;  %1521 = vst.msk [vmem:[#allocation2 + $0x268] sm:$0xff] %vm423_vm2, %v1488_v61  ;;  %v4637_v61 = vld [vmem:[%s6006_s3 + $0x8] sm:$0xff]  }
 0x3f4   :  { %v4207_v30 = vpop.f32.mrb[52].mxu0  ;;  %v4219_v31 = vpop.f32.mrb[56].mxu1 }
 0x3f5   :  { %v1509_v32 = vadd.f32 %v4207_v30, %v5007_v12  ;;  %v1604_v33 = vadd.f32 %v4219_v31, %v4858_v42  ;;  %v1500_v34 = vpop.f32.mrb[53].mxu0  ;;  %v1595_v35 = vpop.f32.mrb[57].mxu1  ;;  %v1717_v30 = vld [vmem:[#allocation2 + $0x38] sm:$0xff] }
 0x3f6   :  { %v1501_v4 = vadd.f32 %v1500_v34, %v4996_v3  ;;  %v1596_v36 = vadd.f32 %v1595_v35, %v4860_v43  ;;  %v4208_v37 = vpop.f32.mrb[54].mxu0  ;;  %v4220_v7 = vpop.f32.mrb[58].mxu1  ;;  %v1715_v34 = vld [vmem:[#allocation2 + $0x28] sm:$0xff] }
 0x3f7   :  { %1526 = vst.msk [vmem:[#allocation2 + $0x290] sm:$0xff] %vm423_vm2, %v1509_v32  ;;  %v1512_v38 = vadd.f32 %v4208_v37, %v5010_v19  ;;  %v1607_v39 = vadd.f32 %v4220_v7, %v4863_v47  ;;  %v1503_v51 = vpop.f32.mrb[55].mxu0  ;;  %v1598_v52 = vpop.f32.mrb[59].mxu1  ;;  %v1612_v54 = vmax.f32 %v1604_v33, 0.0 }
 0x3f8   :  { %1524 = vst.msk [vmem:[#allocation2 + $0x280] sm:$0xff] %vm423_vm2, %v1501_v4  ;;  %v1504_v42 = vadd.f32 %v1503_v51, %v5001_v10  ;;  %v1599_v53 = vadd.f32 %v1598_v52, %v4866_v50  ;;  %v1610_v55 = vmax.f32 %v1596_v36, 0.0  ;;  %v4638_v4 = vld [vmem:[%s6006_s3 + $0x10] sm:$0xff]   ;;  %v5340_v36 = vpop.permute.xlu1 %176 }
 0x3f9   :  { %1527 = vst.msk [vmem:[#allocation2 + $0x298] sm:$0xff] %vm423_vm2, %v1512_v38  ;;  %v1613_v43 = vmax.f32 %v1607_v39, 0.0 }
 0x3fa   :  { %1525 = vst.msk [vmem:[#allocation2 + $0x288] sm:$0xff] %vm423_vm2, %v1504_v42  ;;  %v1611_v56 = vmax.f32 %v1599_v53, 0.0  ;;  %v5342_v42 = vpop.permute.xlu0 %181 }
 0x3fb   :  { %v1615_v57 = vpack.c.bf16 %v1613_v43, %v1612_v54 }
 0x3fc   :  { %v1614_v59 = vpack.c.bf16 %v1611_v56, %v1610_v55  ;;  %v4241_v47 = vpop.f32.mrb[56].mxu0 }
 0x3fd   :  { %v1853_v0 = vadd.f32 %v4241_v47, %v1712_v63  ;;  %v1804_v5 = vpop.f32.mrb[57].mxu0  ;;  %v5345_v63 = vpop.permute.xlu1 %186 }
 0x3fe   :  { %v1851_v6 = vadd.f32 %v1804_v5, %v1710_v2  ;;  %4221 = vmatprep.subr.bf16.mxu1 %v1614_v59  ;;  %v4242_v9 = vpop.f32.mrb[58].mxu0  ;;  %v4639_v5 = vld [vmem:[%s6006_s3 + $0x18] sm:$0xff]  }
 0x3ff   :  { %v1857_v50 = vmul.f32 0.5, %v1853_v0  ;;  %v1854_v11 = vadd.f32 %v4242_v9, %v1713_v8  ;;  %4222 = vmatpush3.bf16.msra.mxu1 %v1614_v59  ;;  %v1807_v16 = vpop.f32.mrb[59].mxu0 }
 0x400   :  { %v1855_v17 = vmul.f32 0.5, %v1851_v6  ;;  %v1852_v20 = vadd.f32 %v1807_v16, %v1711_v14  ;;  %4223 = vmatprep.subr.bf16.mxu1 %v1615_v57  ;;  %v4640_v14 = vld [vmem:[%s6006_s3 + $0x20] sm:$0xff]  }
 0x401   :  { %4425 = vtanh.f32 %v1857_v50  ;;  %v1858_v21 = vmul.f32 0.5, %v1854_v11 }
 0x402   :  { %4427 = vtanh.f32 %v1855_v17  ;;  %v1856_v22 = vmul.f32 0.5, %v1852_v20 }
 0x403   :  { %4429 = vtanh.f32 %v1858_v21  ;;  %4224 = vmatpush3.bf16.msra.mxu1 %v1615_v57  ;;  %v1720_v21 = vld [vmem:[#allocation2 + $0x50] sm:$0xff] }
 0x404   :  { %4431 = vtanh.f32 %v1856_v22  ;;  %v4245_v24 = vpop.f32.mrb[60].mxu0 }
 0x405   :  { %v1873_v25 = vadd.f32 %v4245_v24, %v1716_v23  ;;  %v1820_v27 = vpop.f32.mrb[61].mxu0 }
 0x406   :  { %v1871_v60 = vadd.f32 %v1820_v27, %v1714_v26  ;;  %4226 = vmatmul.mubr.msk.bf16.vlgmr.msra.gmra.mrb[60].mxu1 %vm323_vm1, %v4637_v61  ;;  %v4246_v31 = vpop.f32.mrb[62].mxu0  ;;  %v1721_v61 = vld [vmem:[#allocation2 + $0x58] sm:$0xff] }
 0x407   :  { %v1877_v32 = vmul.f32 0.5, %v1873_v25  ;;  %v1874_v33 = vadd.f32 %v4246_v31, %v1717_v30  ;;  %v1823_v35 = vpop.f32.mrb[63].mxu0  ;;  %4229 = vmatprep.mubr.msk.bf16.mxu1 %vm323_vm1, %v4638_v4  ;;  %v1718_v25 = vld [vmem:[#allocation2 + $0x40] sm:$0xff] }
 0x408   :  { %v1875_v37 = vmul.f32 0.5, %v1871_v60  ;;  %v1872_v7 = vadd.f32 %v1823_v35, %v1715_v34 }
 0x409   :  { %4433 = vtanh.f32 %v1877_v32  ;;  %v1878_v38 = vmul.f32 0.5, %v1874_v33  ;;  %v1719_v33 = vld [vmem:[#allocation2 + $0x48] sm:$0xff] }
 0x40a   :  { %4435 = vtanh.f32 %v1875_v37  ;;  %v1876_v39 = vmul.f32 0.5, %v1872_v7 }
 0x40b   :  { %v4426_v51 = vpop.eup %4425  ;;  %4437 = vtanh.f32 %v1878_v38  ;;  %v4641_v38 = vld [vmem:[%s6006_s3 + $0x28] sm:$0xff]  }
 0x40c   :  { %v4428_v52 = vpop.eup %4427  ;;  %v1865_v53 = vadd.f32 1.0, %v4426_v51  ;;  %4439 = vtanh.f32 %v1876_v39  ;;  %v4249_v54 = vpop.f32.mrb[64].mxu0 }
 0x40d   :  { %v4430_v43 = vpop.eup %4429  ;;  %v1863_v55 = vadd.f32 1.0, %v4428_v52  ;;  %v1893_v56 = vadd.f32 %v4249_v54, %v5342_v42  ;;  %v1836_v57 = vpop.f32.mrb[65].mxu0 }
 0x40e   :  { %v4432_v59 = vpop.eup %4431  ;;  %v1866_v47 = vadd.f32 1.0, %v4430_v43  ;;  %v1869_v0 = vmul.f32 0.5, %v1865_v53  ;;  %v1891_v2 = vadd.f32 %v1836_v57, %v5330_v28  ;;  %4230 = vmatmul.mubr.msk.bf16.gmra.mrb[64].mxu1 %vm323_vm1, %v4639_v5  ;;  %v4250_v6 = vpop.f32.mrb[66].mxu0 }
 0x40f   :  { %v1864_v8 = vadd.f32 1.0, %v4432_v59  ;;  %v1867_v9 = vmul.f32 0.5, %v1863_v55  ;;  %v1894_v50 = vadd.f32 %v4250_v6, %v5345_v63  ;;  %v1839_v11 = vpop.f32.mrb[67].mxu0  ;;  %4233 = vmatprep.mubr.msk.bf16.mxu1 %vm323_vm1, %v4640_v14 }
 0x410   :  { %v1897_v16 = vmul.f32 %v1893_v56, %v1869_v0  ;;  %v1870_v17 = vmul.f32 0.5, %v1866_v47  ;;  %v1892_v20 = vadd.f32 %v1839_v11, %v5340_v36 }
 0x411   :  { %v1895_v22 = vmul.f32 %v1891_v2, %v1867_v9  ;;  %v1868_v23 = vmul.f32 0.5, %v1864_v8 }
 0x412   :  { %v1901_v24 = vadd.f32 %v1897_v16, %v1720_v21  ;;  %v1898_v26 = vmul.f32 %v1894_v50, %v1870_v17 }
 0x413   :  { %v4434_v27 = vpop.eup %4433  ;;  %v1899_v60 = vadd.f32 %v1895_v22, %v1718_v25  ;;  %v1896_v30 = vmul.f32 %v1892_v20, %v1868_v23 }
 0x414   :  { %v4436_v31 = vpop.eup %4435  ;;  %4441 = vtanh.f32 %v1901_v24  ;;  %v1902_v32 = vadd.f32 %v1898_v26, %v1721_v61  ;;  %v1885_v35 = vadd.f32 1.0, %v4434_v27 }
 0x415   :  { %v4438_v34 = vpop.eup %4437  ;;  %4443 = vtanh.f32 %v1899_v60  ;;  %v1900_v4 = vadd.f32 %v1896_v30, %v1719_v33  ;;  %v1883_v7 = vadd.f32 1.0, %v4436_v31 }
 0x416   :  { %v4440_v37 = vpop.eup %4439  ;;  %4445 = vtanh.f32 %v1902_v32  ;;  %4234 = vmatmul.mubr.msk.bf16.gmra.mrb[68].mxu1 %vm323_vm1, %v4641_v38  ;;  %v1886_v39 = vadd.f32 1.0, %v4438_v34  ;;  %v1889_v52 = vmul.f32 0.5, %v1885_v35 }
 0x417   :  { %4447 = vtanh.f32 %v1900_v4  ;;  %4255 = vmatprep.mubr.msk.bf16.mxu1 %vm323_vm1, %v5226_v1  ;;  %v1884_v51 = vadd.f32 1.0, %v4440_v37  ;;  %v1887_v53 = vmul.f32 0.5, %v1883_v7 }
 0x418   :  { %v1890_v54 = vmul.f32 0.5, %v1886_v39  ;;  %v1909_v55 = vsub.f32 1.0, %v1889_v52  ;;  %v1917_v47 = vmul.f32 0.0, %v1889_v52  ;;  %v1929_v52 = vld [vmem:[#allocation2 + $0x70] sm:$0xff] }
 0x419   :  { %v1888_v43 = vmul.f32 0.5, %v1884_v51  ;;  %v1907_v57 = vsub.f32 1.0, %v1887_v53  ;;  %v1915_v6 = vmul.f32 0.0, %v1887_v53 }
 0x41a   :  { %v1910_v0 = vsub.f32 1.0, %v1890_v54  ;;  %v1918_v11 = vmul.f32 0.0, %v1890_v54  ;;  %v1927_v54 = vld [vmem:[#allocation2 + $0x60] sm:$0xff] }
 0x41b   :  { %v1908_v8 = vsub.f32 1.0, %v1888_v43  ;;  %v1916_v17 = vmul.f32 0.0, %v1888_v43 }
 0x41e   :  { %v4442_v56 = vpop.eup %4441 }
 0x41f   :  { %v4444_v59 = vpop.eup %4443  ;;  %v1913_v2 = vmul.f32 %v4442_v56, %v1909_v55  ;;  %v1930_v55 = vld [vmem:[#allocation2 + $0x78] sm:$0xff] }
 0x420   :  { %v4446_v5 = vpop.eup %4445  ;;  %v1911_v9 = vmul.f32 %v4444_v59, %v1907_v57 }
 0x421   :  { %v4448_v50 = vpop.eup %4447  ;;  %v1914_v14 = vmul.f32 %v4446_v5, %v1910_v0  ;;  %v5364_v16 = vadd.f32 %v1917_v47, %v1913_v2 }
 0x422   :  { %v1912_v20 = vmul.f32 %v4448_v50, %v1908_v8  ;;  %v5366_v21 = vadd.f32 %v1915_v6, %v1911_v9  ;;  %v1933_v6 = vld [vmem:[#allocation2 + $0x90] sm:$0xff]  ;;  %v1931_v50 = vld [vmem:[#allocation2 + $0x80] sm:$0xff] }
 0x423   :  { %v5368_v22 = vadd.f32 %v1918_v11, %v1914_v14  ;;  %1925 = vst.msk [vmem:[#allocation3 + $0x10] sm:$0xff] %vm423_vm2, %v5364_v16 }
 0x424   :  { %v5372_v23 = vadd.f32 %v1916_v17, %v1912_v20  ;;  %1923 = vst.msk [vmem:[#allocation3] sm:$0xff] %vm423_vm2, %v5366_v21  ;;  %v1934_v17 = vld [vmem:[#allocation2 + $0x98] sm:$0xff] }
 0x425   :  { %1926 = vst.msk [vmem:[#allocation3 + $0x18] sm:$0xff] %vm423_vm2, %v5368_v22  ;;  %v1940_v25 = vpack.c.bf16 %v5368_v22, %v5364_v16 }
 0x426   :  { %1924 = vst.msk [vmem:[#allocation3 + $0x8] sm:$0xff] %vm423_vm2, %v5372_v23  ;;  %v1939_v24 = vpack.c.bf16 %v5372_v23, %v5366_v21 }
 0x428   :  { %4251 = vmatprep.subr.bf16.mxu1 %v1939_v24 }
 0x429   :  { %4252 = vmatpush3.bf16.msra.mxu1 %v1939_v24 }
 0x42a   :  { %4253 = vmatprep.subr.bf16.mxu1 %v1940_v25 }
 0x42d   :  { %4254 = vmatpush3.bf16.msra.mxu1 %v1940_v25 }
 0x430   :  { %4256 = vmatmul.mubr.msk.bf16.vlgmr.msra.gmra.mrb[72].mxu1 %vm323_vm1, %v5241_v13 }
 0x431   :  { %4259 = vmatprep.mubr.msk.bf16.mxu1 %vm323_vm1, %v5246_v15 }
 0x438   :  { %4260 = vmatmul.mubr.msk.bf16.gmra.mrb[76].mxu1 %vm323_vm1, %v5255_v41 }
 0x439   :  { %4263 = vmatprep.mubr.msk.bf16.mxu1 %vm323_vm1, %v5260_v18 }
 0x440   :  { %4264 = vmatmul.mubr.msk.bf16.gmra.mrb[80].mxu1 %vm323_vm1, %v5269_v29 }
 0x441   :  { %4287 = vmatprep.mubr.msk.bf16.mxu1 %vm323_vm1, %v5226_v1 }
 0x4d9   :  { %v4227_v26 = vpop.f32.mrb[60].mxu1 }
 0x4da   :  { %v1659_v27 = vadd.f32 %v4227_v26, %v4975_v45  ;;  %v1650_v60 = vpop.f32.mrb[61].mxu1  ;;  %v1932_v26 = vld [vmem:[#allocation2 + $0x88] sm:$0xff] }
 0x4db   :  { %v1651_v61 = vadd.f32 %v1650_v60, %v4971_v40  ;;  %v4228_v30 = vpop.f32.mrb[62].mxu1 }
 0x4dc   :  { %1700 = vst.msk [vmem:[#allocation2 + $0x2b0] sm:$0xff] %vm423_vm2, %v1659_v27  ;;  %v1662_v31 = vadd.f32 %v4228_v30, %v4977_v46  ;;  %v1653_v32 = vpop.f32.mrb[63].mxu1 }
 0x4dd   :  { %1698 = vst.msk [vmem:[#allocation2 + $0x2a0] sm:$0xff] %vm423_vm2, %v1651_v61  ;;  %v1654_v33 = vadd.f32 %v1653_v32, %v4973_v44 }
 0x4de   :  { %1701 = vst.msk [vmem:[#allocation2 + $0x2b8] sm:$0xff] %vm423_vm2, %v1662_v31 }
 0x4df   :  { %1699 = vst.msk [vmem:[#allocation2 + $0x2a8] sm:$0xff] %vm423_vm2, %v1654_v33 }
 0x4e1   :  { %v4231_v34 = vpop.f32.mrb[64].mxu1 }
 0x4e2   :  { %v1675_v45 = vadd.f32 %v4231_v34, %v4987_v58  ;;  %v1666_v35 = vpop.f32.mrb[65].mxu1 }
 0x4e3   :  { %v1667_v40 = vadd.f32 %v1666_v35, %v4979_v48  ;;  %v4232_v4 = vpop.f32.mrb[66].mxu1 }
 0x4e4   :  { %1704 = vst.msk [vmem:[#allocation2 + $0x2d0] sm:$0xff] %vm423_vm2, %v1675_v45  ;;  %v1678_v46 = vadd.f32 %v4232_v4, %v4992_v62  ;;  %v1669_v37 = vpop.f32.mrb[67].mxu1 }
 0x4e5   :  { %1702 = vst.msk [vmem:[#allocation2 + $0x2c0] sm:$0xff] %vm423_vm2, %v1667_v40  ;;  %v1670_v44 = vadd.f32 %v1669_v37, %v4981_v49 }
 0x4e6   :  { %1705 = vst.msk [vmem:[#allocation2 + $0x2d8] sm:$0xff] %vm423_vm2, %v1678_v46 }
 0x4e7   :  { %1703 = vst.msk [vmem:[#allocation2 + $0x2c8] sm:$0xff] %vm423_vm2, %v1670_v44 }
 0x4e9   :  { %v4235_v7 = vpop.f32.mrb[68].mxu1 }
 0x4ea   :  { %v1691_v58 = vadd.f32 %v4235_v7, %v5007_v12  ;;  %v1682_v38 = vpop.f32.mrb[69].mxu1 }
 0x4eb   :  { %v1683_v48 = vadd.f32 %v1682_v38, %v4996_v3  ;;  %v4236_v39 = vpop.f32.mrb[70].mxu1 }
 0x4ec   :  { %1708 = vst.msk [vmem:[#allocation2 + $0x2f0] sm:$0xff] %vm423_vm2, %v1691_v58  ;;  %v1694_v62 = vadd.f32 %v4236_v39, %v5010_v19  ;;  %v1685_v51 = vpop.f32.mrb[71].mxu1  ;;  %v1928_v19 = vld [vmem:[#allocation2 + $0x68] sm:$0xff] }
 0x4ed   :  { %1706 = vst.msk [vmem:[#allocation2 + $0x2e0] sm:$0xff] %vm423_vm2, %v1683_v48  ;;  %v1686_v49 = vadd.f32 %v1685_v51, %v5001_v10 }
 0x4ee   :  { %1709 = vst.msk [vmem:[#allocation2 + $0x2f8] sm:$0xff] %vm423_vm2, %v1694_v62 }
 0x4ef   :  { %1707 = vst.msk [vmem:[#allocation2 + $0x2e8] sm:$0xff] %vm423_vm2, %v1686_v49 }
 0x503   :  { %v4257_v53 = vpop.f32.mrb[72].mxu1 }
 0x504   :  { %v2024_v12 = vadd.f32 %v4257_v53, %v1929_v52  ;;  %v1975_v43 = vpop.f32.mrb[73].mxu1 }
 0x505   :  { %v2022_v3 = vadd.f32 %v1975_v43, %v1927_v54  ;;  %v4258_v56 = vpop.f32.mrb[74].mxu1 }
 0x506   :  { %v2028_v57 = vmul.f32 0.5, %v2024_v12  ;;  %v2025_v59 = vadd.f32 %v4258_v56, %v1930_v55  ;;  %v1978_v47 = vpop.f32.mrb[75].mxu1  ;;  %v1937_v12 = vld [vmem:[#allocation2 + $0xb0] sm:$0xff]  ;;  %v1935_v55 = vld [vmem:[#allocation2 + $0xa0] sm:$0xff] }
 0x507   :  { %v2026_v0 = vmul.f32 0.5, %v2022_v3  ;;  %v2023_v2 = vadd.f32 %v1978_v47, %v1928_v19  ;;  %v1938_v19 = vld [vmem:[#allocation2 + $0xb8] sm:$0xff] }
 0x508   :  { %4449 = vtanh.f32 %v2028_v57  ;;  %v2029_v10 = vmul.f32 0.5, %v2025_v59 }
 0x509   :  { %4451 = vtanh.f32 %v2026_v0  ;;  %v2027_v5 = vmul.f32 0.5, %v2023_v2 }
 0x50a   :  { %4453 = vtanh.f32 %v2029_v10  ;;  %v1936_v10 = vld [vmem:[#allocation2 + $0xa8] sm:$0xff] }
 0x50b   :  { %4455 = vtanh.f32 %v2027_v5  ;;  %v4261_v8 = vpop.f32.mrb[76].mxu1 }
 0x50c   :  { %v2044_v9 = vadd.f32 %v4261_v8, %v1933_v6  ;;  %v1991_v11 = vpop.f32.mrb[77].mxu1 }
 0x50d   :  { %v2042_v14 = vadd.f32 %v1991_v11, %v1931_v50  ;;  %v4262_v20 = vpop.f32.mrb[78].mxu1 }
 0x50e   :  { %v2048_v24 = vmul.f32 0.5, %v2044_v9  ;;  %v2045_v25 = vadd.f32 %v4262_v20, %v1934_v17  ;;  %v1994_v27 = vpop.f32.mrb[79].mxu1 }
 0x50f   :  { %v2046_v60 = vmul.f32 0.5, %v2042_v14  ;;  %v2043_v61 = vadd.f32 %v1994_v27, %v1932_v26 }
 0x510   :  { %4457 = vtanh.f32 %v2048_v24  ;;  %v2049_v30 = vmul.f32 0.5, %v2045_v25 }
 0x511   :  { %4459 = vtanh.f32 %v2046_v60  ;;  %v2047_v31 = vmul.f32 0.5, %v2043_v61 }
 0x512   :  { %v4450_v32 = vpop.eup %4449  ;;  %4461 = vtanh.f32 %v2049_v30 }
 0x513   :  { %v4452_v33 = vpop.eup %4451  ;;  %v2036_v34 = vadd.f32 1.0, %v4450_v32  ;;  %4463 = vtanh.f32 %v2047_v31  ;;  %v4265_v45 = vpop.f32.mrb[80].mxu1 }
 0x514   :  { %v4454_v35 = vpop.eup %4453  ;;  %v2034_v40 = vadd.f32 1.0, %v4452_v33  ;;  %v2064_v4 = vadd.f32 %v4265_v45, %v5342_v42  ;;  %v2007_v46 = vpop.f32.mrb[81].mxu1 }
 0x515   :  { %v4456_v37 = vpop.eup %4455  ;;  %v2037_v44 = vadd.f32 1.0, %v4454_v35  ;;  %v2040_v7 = vmul.f32 0.5, %v2036_v34  ;;  %v2062_v58 = vadd.f32 %v2007_v46, %v5330_v28  ;;  %v4266_v38 = vpop.f32.mrb[82].mxu1 }
 0x516   :  { %v2035_v48 = vadd.f32 1.0, %v4456_v37  ;;  %v2038_v39 = vmul.f32 0.5, %v2034_v40  ;;  %v2065_v62 = vadd.f32 %v4266_v38, %v5345_v63  ;;  %v2010_v51 = vpop.f32.mrb[83].mxu1 }
 0x517   :  { %v2068_v49 = vmul.f32 %v2064_v4, %v2040_v7  ;;  %v2041_v52 = vmul.f32 0.5, %v2037_v44  ;;  %v2063_v53 = vadd.f32 %v2010_v51, %v5340_v36 }
 0x518   :  { %v2066_v54 = vmul.f32 %v2062_v58, %v2038_v39  ;;  %v2039_v43 = vmul.f32 0.5, %v2035_v48 }
 0x519   :  { %v2072_v3 = vadd.f32 %v2068_v49, %v1937_v12  ;;  %v2069_v56 = vmul.f32 %v2065_v62, %v2041_v52  ;;  %v2099_v62 = vld [vmem:[#allocation2 + $0xc0] sm:$0xff]  ;;  %v2102_v49 = vld [vmem:[#allocation2 + $0xd8] sm:$0xff] }
 0x51a   :  { %v4458_v57 = vpop.eup %4457  ;;  %v2070_v59 = vadd.f32 %v2066_v54, %v1935_v55  ;;  %v2067_v47 = vmul.f32 %v2063_v53, %v2039_v43 }
 0x51b   :  { %v4460_v0 = vpop.eup %4459  ;;  %4465 = vtanh.f32 %v2072_v3  ;;  %v2073_v2 = vadd.f32 %v2069_v56, %v1938_v19  ;;  %v2056_v6 = vadd.f32 1.0, %v4458_v57  ;;  %v2103_v56 = vld [vmem:[#allocation2 + $0xe0] sm:$0xff]  ;;  %v2106_v19 = vld [vmem:[#allocation2 + $0xf8] sm:$0xff] }
 0x51c   :  { %v4462_v5 = vpop.eup %4461  ;;  %4467 = vtanh.f32 %v2070_v59  ;;  %v2071_v8 = vadd.f32 %v2067_v47, %v1936_v10  ;;  %v2054_v50 = vadd.f32 1.0, %v4460_v0  ;;  %v2104_v10 = vld [vmem:[#allocation2 + $0xe8] sm:$0xff] }
 0x51d   :  { %v4464_v9 = vpop.eup %4463  ;;  %4469 = vtanh.f32 %v2073_v2  ;;  %v2057_v11 = vadd.f32 1.0, %v4462_v5  ;;  %v2060_v17 = vmul.f32 0.5, %v2056_v6 }
 0x51e   :  { %4471 = vtanh.f32 %v2071_v8  ;;  %v2055_v14 = vadd.f32 1.0, %v4464_v9  ;;  %v2058_v20 = vmul.f32 0.5, %v2054_v50 }
 0x51f   :  { %v2061_v24 = vmul.f32 0.5, %v2057_v11  ;;  %v2080_v26 = vsub.f32 1.0, %v2060_v17  ;;  %v2088_v30 = vmul.f32 %v2060_v17, %v5364_v16 }
 0x520   :  { %v2059_v25 = vmul.f32 0.5, %v2055_v14  ;;  %v2078_v60 = vsub.f32 1.0, %v2058_v20  ;;  %v2086_v34 = vmul.f32 %v2058_v20, %v5366_v21 }
 0x521   :  { %v2081_v31 = vsub.f32 1.0, %v2061_v24  ;;  %v2089_v4 = vmul.f32 %v2061_v24, %v5368_v22 }
 0x522   :  { %v2079_v45 = vsub.f32 1.0, %v2059_v25  ;;  %v2087_v44 = vmul.f32 %v2059_v25, %v5372_v23  ;;  %v2101_v23 = vld [vmem:[#allocation2 + $0xd0] sm:$0xff] }
 0x525   :  { %v4466_v27 = vpop.eup %4465 }
 0x526   :  { %v4468_v61 = vpop.eup %4467  ;;  %v2084_v32 = vmul.f32 %v4466_v27, %v2080_v26 }
 0x527   :  { %v4470_v33 = vpop.eup %4469  ;;  %v2082_v35 = vmul.f32 %v4468_v61, %v2078_v60 }
 0x528   :  { %v4472_v40 = vpop.eup %4471  ;;  %v2085_v46 = vmul.f32 %v4470_v33, %v2081_v31  ;;  %v5427_v37 = vadd.f32 %v2088_v30, %v2084_v32 }
 0x529   :  { %v2083_v7 = vmul.f32 %v4472_v40, %v2079_v45  ;;  %v5430_v58 = vadd.f32 %v2086_v34, %v2082_v35 }
 0x52a   :  { %v5432_v38 = vadd.f32 %v2089_v4, %v2085_v46  ;;  %2097 = vst.msk [vmem:[#allocation3 + $0x30] sm:$0xff] %vm423_vm2, %v5427_v37 }
 0x52b   :  { %v5436_v16 = vadd.f32 %v2087_v44, %v2083_v7  ;;  %2095 = vst.msk [vmem:[#allocation3 + $0x20] sm:$0xff] %vm423_vm2, %v5430_v58  ;;  %v2109_v44 = vld [vmem:[#allocation2 + $0x110] sm:$0xff] }
 0x52c   :  { %2098 = vst.msk [vmem:[#allocation3 + $0x38] sm:$0xff] %vm423_vm2, %v5432_v38  ;;  %v2112_v22 = vpack.c.bf16 %v5432_v38, %v5427_v37 }
 0x52d   :  { %2096 = vst.msk [vmem:[#allocation3 + $0x28] sm:$0xff] %vm423_vm2, %v5436_v16  ;;  %v2111_v21 = vpack.c.bf16 %v5436_v16, %v5430_v58 }
 0x52f   :  { %4267 = vmatprep.subr.bf16.mxu0 %v2111_v21 }
 0x530   :  { %4268 = vmatpush3.bf16.msra.mxu0 %v2111_v21 }
 0x531   :  { %4269 = vmatprep.subr.bf16.mxu0 %v2112_v22 }
 0x534   :  { %4270 = vmatpush3.bf16.msra.mxu0 %v2112_v22 }
 0x537   :  { %4272 = vmatmul.mubr.msk.bf16.vlgmr.msra.gmra.mrb[68].mxu0 %vm323_vm1, %v5241_v13 }
 0x538   :  { %4275 = vmatprep.mubr.msk.bf16.mxu0 %vm323_vm1, %v5246_v15 }
 0x53f   :  { %4276 = vmatmul.mubr.msk.bf16.gmra.mrb[72].mxu0 %vm323_vm1, %v5255_v41  ;;  %v2100_v41 = vld [vmem:[#allocation2 + $0xc8] sm:$0xff] }
 0x540   :  { %4279 = vmatprep.mubr.msk.bf16.mxu0 %vm323_vm1, %v5260_v18 }
 0x547   :  { %4280 = vmatmul.mubr.msk.bf16.gmra.mrb[76].mxu0 %vm323_vm1, %v5269_v29 }
 0x548   :  { %4303 = vmatprep.mubr.msk.bf16.mxu0 %vm323_vm1, %v5226_v1  ;;  %v2105_v1 = vld [vmem:[#allocation2 + $0xf0] sm:$0xff] }
 0x60a   :  { %v4273_v48 = vpop.f32.mrb[68].mxu0 }
 0x60b   :  { %v2196_v39 = vadd.f32 %v4273_v48, %v2101_v23  ;;  %v2147_v13 = vpop.f32.mrb[69].mxu0  ;;  %v2107_v23 = vld [vmem:[#allocation2 + $0x100] sm:$0xff] }
 0x60c   :  { %v2194_v51 = vadd.f32 %v2147_v13, %v2099_v62  ;;  %v4274_v15 = vpop.f32.mrb[70].mxu0  ;;  %v2110_v13 = vld [vmem:[#allocation2 + $0x118] sm:$0xff] }
 0x60d   :  { %v2200_v52 = vmul.f32 0.5, %v2196_v39  ;;  %v2197_v53 = vadd.f32 %v4274_v15, %v2102_v49  ;;  %v2150_v12 = vpop.f32.mrb[71].mxu0 }
 0x60e   :  { %v2198_v54 = vmul.f32 0.5, %v2194_v51  ;;  %v2195_v18 = vadd.f32 %v2150_v12, %v2100_v41 }
 0x60f   :  { %4473 = vtanh.f32 %v2200_v52  ;;  %v2201_v43 = vmul.f32 0.5, %v2197_v53  ;;  %v2108_v52 = vld [vmem:[#allocation2 + $0x108] sm:$0xff] }
 0x610   :  { %4475 = vtanh.f32 %v2198_v54  ;;  %v2199_v29 = vmul.f32 0.5, %v2195_v18 }
 0x611   :  { %4477 = vtanh.f32 %v2201_v43 }
 0x612   :  { %4479 = vtanh.f32 %v2199_v29  ;;  %v4277_v3 = vpop.f32.mrb[72].mxu0 }
 0x613   :  { %v2216_v55 = vadd.f32 %v4277_v3, %v2105_v1  ;;  %v2163_v57 = vpop.f32.mrb[73].mxu0 }
 0x614   :  { %v2214_v59 = vadd.f32 %v2163_v57, %v2103_v56  ;;  %v4278_v47 = vpop.f32.mrb[74].mxu0 }
 0x615   :  { %v2220_v0 = vmul.f32 0.5, %v2216_v55  ;;  %v2217_v2 = vadd.f32 %v4278_v47, %v2106_v19  ;;  %v2166_v5 = vpop.f32.mrb[75].mxu0 }
 0x616   :  { %v2218_v6 = vmul.f32 0.5, %v2214_v59  ;;  %v2215_v8 = vadd.f32 %v2166_v5, %v2104_v10 }
 0x617   :  { %4481 = vtanh.f32 %v2220_v0  ;;  %v2221_v9 = vmul.f32 0.5, %v2217_v2 }
 0x618   :  { %4483 = vtanh.f32 %v2218_v6  ;;  %v2219_v50 = vmul.f32 0.5, %v2215_v8 }
 0x619   :  { %v4474_v11 = vpop.eup %4473  ;;  %4485 = vtanh.f32 %v2221_v9 }
 0x61a   :  { %v4476_v14 = vpop.eup %4475  ;;  %v2208_v17 = vadd.f32 1.0, %v4474_v11  ;;  %4487 = vtanh.f32 %v2219_v50  ;;  %v4281_v20 = vpop.f32.mrb[76].mxu0 }
 0x61b   :  { %v4478_v24 = vpop.eup %4477  ;;  %v2206_v25 = vadd.f32 1.0, %v4476_v14  ;;  %v2236_v26 = vadd.f32 %v4281_v20, %v5342_v42  ;;  %v2179_v27 = vpop.f32.mrb[77].mxu0 }
 0x61c   :  { %v4480_v60 = vpop.eup %4479  ;;  %v2209_v61 = vadd.f32 1.0, %v4478_v24  ;;  %v2212_v30 = vmul.f32 0.5, %v2208_v17  ;;  %v2234_v31 = vadd.f32 %v2179_v27, %v5330_v28  ;;  %v4282_v32 = vpop.f32.mrb[78].mxu0  ;;  %v5498_v27 = vld [vmem:[%s6007_s5 + $0x10] sm:$0xff]  }
 0x61d   :  { %v2207_v33 = vadd.f32 1.0, %v4480_v60  ;;  %v2210_v34 = vmul.f32 0.5, %v2206_v25  ;;  %v2237_v45 = vadd.f32 %v4282_v32, %v5345_v63  ;;  %v2182_v35 = vpop.f32.mrb[79].mxu0  ;;  %v5505_v60 = vld [vmem:[%s6007_s5 + $0x18] sm:$0xff]   ;;  %v2273_v32 = vld [vmem:[#allocation2 + $0x130] sm:$0xff] }
 0x61e   :  { %v2240_v40 = vmul.f32 %v2236_v26, %v2212_v30  ;;  %v2213_v4 = vmul.f32 0.5, %v2209_v61  ;;  %v2235_v46 = vadd.f32 %v2182_v35, %v5340_v36  ;;  %v5512_v61 = vld [vmem:[%s6007_s5 + $0x20] sm:$0xff]   ;;  %v5519_v30 = vld [vmem:[%s6007_s5 + $0x28] sm:$0xff]  }
 0x61f   :  { %v2238_v7 = vmul.f32 %v2234_v31, %v2210_v34  ;;  %v2211_v21 = vmul.f32 0.5, %v2207_v33  ;;  %v5526_v31 = vld [vmem:[%s6007_s5] sm:$0xff]  }
 0x620   :  { %v2244_v22 = vadd.f32 %v2240_v40, %v2109_v44  ;;  %v2241_v48 = vmul.f32 %v2237_v45, %v2213_v4  ;;  %v2271_v45 = vld [vmem:[#allocation2 + $0x120] sm:$0xff]  ;;  %v2274_v4 = vld [vmem:[#allocation2 + $0x138] sm:$0xff] }
 0x621   :  { %v4482_v39 = vpop.eup %4481  ;;  %v2242_v62 = vadd.f32 %v2238_v7, %v2107_v23  ;;  %v2239_v51 = vmul.f32 %v2235_v46, %v2211_v21  ;;  %v2272_v21 = vld [vmem:[#allocation2 + $0x128] sm:$0xff] }
 0x622   :  { %v4484_v49 = vpop.eup %4483  ;;  %4489 = vtanh.f32 %v2244_v22  ;;  %v2245_v15 = vadd.f32 %v2241_v48, %v2110_v13  ;;  %v2228_v41 = vadd.f32 1.0, %v4482_v39  ;;  %v2277_v13 = vld [vmem:[#allocation2 + $0x150] sm:$0xff] }
 0x623   :  { %v4486_v53 = vpop.eup %4485  ;;  %4491 = vtanh.f32 %v2242_v62  ;;  %v2243_v12 = vadd.f32 %v2239_v51, %v2108_v52  ;;  %v2226_v18 = vadd.f32 1.0, %v4484_v49 }
 0x624   :  { %v4488_v54 = vpop.eup %4487  ;;  %4493 = vtanh.f32 %v2245_v15  ;;  %v2229_v43 = vadd.f32 1.0, %v4486_v53  ;;  %v2232_v1 = vmul.f32 0.5, %v2228_v41  ;;  %v2275_v15 = vld [vmem:[#allocation2 + $0x140] sm:$0xff]  ;;  %v2278_v41 = vld [vmem:[#allocation2 + $0x158] sm:$0xff] }
 0x625   :  { %4495 = vtanh.f32 %v2243_v12  ;;  %v2227_v29 = vadd.f32 1.0, %v4488_v54  ;;  %v2230_v3 = vmul.f32 0.5, %v2226_v18 }
 0x626   :  { %v2233_v55 = vmul.f32 0.5, %v2229_v43  ;;  %v2252_v57 = vsub.f32 1.0, %v2232_v1  ;;  %v2260_v0 = vmul.f32 %v2232_v1, %v5427_v37  ;;  %v2276_v43 = vld [vmem:[#allocation2 + $0x148] sm:$0xff] }
 0x627   :  { %v2231_v56 = vmul.f32 0.5, %v2227_v29  ;;  %v2250_v19 = vsub.f32 1.0, %v2230_v3  ;;  %v2258_v6 = vmul.f32 %v2230_v3, %v5430_v58 }
 0x628   :  { %v2253_v2 = vsub.f32 1.0, %v2233_v55  ;;  %v2261_v11 = vmul.f32 %v2233_v55, %v5432_v38 }
 0x629   :  { %v2251_v8 = vsub.f32 1.0, %v2231_v56  ;;  %v2259_v20 = vmul.f32 %v2231_v56, %v5436_v16  ;;  %v5491_v16 = vld [vmem:[%s6007_s5 + $0x8] sm:$0xff]   ;;  %s4372_s5 = spop %4371 }
 0x62c   :  { %v4490_v59 = vpop.eup %4489 }
 0x62d   :  { %v4492_v47 = vpop.eup %4491  ;;  %v2256_v10 = vmul.f32 %v4490_v59, %v2252_v57 }
 0x62e   :  { %v4494_v5 = vpop.eup %4493  ;;  %v2254_v9 = vmul.f32 %v4492_v47, %v2250_v19 }
 0x62f   :  { %v4496_v50 = vpop.eup %4495  ;;  %v2257_v14 = vmul.f32 %v4494_v5, %v2253_v2  ;;  %v5467_v17 = vadd.f32 %v2260_v0, %v2256_v10 }
 0x630   :  { %v2255_v24 = vmul.f32 %v4496_v50, %v2251_v8  ;;  %v5470_v25 = vadd.f32 %v2258_v6, %v2254_v9 }
 0x631   :  { %v5472_v26 = vadd.f32 %v2261_v11, %v2257_v14  ;;  %2269 = vst.msk [vmem:[#allocation3 + $0x50] sm:$0xff] %vm423_vm2, %v5467_v17 }
 0x632   :  { %v5476_v37 = vadd.f32 %v2259_v20, %v2255_v24  ;;  %2267 = vst.msk [vmem:[#allocation3 + $0x40] sm:$0xff] %vm423_vm2, %v5470_v25 }
 0x633   :  { %2270 = vst.msk [vmem:[#allocation3 + $0x58] sm:$0xff] %vm423_vm2, %v5472_v26  ;;  %v2284_v38 = vpack.c.bf16 %v5472_v26, %v5467_v17 }
 0x634   :  { %2268 = vst.msk [vmem:[#allocation3 + $0x48] sm:$0xff] %vm423_vm2, %v5476_v37  ;;  %v2283_v58 = vpack.c.bf16 %v5476_v37, %v5470_v25 }
 0x636   :  { %4283 = vmatprep.subr.bf16.mxu1 %v2283_v58 }
 0x637   :  { %4284 = vmatpush3.bf16.msra.mxu1 %v2283_v58 }
 0x638   :  { %4285 = vmatprep.subr.bf16.mxu1 %v2284_v38 }
 0x63b   :  { %4286 = vmatpush3.bf16.msra.mxu1 %v2284_v38 }
 0x63e   :  { %4288 = vmatmul.mubr.msk.bf16.vlgmr.msra.gmra.mrb[84].mxu1 %vm323_vm1, %v5491_v16 }
 0x63f   :  { %4291 = vmatprep.mubr.msk.bf16.mxu1 %vm323_vm1, %v5498_v27 }
 0x646   :  { %4292 = vmatmul.mubr.msk.bf16.gmra.mrb[88].mxu1 %vm323_vm1, %v5505_v60 }
 0x647   :  { %4295 = vmatprep.mubr.msk.bf16.mxu1 %vm323_vm1, %v5512_v61 }
 0x64e   :  { %4296 = vmatmul.mubr.msk.bf16.gmra.mrb[92].mxu1 %vm323_vm1, %v5519_v30 }
 0x64f   :  { %4319 = vmatprep.mubr.msk.bf16.mxu1 %vm323_vm1, %v5526_v31 }
 0x711   :  { %v4289_v33 = vpop.f32.mrb[84].mxu1 }
 0x712   :  { %v2368_v34 = vadd.f32 %v4289_v33, %v2273_v32  ;;  %v2319_v35 = vpop.f32.mrb[85].mxu1 }
 0x713   :  { %v2366_v40 = vadd.f32 %v2319_v35, %v2271_v45  ;;  %v4290_v46 = vpop.f32.mrb[86].mxu1 }
 0x714   :  { %v2372_v44 = vmul.f32 0.5, %v2368_v34  ;;  %v2369_v7 = vadd.f32 %v4290_v46, %v2274_v4  ;;  %v2322_v22 = vpop.f32.mrb[87].mxu1  ;;  %v2281_v34 = vld [vmem:[#allocation2 + $0x170] sm:$0xff]  ;;  %v2279_v4 = vld [vmem:[#allocation2 + $0x160] sm:$0xff] }
 0x715   :  { %v2370_v23 = vmul.f32 0.5, %v2366_v40  ;;  %v2367_v48 = vadd.f32 %v2322_v22, %v2272_v21  ;;  %v2282_v21 = vld [vmem:[#allocation2 + $0x178] sm:$0xff] }
 0x716   :  { %4497 = vtanh.f32 %v2372_v44  ;;  %v2373_v39 = vmul.f32 0.5, %v2369_v7 }
 0x717   :  { %4499 = vtanh.f32 %v2370_v23  ;;  %v2371_v62 = vmul.f32 0.5, %v2367_v48 }
 0x718   :  { %4501 = vtanh.f32 %v2373_v39  ;;  %v2280_v39 = vld [vmem:[#allocation2 + $0x168] sm:$0xff] }
 0x719   :  { %4503 = vtanh.f32 %v2371_v62  ;;  %v4293_v51 = vpop.f32.mrb[88].mxu1 }
 0x71a   :  { %v2388_v49 = vadd.f32 %v4293_v51, %v2277_v13  ;;  %v2335_v52 = vpop.f32.mrb[89].mxu1 }
 0x71b   :  { %v2386_v53 = vadd.f32 %v2335_v52, %v2275_v15  ;;  %v4294_v12 = vpop.f32.mrb[90].mxu1 }
 0x71c   :  { %v2392_v54 = vmul.f32 0.5, %v2388_v49  ;;  %v2389_v18 = vadd.f32 %v4294_v12, %v2278_v41  ;;  %v2338_v29 = vpop.f32.mrb[91].mxu1 }
 0x71d   :  { %v2390_v1 = vmul.f32 0.5, %v2386_v53  ;;  %v2387_v3 = vadd.f32 %v2338_v29, %v2276_v43 }
 0x71e   :  { %4505 = vtanh.f32 %v2392_v54  ;;  %v2393_v55 = vmul.f32 0.5, %v2389_v18 }
 0x71f   :  { %4507 = vtanh.f32 %v2390_v1  ;;  %v2391_v56 = vmul.f32 0.5, %v2387_v3 }
 0x720   :  { %v4498_v57 = vpop.eup %4497  ;;  %4509 = vtanh.f32 %v2393_v55 }
 0x721   :  { %v4500_v59 = vpop.eup %4499  ;;  %v2380_v19 = vadd.f32 1.0, %v4498_v57  ;;  %4511 = vtanh.f32 %v2391_v56  ;;  %v4297_v47 = vpop.f32.mrb[92].mxu1 }
 0x722   :  { %v4502_v0 = vpop.eup %4501  ;;  %v2378_v2 = vadd.f32 1.0, %v4500_v59  ;;  %v2408_v10 = vadd.f32 %v4297_v47, %v5342_v42  ;;  %v2351_v5 = vpop.f32.mrb[93].mxu1 }
 0x723   :  { %v4504_v6 = vpop.eup %4503  ;;  %v2381_v8 = vadd.f32 1.0, %v4502_v0  ;;  %v2384_v9 = vmul.f32 0.5, %v2380_v19  ;;  %v2406_v50 = vadd.f32 %v2351_v5, %v5330_v28  ;;  %v4298_v11 = vpop.f32.mrb[94].mxu1 }
 0x724   :  { %v2379_v14 = vadd.f32 1.0, %v4504_v6  ;;  %v2382_v20 = vmul.f32 0.5, %v2378_v2  ;;  %v2409_v24 = vadd.f32 %v4298_v11, %v5345_v63  ;;  %v2354_v58 = vpop.f32.mrb[95].mxu1 }
 0x725   :  { %v2412_v38 = vmul.f32 %v2408_v10, %v2384_v9  ;;  %v2385_v32 = vmul.f32 0.5, %v2381_v8  ;;  %v2407_v33 = vadd.f32 %v2354_v58, %v5340_v36 }
 0x726   :  { %v2410_v45 = vmul.f32 %v2406_v50, %v2382_v20  ;;  %v2383_v35 = vmul.f32 0.5, %v2379_v14 }
 0x727   :  { %v2416_v40 = vadd.f32 %v2412_v38, %v2281_v34  ;;  %v2413_v46 = vmul.f32 %v2409_v24, %v2385_v32  ;;  %v2443_v24 = vld [vmem:[#allocation2 + $0x180] sm:$0xff]  ;;  %v2446_v32 = vld [vmem:[#allocation2 + $0x198] sm:$0xff] }
 0x728   :  { %v4506_v44 = vpop.eup %4505  ;;  %v2414_v7 = vadd.f32 %v2410_v45, %v2279_v4  ;;  %v2411_v22 = vmul.f32 %v2407_v33, %v2383_v35  ;;  %v2444_v35 = vld [vmem:[#allocation2 + $0x188] sm:$0xff] }
 0x729   :  { %v4508_v23 = vpop.eup %4507  ;;  %4513 = vtanh.f32 %v2416_v40  ;;  %v2417_v48 = vadd.f32 %v2413_v46, %v2282_v21  ;;  %v2400_v13 = vadd.f32 1.0, %v4506_v44  ;;  %v2449_v21 = vld [vmem:[#allocation2 + $0x1b0] sm:$0xff] }
 0x72a   :  { %v4510_v62 = vpop.eup %4509  ;;  %4515 = vtanh.f32 %v2414_v7  ;;  %v2415_v51 = vadd.f32 %v2411_v22, %v2280_v39  ;;  %v2398_v15 = vadd.f32 1.0, %v4508_v23 }
 0x72b   :  { %v4512_v49 = vpop.eup %4511  ;;  %4517 = vtanh.f32 %v2417_v48  ;;  %v2401_v52 = vadd.f32 1.0, %v4510_v62  ;;  %v2404_v41 = vmul.f32 0.5, %v2400_v13  ;;  %v2447_v48 = vld [vmem:[#allocation2 + $0x1a0] sm:$0xff]  ;;  %v2450_v13 = vld [vmem:[#allocation2 + $0x1b8] sm:$0xff] }
 0x72c   :  { %4519 = vtanh.f32 %v2415_v51  ;;  %v2399_v53 = vadd.f32 1.0, %v4512_v49  ;;  %v2402_v12 = vmul.f32 0.5, %v2398_v15 }
 0x72d   :  { %v2405_v54 = vmul.f32 0.5, %v2401_v52  ;;  %v2424_v43 = vsub.f32 1.0, %v2404_v41  ;;  %v2432_v55 = vmul.f32 %v2404_v41, %v5467_v17  ;;  %v2448_v52 = vld [vmem:[#allocation2 + $0x1a8] sm:$0xff] }
 0x72e   :  { %v2403_v18 = vmul.f32 0.5, %v2399_v53  ;;  %v2422_v1 = vsub.f32 1.0, %v2402_v12  ;;  %v2430_v19 = vmul.f32 %v2402_v12, %v5470_v25 }
 0x72f   :  { %v2425_v56 = vsub.f32 1.0, %v2405_v54  ;;  %v2433_v10 = vmul.f32 %v2405_v54, %v5472_v26 }
 0x730   :  { %v2423_v47 = vsub.f32 1.0, %v2403_v18  ;;  %v2431_v8 = vmul.f32 %v2403_v18, %v5476_v37  ;;  %v2445_v37 = vld [vmem:[#allocation2 + $0x190] sm:$0xff] }
 0x733   :  { %v4514_v29 = vpop.eup %4513 }
 0x734   :  { %v4516_v3 = vpop.eup %4515  ;;  %v2428_v57 = vmul.f32 %v4514_v29, %v2424_v43 }
 0x735   :  { %v4518_v59 = vpop.eup %4517  ;;  %v2426_v0 = vmul.f32 %v4516_v3, %v2422_v1 }
 0x736   :  { %v4520_v2 = vpop.eup %4519  ;;  %v2429_v5 = vmul.f32 %v4518_v59, %v2425_v56  ;;  %v5537_v6 = vadd.f32 %v2432_v55, %v2428_v57 }
 0x737   :  { %v2427_v9 = vmul.f32 %v4520_v2, %v2423_v47  ;;  %v5540_v50 = vadd.f32 %v2430_v19, %v2426_v0 }
 0x738   :  { %v5542_v11 = vadd.f32 %v2433_v10, %v2429_v5  ;;  %2441 = vst.msk [vmem:[#allocation3 + $0x70] sm:$0xff] %vm423_vm2, %v5537_v6 }
 0x739   :  { %v5546_v17 = vadd.f32 %v2431_v8, %v2427_v9  ;;  %2439 = vst.msk [vmem:[#allocation3 + $0x60] sm:$0xff] %vm423_vm2, %v5540_v50 }
 0x73a   :  { %2442 = vst.msk [vmem:[#allocation3 + $0x78] sm:$0xff] %vm423_vm2, %v5542_v11  ;;  %v2456_v26 = vpack.c.bf16 %v5542_v11, %v5537_v6 }
 0x73b   :  { %2440 = vst.msk [vmem:[#allocation3 + $0x68] sm:$0xff] %vm423_vm2, %v5546_v17  ;;  %v2455_v25 = vpack.c.bf16 %v5546_v17, %v5540_v50 }
 0x73d   :  { %4299 = vmatprep.subr.bf16.mxu0 %v2455_v25 }
 0x73e   :  { %4300 = vmatpush3.bf16.msra.mxu0 %v2455_v25 }
 0x73f   :  { %4301 = vmatprep.subr.bf16.mxu0 %v2456_v26 }
 0x742   :  { %4302 = vmatpush3.bf16.msra.mxu0 %v2456_v26 }
 0x745   :  { %4304 = vmatmul.mubr.msk.bf16.vlgmr.msra.gmra.mrb[80].mxu0 %vm323_vm1, %v5491_v16 }
 0x746   :  { %4307 = vmatprep.mubr.msk.bf16.mxu0 %vm323_vm1, %v5498_v27 }
 0x74d   :  { %4308 = vmatmul.mubr.msk.bf16.gmra.mrb[84].mxu0 %vm323_vm1, %v5505_v60 }
 0x74e   :  { %4311 = vmatprep.mubr.msk.bf16.mxu0 %vm323_vm1, %v5512_v61 }
 0x755   :  { %4312 = vmatmul.mubr.msk.bf16.gmra.mrb[88].mxu0 %vm323_vm1, %v5519_v30 }
 0x756   :  { %4335 = vmatprep.mubr.msk.bf16.mxu0 %vm323_vm1, %v5526_v31 }
 0x818   :  { %v4305_v14 = vpop.f32.mrb[80].mxu0 }
 0x819   :  { %v2540_v20 = vadd.f32 %v4305_v14, %v2445_v37  ;;  %v2491_v58 = vpop.f32.mrb[81].mxu0 }
 0x81a   :  { %v2538_v38 = vadd.f32 %v2491_v58, %v2443_v24  ;;  %v4306_v33 = vpop.f32.mrb[82].mxu0 }
 0x81b   :  { %v2544_v34 = vmul.f32 0.5, %v2540_v20  ;;  %v2541_v45 = vadd.f32 %v4306_v33, %v2446_v32  ;;  %v2494_v40 = vpop.f32.mrb[83].mxu0  ;;  %v2453_v20 = vld [vmem:[#allocation2 + $0x1d0] sm:$0xff]  ;;  %v2451_v32 = vld [vmem:[#allocation2 + $0x1c0] sm:$0xff] }
 0x81c   :  { %v2542_v4 = vmul.f32 0.5, %v2538_v38  ;;  %v2539_v46 = vadd.f32 %v2494_v40, %v2444_v35  ;;  %v2454_v35 = vld [vmem:[#allocation2 + $0x1d8] sm:$0xff] }
 0x81d   :  { %4521 = vtanh.f32 %v2544_v34  ;;  %v2545_v44 = vmul.f32 0.5, %v2541_v45 }
 0x81e   :  { %4523 = vtanh.f32 %v2542_v4  ;;  %v2543_v7 = vmul.f32 0.5, %v2539_v46 }
 0x81f   :  { %4525 = vtanh.f32 %v2545_v44  ;;  %v2452_v44 = vld [vmem:[#allocation2 + $0x1c8] sm:$0xff] }
 0x820   :  { %4527 = vtanh.f32 %v2543_v7  ;;  %v4309_v22 = vpop.f32.mrb[84].mxu0 }
 0x821   :  { %v2560_v23 = vadd.f32 %v4309_v22, %v2449_v21  ;;  %v2507_v39 = vpop.f32.mrb[85].mxu0 }
 0x822   :  { %v2558_v62 = vadd.f32 %v2507_v39, %v2447_v48  ;;  %v4310_v51 = vpop.f32.mrb[86].mxu0 }
 0x823   :  { %v2564_v49 = vmul.f32 0.5, %v2560_v23  ;;  %v2561_v15 = vadd.f32 %v4310_v51, %v2450_v13  ;;  %v2510_v53 = vpop.f32.mrb[87].mxu0 }
 0x824   :  { %v2562_v41 = vmul.f32 0.5, %v2558_v62  ;;  %v2559_v12 = vadd.f32 %v2510_v53, %v2448_v52 }
 0x825   :  { %4529 = vtanh.f32 %v2564_v49  ;;  %v2565_v54 = vmul.f32 0.5, %v2561_v15 }
 0x826   :  { %4531 = vtanh.f32 %v2562_v41  ;;  %v2563_v18 = vmul.f32 0.5, %v2559_v12 }
 0x827   :  { %v4522_v43 = vpop.eup %4521  ;;  %4533 = vtanh.f32 %v2565_v54 }
 0x828   :  { %v4524_v29 = vpop.eup %4523  ;;  %v2552_v1 = vadd.f32 1.0, %v4522_v43  ;;  %4535 = vtanh.f32 %v2563_v18  ;;  %v4313_v3 = vpop.f32.mrb[88].mxu0 }
 0x829   :  { %v4526_v55 = vpop.eup %4525  ;;  %v2550_v56 = vadd.f32 1.0, %v4524_v29  ;;  %v2580_v57 = vadd.f32 %v4313_v3, %v5342_v42  ;;  %v2523_v59 = vpop.f32.mrb[89].mxu0 }
 0x82a   :  { %v4528_v19 = vpop.eup %4527  ;;  %v2553_v47 = vadd.f32 1.0, %v4526_v55  ;;  %v2556_v0 = vmul.f32 0.5, %v2552_v1  ;;  %v2578_v2 = vadd.f32 %v2523_v59, %v5330_v28  ;;  %v4314_v10 = vpop.f32.mrb[90].mxu0 }
 0x82b   :  { %v2551_v5 = vadd.f32 1.0, %v4528_v19  ;;  %v2554_v8 = vmul.f32 0.5, %v2550_v56  ;;  %v2581_v9 = vadd.f32 %v4314_v10, %v5345_v63  ;;  %v2526_v25 = vpop.f32.mrb[91].mxu0 }
 0x82c   :  { %v2584_v26 = vmul.f32 %v2580_v57, %v2556_v0  ;;  %v2557_v37 = vmul.f32 0.5, %v2553_v47  ;;  %v2579_v14 = vadd.f32 %v2526_v25, %v5340_v36 }
 0x82d   :  { %v2582_v24 = vmul.f32 %v2578_v2, %v2554_v8  ;;  %v2555_v58 = vmul.f32 0.5, %v2551_v5 }
 0x82e   :  { %v2588_v38 = vadd.f32 %v2584_v26, %v2453_v20  ;;  %v2585_v33 = vmul.f32 %v2581_v9, %v2557_v37  ;;  %v2615_v9 = vld [vmem:[#allocation2 + $0x1e0] sm:$0xff]  ;;  %v2618_v37 = vld [vmem:[#allocation2 + $0x1f8] sm:$0xff] }
 0x82f   :  { %v4530_v34 = vpop.eup %4529  ;;  %v2586_v45 = vadd.f32 %v2582_v24, %v2451_v32  ;;  %v2583_v40 = vmul.f32 %v2579_v14, %v2555_v58  ;;  %v2616_v58 = vld [vmem:[#allocation2 + $0x1e8] sm:$0xff] }
 0x830   :  { %v4532_v4 = vpop.eup %4531  ;;  %4537 = vtanh.f32 %v2588_v38  ;;  %v2589_v46 = vadd.f32 %v2585_v33, %v2454_v35  ;;  %v2572_v21 = vadd.f32 1.0, %v4530_v34 }
 0x831   :  { %v4534_v7 = vpop.eup %4533  ;;  %4539 = vtanh.f32 %v2586_v45  ;;  %v2587_v22 = vadd.f32 %v2583_v40, %v2452_v44  ;;  %v2570_v48 = vadd.f32 1.0, %v4532_v4  ;;  %v2619_v4 = vld [vmem:[#allocation2 + $0x200] sm:$0xff] }
 0x832   :  { %v4536_v23 = vpop.eup %4535  ;;  %4541 = vtanh.f32 %v2589_v46  ;;  %v2573_v39 = vadd.f32 1.0, %v4534_v7  ;;  %v2576_v13 = vmul.f32 0.5, %v2572_v21  ;;  %v2622_v7 = vld [vmem:[#allocation2 + $0x218] sm:$0xff] }
 0x833   :  { %4543 = vtanh.f32 %v2587_v22  ;;  %v2571_v62 = vadd.f32 1.0, %v4536_v23  ;;  %v2574_v51 = vmul.f32 0.5, %v2570_v48  ;;  %v2620_v48 = vld [vmem:[#allocation2 + $0x208] sm:$0xff] }
 0x834   :  { %v2577_v49 = vmul.f32 0.5, %v2573_v39  ;;  %v2596_v52 = vsub.f32 1.0, %v2576_v13  ;;  %v2604_v54 = vmul.f32 %v2576_v13, %v5537_v6 }
 0x835   :  { %v2575_v15 = vmul.f32 0.5, %v2571_v62  ;;  %v2594_v41 = vsub.f32 1.0, %v2574_v51  ;;  %v2602_v1 = vmul.f32 %v2574_v51, %v5540_v50 }
 0x836   :  { %v2597_v18 = vsub.f32 1.0, %v2577_v49  ;;  %v2605_v57 = vmul.f32 %v2577_v49, %v5542_v11 }
 0x837   :  { %v2595_v3 = vsub.f32 1.0, %v2575_v15  ;;  %v2603_v47 = vmul.f32 %v2575_v15, %v5546_v17  ;;  %v2617_v17 = vld [vmem:[#allocation2 + $0x1f0] sm:$0xff] }
 0x83a   :  { %v4538_v53 = vpop.eup %4537 }
 0x83b   :  { %v4540_v12 = vpop.eup %4539  ;;  %v2600_v43 = vmul.f32 %v4538_v53, %v2596_v52 }
 0x83c   :  { %v4542_v29 = vpop.eup %4541  ;;  %v2598_v55 = vmul.f32 %v4540_v12, %v2594_v41 }
 0x83d   :  { %v4544_v56 = vpop.eup %4543  ;;  %v2601_v59 = vmul.f32 %v4542_v29, %v2597_v18  ;;  %v5577_v19 = vadd.f32 %v2604_v54, %v2600_v43 }
 0x83e   :  { %v2599_v0 = vmul.f32 %v4544_v56, %v2595_v3  ;;  %v5580_v2 = vadd.f32 %v2602_v1, %v2598_v55 }
 0x83f   :  { %v5582_v10 = vadd.f32 %v2605_v57, %v2601_v59  ;;  %2613 = vst.msk [vmem:[#allocation3 + $0x90] sm:$0xff] %vm423_vm2, %v5577_v19 }
 0x840   :  { %v5586_v6 = vadd.f32 %v2603_v47, %v2599_v0  ;;  %2611 = vst.msk [vmem:[#allocation3 + $0x80] sm:$0xff] %vm423_vm2, %v5580_v2 }
 0x841   :  { %2614 = vst.msk [vmem:[#allocation3 + $0x98] sm:$0xff] %vm423_vm2, %v5582_v10  ;;  %v2628_v11 = vpack.c.bf16 %v5582_v10, %v5577_v19 }
 0x842   :  { %2612 = vst.msk [vmem:[#allocation3 + $0x88] sm:$0xff] %vm423_vm2, %v5586_v6  ;;  %v2627_v50 = vpack.c.bf16 %v5586_v6, %v5580_v2 }
 0x844   :  { %4315 = vmatprep.subr.bf16.mxu1 %v2627_v50 }
 0x845   :  { %4316 = vmatpush3.bf16.msra.mxu1 %v2627_v50 }
 0x846   :  { %4317 = vmatprep.subr.bf16.mxu1 %v2628_v11 }
 0x849   :  { %4318 = vmatpush3.bf16.msra.mxu1 %v2628_v11 }
 0x84c   :  { %4320 = vmatmul.mubr.msk.bf16.vlgmr.msra.gmra.mrb[96].mxu1 %vm323_vm1, %v5491_v16 }
 0x84d   :  { %4323 = vmatprep.mubr.msk.bf16.mxu1 %vm323_vm1, %v5498_v27 }
 0x854   :  { %4324 = vmatmul.mubr.msk.bf16.gmra.mrb[100].mxu1 %vm323_vm1, %v5505_v60 }
 0x855   :  { %4327 = vmatprep.mubr.msk.bf16.mxu1 %vm323_vm1, %v5512_v61 }
 0x85c   :  { %4328 = vmatmul.mubr.msk.bf16.gmra.mrb[104].mxu1 %vm323_vm1, %v5519_v30 }
 0x85d   :  { %4351 = vmatprep.mubr.msk.bf16.mxu1 %vm323_vm1, %v5526_v31  ;;  %v2621_v31 = vld [vmem:[#allocation2 + $0x210] sm:$0xff] }
 0x91f   :  { %v4321_v5 = vpop.f32.mrb[96].mxu1 }
 0x920   :  { %v2712_v8 = vadd.f32 %v4321_v5, %v2617_v17  ;;  %v2663_v25 = vpop.f32.mrb[97].mxu1  ;;  %v2625_v5 = vld [vmem:[#allocation2 + $0x230] sm:$0xff] }
 0x921   :  { %v2710_v26 = vadd.f32 %v2663_v25, %v2615_v9  ;;  %v4322_v14 = vpop.f32.mrb[98].mxu1 }
 0x922   :  { %v2716_v20 = vmul.f32 0.5, %v2712_v8  ;;  %v2713_v24 = vadd.f32 %v4322_v14, %v2618_v37  ;;  %v2666_v38 = vpop.f32.mrb[99].mxu1 }
 0x923   :  { %v2714_v32 = vmul.f32 0.5, %v2710_v26  ;;  %v2711_v33 = vadd.f32 %v2666_v38, %v2616_v58  ;;  %v2623_v26 = vld [vmem:[#allocation2 + $0x220] sm:$0xff] }
 0x924   :  { %4545 = vtanh.f32 %v2716_v20  ;;  %v2717_v34 = vmul.f32 0.5, %v2713_v24  ;;  %v2626_v24 = vld [vmem:[#allocation2 + $0x238] sm:$0xff] }
 0x925   :  { %4547 = vtanh.f32 %v2714_v32  ;;  %v2715_v45 = vmul.f32 0.5, %v2711_v33  ;;  %v2624_v33 = vld [vmem:[#allocation2 + $0x228] sm:$0xff] }
 0x926   :  { %4549 = vtanh.f32 %v2717_v34 }
 0x927   :  { %4551 = vtanh.f32 %v2715_v45  ;;  %v4325_v35 = vpop.f32.mrb[100].mxu1 }
 0x928   :  { %v2732_v40 = vadd.f32 %v4325_v35, %v2621_v31  ;;  %v2679_v46 = vpop.f32.mrb[101].mxu1 }
 0x929   :  { %v2730_v44 = vadd.f32 %v2679_v46, %v2619_v4  ;;  %v4326_v21 = vpop.f32.mrb[102].mxu1 }
 0x92a   :  { %v2736_v22 = vmul.f32 0.5, %v2732_v40  ;;  %v2733_v23 = vadd.f32 %v4326_v21, %v2622_v7  ;;  %v2682_v39 = vpop.f32.mrb[103].mxu1 }
 0x92b   :  { %v2734_v62 = vmul.f32 0.5, %v2730_v44  ;;  %v2731_v13 = vadd.f32 %v2682_v39, %v2620_v48 }
 0x92c   :  { %4553 = vtanh.f32 %v2736_v22  ;;  %v2737_v51 = vmul.f32 0.5, %v2733_v23 }
 0x92d   :  { %4555 = vtanh.f32 %v2734_v62  ;;  %v2735_v49 = vmul.f32 0.5, %v2731_v13 }
 0x92e   :  { %v4546_v15 = vpop.eup %4545  ;;  %4557 = vtanh.f32 %v2737_v51 }
 0x92f   :  { %v4548_v52 = vpop.eup %4547  ;;  %v2724_v53 = vadd.f32 1.0, %v4546_v15  ;;  %4559 = vtanh.f32 %v2735_v49  ;;  %v4329_v41 = vpop.f32.mrb[104].mxu1 }
 0x930   :  { %v4550_v12 = vpop.eup %4549  ;;  %v2722_v54 = vadd.f32 1.0, %v4548_v52  ;;  %v2752_v18 = vadd.f32 %v4329_v41, %v5342_v42  ;;  %v2695_v43 = vpop.f32.mrb[105].mxu1 }
 0x931   :  { %v4552_v29 = vpop.eup %4551  ;;  %v2725_v1 = vadd.f32 1.0, %v4550_v12  ;;  %v2728_v3 = vmul.f32 0.5, %v2724_v53  ;;  %v2750_v55 = vadd.f32 %v2695_v43, %v5330_v28  ;;  %v4330_v56 = vpop.f32.mrb[106].mxu1 }
 0x932   :  { %v2723_v57 = vadd.f32 1.0, %v4552_v29  ;;  %v2726_v59 = vmul.f32 0.5, %v2722_v54  ;;  %v2753_v47 = vadd.f32 %v4330_v56, %v5345_v63  ;;  %v2698_v0 = vpop.f32.mrb[107].mxu1 }
 0x933   :  { %v2756_v50 = vmul.f32 %v2752_v18, %v2728_v3  ;;  %v2729_v11 = vmul.f32 0.5, %v2725_v1  ;;  %v2751_v17 = vadd.f32 %v2698_v0, %v5340_v36 }
 0x934   :  { %v2754_v8 = vmul.f32 %v2750_v55, %v2726_v59  ;;  %v2727_v9 = vmul.f32 0.5, %v2723_v57  ;;  %v2787_v59 = vld [vmem:[#allocation2 + $0x240] sm:$0xff] }
 0x935   :  { %v2760_v25 = vadd.f32 %v2756_v50, %v2625_v5  ;;  %v2757_v37 = vmul.f32 %v2753_v47, %v2729_v11  ;;  %v2790_v50 = vld [vmem:[#allocation2 + $0x258] sm:$0xff] }
 0x936   :  { %v4554_v14 = vpop.eup %4553  ;;  %v2758_v20 = vadd.f32 %v2754_v8, %v2623_v26  ;;  %v2755_v58 = vmul.f32 %v2751_v17, %v2727_v9  ;;  %v2788_v8 = vld [vmem:[#allocation2 + $0x248] sm:$0xff] }
 0x937   :  { %v4556_v38 = vpop.eup %4555  ;;  %4561 = vtanh.f32 %v2760_v25  ;;  %v2761_v32 = vadd.f32 %v2757_v37, %v2626_v24  ;;  %v2744_v45 = vadd.f32 1.0, %v4554_v14 }
 0x938   :  { %v4558_v34 = vpop.eup %4557  ;;  %4563 = vtanh.f32 %v2758_v20  ;;  %v2759_v31 = vadd.f32 %v2755_v58, %v2624_v33  ;;  %v2742_v40 = vadd.f32 1.0, %v4556_v38  ;;  %v2793_v20 = vld [vmem:[#allocation2 + $0x270] sm:$0xff]  ;;  %v2791_v38 = vld [vmem:[#allocation2 + $0x260] sm:$0xff] }
 0x939   :  { %v4560_v35 = vpop.eup %4559  ;;  %4565 = vtanh.f32 %v2761_v32  ;;  %v2745_v4 = vadd.f32 1.0, %v4558_v34  ;;  %v2748_v44 = vmul.f32 0.5, %v2744_v45  ;;  %v2794_v34 = vld [vmem:[#allocation2 + $0x278] sm:$0xff] }
 0x93a   :  { %4567 = vtanh.f32 %v2759_v31  ;;  %v2743_v46 = vadd.f32 1.0, %v4560_v35  ;;  %v2746_v7 = vmul.f32 0.5, %v2742_v40  ;;  %v2792_v40 = vld [vmem:[#allocation2 + $0x268] sm:$0xff] }
 0x93b   :  { %v2749_v21 = vmul.f32 0.5, %v2745_v4  ;;  %v2768_v23 = vsub.f32 1.0, %v2748_v44  ;;  %v2776_v13 = vmul.f32 %v2748_v44, %v5577_v19 }
 0x93c   :  { %v2747_v22 = vmul.f32 0.5, %v2743_v46  ;;  %v2766_v39 = vsub.f32 1.0, %v2746_v7  ;;  %v2774_v52 = vmul.f32 %v2746_v7, %v5580_v2 }
 0x93d   :  { %v2769_v51 = vsub.f32 1.0, %v2749_v21  ;;  %v2777_v54 = vmul.f32 %v2749_v21, %v5582_v10 }
 0x93e   :  { %v2767_v53 = vsub.f32 1.0, %v2747_v22  ;;  %v2775_v29 = vmul.f32 %v2747_v22, %v5586_v6  ;;  %v2789_v6 = vld [vmem:[#allocation2 + $0x250] sm:$0xff] }
 0x941   :  { %v4562_v48 = vpop.eup %4561 }
 0x942   :  { %v4564_v62 = vpop.eup %4563  ;;  %v2772_v49 = vmul.f32 %v4562_v48, %v2768_v23 }
 0x943   :  { %v4566_v15 = vpop.eup %4565  ;;  %v2770_v41 = vmul.f32 %v4564_v62, %v2766_v39 }
 0x944   :  { %v4568_v12 = vpop.eup %4567  ;;  %v2773_v18 = vmul.f32 %v4566_v15, %v2769_v51  ;;  %v5617_v43 = vadd.f32 %v2776_v13, %v2772_v49 }
 0x945   :  { %v2771_v1 = vmul.f32 %v4568_v12, %v2767_v53  ;;  %v5620_v3 = vadd.f32 %v2774_v52, %v2770_v41 }
 0x946   :  { %v5622_v55 = vadd.f32 %v2777_v54, %v2773_v18  ;;  %2785 = vst.msk [vmem:[#allocation3 + $0xb0] sm:$0xff] %vm423_vm2, %v5617_v43 }
 0x947   :  { %v5626_v19 = vadd.f32 %v2775_v29, %v2771_v1  ;;  %2783 = vst.msk [vmem:[#allocation3 + $0xa0] sm:$0xff] %vm423_vm2, %v5620_v3 }
 0x948   :  { %2786 = vst.msk [vmem:[#allocation3 + $0xb8] sm:$0xff] %vm423_vm2, %v5622_v55  ;;  %v2800_v10 = vpack.c.bf16 %v5622_v55, %v5617_v43 }
 0x949   :  { %2784 = vst.msk [vmem:[#allocation3 + $0xa8] sm:$0xff] %vm423_vm2, %v5626_v19  ;;  %v2799_v2 = vpack.c.bf16 %v5626_v19, %v5620_v3 }
 0x94b   :  { %4331 = vmatprep.subr.bf16.mxu0 %v2799_v2 }
 0x94c   :  { %4332 = vmatpush3.bf16.msra.mxu0 %v2799_v2 }
 0x94d   :  { %4333 = vmatprep.subr.bf16.mxu0 %v2800_v10 }
 0x950   :  { %4334 = vmatpush3.bf16.msra.mxu0 %v2800_v10 }
 0x953   :  { %4336 = vmatmul.mubr.msk.bf16.vlgmr.msra.gmra.mrb[92].mxu0 %vm323_vm1, %v5491_v16 }
 0x954   :  { %4339 = vmatprep.mubr.msk.bf16.mxu0 %vm323_vm1, %v5498_v27 }
 0x95b   :  { %4340 = vmatmul.mubr.msk.bf16.gmra.mrb[96].mxu0 %vm323_vm1, %v5505_v60 }
 0x95c   :  { %4343 = vmatprep.mubr.msk.bf16.mxu0 %vm323_vm1, %v5512_v61 }
 0x963   :  { %4344 = vmatmul.mubr.msk.bf16.gmra.mrb[100].mxu0 %vm323_vm1, %v5519_v30 }
 0xa26   :  { %v4337_v56 = vpop.f32.mrb[92].mxu0 }
 0xa27   :  { %v2884_v57 = vadd.f32 %v4337_v56, %v2789_v6  ;;  %v2835_v47 = vpop.f32.mrb[93].mxu0  ;;  %v2797_v56 = vld [vmem:[#allocation2 + $0x290] sm:$0xff] }
 0xa28   :  { %v2882_v0 = vadd.f32 %v2835_v47, %v2787_v59  ;;  %v4338_v11 = vpop.f32.mrb[94].mxu0 }
 0xa29   :  { %v2888_v17 = vmul.f32 0.5, %v2884_v57  ;;  %v2885_v5 = vadd.f32 %v4338_v11, %v2790_v50  ;;  %v2838_v9 = vpop.f32.mrb[95].mxu0 }
 0xa2a   :  { %v2886_v25 = vmul.f32 0.5, %v2882_v0  ;;  %v2883_v26 = vadd.f32 %v2838_v9, %v2788_v8  ;;  %v2795_v0 = vld [vmem:[#allocation2 + $0x280] sm:$0xff] }
 0xa2b   :  { %4569 = vtanh.f32 %v2888_v17  ;;  %v2889_v37 = vmul.f32 0.5, %v2885_v5  ;;  %v2798_v5 = vld [vmem:[#allocation2 + $0x298] sm:$0xff] }
 0xa2c   :  { %4571 = vtanh.f32 %v2886_v25  ;;  %v2887_v14 = vmul.f32 0.5, %v2883_v26  ;;  %v2796_v26 = vld [vmem:[#allocation2 + $0x288] sm:$0xff] }
 0xa2d   :  { %4573 = vtanh.f32 %v2889_v37 }
 0xa2e   :  { %4575 = vtanh.f32 %v2887_v14  ;;  %v4341_v24 = vpop.f32.mrb[96].mxu0 }
 0xa2f   :  { %v2904_v58 = vadd.f32 %v4341_v24, %v2793_v20  ;;  %v2851_v32 = vpop.f32.mrb[97].mxu0 }
 0xa30   :  { %v2902_v33 = vadd.f32 %v2851_v32, %v2791_v38  ;;  %v4342_v45 = vpop.f32.mrb[98].mxu0 }
 0xa31   :  { %v2908_v31 = vmul.f32 0.5, %v2904_v58  ;;  %v2905_v35 = vadd.f32 %v4342_v45, %v2794_v34  ;;  %v2854_v4 = vpop.f32.mrb[99].mxu0 }
 0xa32   :  { %v2906_v46 = vmul.f32 0.5, %v2902_v33  ;;  %v2903_v44 = vadd.f32 %v2854_v4, %v2792_v40 }
 0xa33   :  { %4577 = vtanh.f32 %v2908_v31  ;;  %v2909_v7 = vmul.f32 0.5, %v2905_v35 }
 0xa34   :  { %4579 = vtanh.f32 %v2906_v46  ;;  %v2907_v21 = vmul.f32 0.5, %v2903_v44 }
 0xa35   :  { %v4570_v22 = vpop.eup %4569  ;;  %4581 = vtanh.f32 %v2909_v7 }
 0xa36   :  { %v4572_v23 = vpop.eup %4571  ;;  %v2896_v48 = vadd.f32 1.0, %v4570_v22  ;;  %4583 = vtanh.f32 %v2907_v21  ;;  %v4345_v39 = vpop.f32.mrb[100].mxu0 }
 0xa37   :  { %v4574_v62 = vpop.eup %4573  ;;  %v2894_v13 = vadd.f32 1.0, %v4572_v23  ;;  %v2924_v51 = vadd.f32 %v4345_v39, %v5342_v42  ;;  %v2867_v49 = vpop.f32.mrb[101].mxu0 }
 0xa38   :  { %v4576_v15 = vpop.eup %4575  ;;  %v2897_v52 = vadd.f32 1.0, %v4574_v62  ;;  %v2900_v53 = vmul.f32 0.5, %v2896_v48  ;;  %v2922_v41 = vadd.f32 %v2867_v49, %v5330_v28  ;;  %v4346_v12 = vpop.f32.mrb[102].mxu0 }
 0xa39   :  { %v2895_v54 = vadd.f32 1.0, %v4576_v15  ;;  %v2898_v18 = vmul.f32 0.5, %v2894_v13  ;;  %v2925_v29 = vadd.f32 %v4346_v12, %v5345_v63  ;;  %v2870_v1 = vpop.f32.mrb[103].mxu0  ;;  %v5687_v12 = vld [vmem:[#allocation3 + $0x28] sm:$0xff] }
 0xa3a   :  { %v2928_v2 = vmul.f32 %v2924_v51, %v2900_v53  ;;  %v2901_v10 = vmul.f32 0.5, %v2897_v52  ;;  %v2923_v6 = vadd.f32 %v2870_v1, %v5340_v36 }
 0xa3b   :  { %v2926_v57 = vmul.f32 %v2922_v41, %v2898_v18  ;;  %v2899_v59 = vmul.f32 0.5, %v2895_v54  ;;  %v5689_v54 = vpop.permute.xlu0 %3169  ;;  %v5693_v18 = vld [vmem:[#allocation3 + $0x20] sm:$0xff] }
 0xa3c   :  { %v2932_v47 = vadd.f32 %v2928_v2, %v2797_v56  ;;  %v2929_v50 = vmul.f32 %v2925_v29, %v2901_v10  ;;  %v5699_v10 = vld [vmem:[#allocation3] sm:$0xff]  ;;  %v2962_v56 = vld [vmem:[#allocation2 + $0x2b8] sm:$0xff] }
 0xa3d   :  { %v4578_v11 = vpop.eup %4577  ;;  %v2930_v17 = vadd.f32 %v2926_v57, %v2795_v0  ;;  %v2927_v8 = vmul.f32 %v2923_v6, %v2899_v59  ;;  %v3191_v59 = vmul.f32 %v5689_v54, %v5693_v18 }
 0xa3e   :  { %v4580_v9 = vpop.eup %4579  ;;  %4585 = vtanh.f32 %v2932_v47  ;;  %v2933_v25 = vadd.f32 %v2929_v50, %v2798_v5  ;;  %v2916_v14 = vadd.f32 1.0, %v4578_v11  ;;  %v2960_v50 = vld [vmem:[#allocation2 + $0x2a8] sm:$0xff] }
 0xa3f   :  { %v4582_v37 = vpop.eup %4581  ;;  %4587 = vtanh.f32 %v2930_v17  ;;  %v2931_v20 = vadd.f32 %v2927_v8, %v2796_v26  ;;  %v2914_v58 = vadd.f32 1.0, %v4580_v9  ;;  %v5703_v17 = vld [vmem:[#allocation3 + $0x30] sm:$0xff]  ;;  %v5708_v26 = vpop.permute.xlu0 %3179 }
 0xa40   :  { %v4584_v24 = vpop.eup %4583  ;;  %4589 = vtanh.f32 %v2933_v25  ;;  %v2917_v38 = vadd.f32 1.0, %v4582_v37  ;;  %v2920_v33 = vmul.f32 0.5, %v2916_v14  ;;  %v3187_v37 = vmul.f32 %v5689_v54, %v5699_v10 }
 0xa41   :  { %4591 = vtanh.f32 %v2931_v20  ;;  %v2915_v32 = vadd.f32 1.0, %v4584_v24  ;;  %v2918_v34 = vmul.f32 0.5, %v2914_v58  ;;  %v5712_v20 = vld [vmem:[#allocation3 + $0x10] sm:$0xff]  ;;  %v3193_v58 = vmul.f32 %v5708_v26, %v5703_v17 }
 0xa42   :  { %v2921_v45 = vmul.f32 0.5, %v2917_v38  ;;  %v2940_v35 = vsub.f32 1.0, %v2920_v33  ;;  %v2948_v44 = vmul.f32 %v2920_v33, %v5617_v43  ;;  %v3232_v38 = vsel %vm423_vm2, %v3191_v59, 0.0  ;;  %v5719_v33 = vld [vmem:[#allocation3 + $0x48] sm:$0xff] }
 0xa43   :  { %v2919_v31 = vmul.f32 0.5, %v2915_v32  ;;  %v2938_v4 = vsub.f32 1.0, %v2918_v34  ;;  %v2946_v23 = vmul.f32 %v2918_v34, %v5620_v3  ;;  %v5717_v32 = vld [vmem:[#allocation3 + $0x38] sm:$0xff] }
 0xa44   :  { %v2941_v7 = vsub.f32 1.0, %v2921_v45  ;;  %v2949_v13 = vmul.f32 %v2921_v45, %v5622_v55  ;;  %6023 = vst [vmem:[#allocation5_spill] sm:$0xff] %v5717_v32 }
 0xa45   :  { %v2939_v48 = vsub.f32 1.0, %v2919_v31  ;;  %v2947_v15 = vmul.f32 %v2919_v31, %v5626_v19  ;;  %v6011_v19 = vmov 0.0   ;;  %v2965_v31 = vld [vmem:[#allocation2 + $0x2d0] sm:$0xff] }
 0xa46   :  { %4363 = vmatprep.subr.bf16.mxu0 %v6011_v19 }
 0xa48   :  { %v4586_v40 = vpop.eup %4585 }
 0xa49   :  { %v4588_v46 = vpop.eup %4587  ;;  %v2944_v21 = vmul.f32 %v4586_v40, %v2940_v35 }
 0xa4a   :  { %v4590_v22 = vpop.eup %4589  ;;  %v2942_v39 = vmul.f32 %v4588_v46, %v2938_v4  ;;  %v3189_v4 = vmul.f32 %v5708_v26, %v5712_v20  ;;  %v3219_v46 = vsel %vm423_vm2, %v3187_v37, 0.0 }
 0xa4b   :  { %v4592_v62 = vpop.eup %4591  ;;  %v2945_v51 = vmul.f32 %v4590_v22, %v2941_v7  ;;  %v5655_v49 = vadd.f32 %v2948_v44, %v2944_v21  ;;  %v2963_v7 = vld [vmem:[#allocation2 + $0x2c0] sm:$0xff] }
 0xa4c   :  { %v2943_v52 = vmul.f32 %v4592_v62, %v2939_v48  ;;  %v5658_v53 = vadd.f32 %v2946_v23, %v2942_v39  ;;  %v5727_v22 = vld [vmem:[#allocation3 + $0x40] sm:$0xff]  ;;  %v5729_v23 = vld [vmem:[#allocation3 + $0x18] sm:$0xff] }
 0xa4d   :  { %v5660_v41 = vadd.f32 %v2949_v13, %v2945_v51  ;;  %2957 = vst.msk [vmem:[#allocation3 + $0xd0] sm:$0xff] %vm423_vm2, %v5655_v49  ;;  %v2966_v39 = vld [vmem:[#allocation2 + $0x2d8] sm:$0xff] }
 0xa4e   :  { %v5664_v43 = vadd.f32 %v2947_v15, %v2943_v52  ;;  %2955 = vst.msk [vmem:[#allocation3 + $0xc0] sm:$0xff] %vm423_vm2, %v5658_v53  ;;  %v3235_v15 = vsel %vm423_vm2, %v3193_v58, 0.0 }
 0xa4f   :  { %2958 = vst.msk [vmem:[#allocation3 + $0xd8] sm:$0xff] %vm423_vm2, %v5660_v41  ;;  %v2972_v55 = vpack.c.bf16 %v5660_v41, %v5655_v49 }
 0xa50   :  { %2956 = vst.msk [vmem:[#allocation3 + $0xc8] sm:$0xff] %vm423_vm2, %v5664_v43  ;;  %v2971_v3 = vpack.c.bf16 %v5664_v43, %v5658_v53 }
 0xa52   :  { %4347 = vmatprep.subr.bf16.mxu1 %v2971_v3 }
 0xa53   :  { %4348 = vmatpush3.bf16.msra.mxu1 %v2971_v3 }
 0xa54   :  { %4349 = vmatprep.subr.bf16.mxu1 %v2972_v55 }
 0xa57   :  { %4350 = vmatpush3.bf16.msra.mxu1 %v2972_v55 }
 0xa5a   :  { %4352 = vmatmul.mubr.msk.bf16.vlgmr.msra.gmra.mrb[108].mxu1 %vm323_vm1, %v5491_v16  ;;  %v5691_v16 = vpop.permute.xlu1 %3174 }
 0xa5b   :  { %4355 = vmatprep.mubr.msk.bf16.mxu1 %vm323_vm1, %v5498_v27  ;;  %v2961_v27 = vld [vmem:[#allocation2 + $0x2b0] sm:$0xff]  ;;  %v3196_v51 = vmul.f32 %v5691_v16, %v5719_v33 }
 0xa5e   :  { %v5722_v40 = vpop.permute.xlu1 %3184 }
 0xa5f   :  { %v3194_v13 = vmul.f32 %v5722_v40, %v5717_v32 }
 0xa62   :  { %4356 = vmatmul.mubr.msk.bf16.gmra.mrb[112].mxu1 %vm323_vm1, %v5505_v60  ;;  %v3192_v60 = vmul.f32 %v5691_v16, %v5687_v12 }
 0xa63   :  { %4359 = vmatprep.mubr.msk.bf16.mxu1 %vm323_vm1, %v5512_v61  ;;  %v5697_v61 = vld [vmem:[#allocation3 + $0x8] sm:$0xff] }
 0xa64   :  { %v3188_v5 = vmul.f32 %v5691_v16, %v5697_v61  ;;  %v3233_v25 = vsel %vm423_vm2, %v3192_v60, 0.0 }
 0xa65   :  { %v3234_v34 = vadd.f32 %v3233_v25, %v3232_v38  ;;  %v5753_v25 = vld [vmem:[#allocation3 + $0x60] sm:$0xff] }
 0xa66   :  { %v3220_v45 = vsel %vm423_vm2, %v3188_v5, 0.0  ;;  %v3246_v5 = vsel %vm423_vm2, %v3196_v51, 0.0  ;;  %v5768_v51 = vld [vmem:[#allocation3 + $0x70] sm:$0xff] }
 0xa67   :  { %v3221_v52 = vadd.f32 %v3220_v45, %v3219_v46  ;;  %v3236_v60 = vadd.f32 %v3235_v15, %v3234_v34  ;;  %6025 = vst [vmem:[#allocation7_spill] sm:$0xff] %v5768_v51  ;;  %v3199_v15 = vmul.f32 %v5689_v54, %v5753_v25 }
 0xa6a   :  { %4360 = vmatmul.mubr.msk.bf16.gmra.mrb[116].mxu1 %vm323_vm1, %v5519_v30  ;;  %v2959_v30 = vld [vmem:[#allocation2 + $0x2a0] sm:$0xff] }
 0xb2d   :  { %v4353_v29 = vpop.f32.mrb[108].mxu1 }
 0xb2e   :  { %v3056_v1 = vadd.f32 %v4353_v29, %v2961_v27  ;;  %v3007_v2 = vpop.f32.mrb[109].mxu1  ;;  %v2964_v27 = vld [vmem:[#allocation2 + $0x2c8] sm:$0xff] }
 0xb2f   :  { %v3054_v6 = vadd.f32 %v3007_v2, %v2959_v30  ;;  %v4354_v57 = vpop.f32.mrb[110].mxu1  ;;  %v5736_v2 = vld [vmem:[#allocation3 + $0x50] sm:$0xff] }
 0xb30   :  { %v3060_v47 = vmul.f32 0.5, %v3056_v1  ;;  %v3057_v0 = vadd.f32 %v4354_v57, %v2962_v56  ;;  %v3010_v11 = vpop.f32.mrb[111].mxu1  ;;  %v5742_v56 = vmul.f32 %v5722_v40, %v5729_v23  ;;  %v3222_v57 = vsel %vm423_vm2, %v3189_v4, 0.0 }
 0xb31   :  { %v3058_v8 = vmul.f32 0.5, %v3054_v6  ;;  %v3055_v9 = vadd.f32 %v3010_v11, %v2960_v50  ;;  %v3195_v6 = vmul.f32 %v5689_v54, %v5727_v22  ;;  %v5747_v50 = vld [vmem:[#allocation3 + $0x58] sm:$0xff]  ;;  %v3237_v11 = vsel %vm423_vm2, %v3194_v13, 0.0 }
 0xb32   :  { %4593 = vtanh.f32 %v3060_v47  ;;  %v3061_v14 = vmul.f32 0.5, %v3057_v0  ;;  %v5745_v47 = vld [vmem:[#allocation3 + $0x68] sm:$0xff]  ;;  %6024 = vst [vmem:[#allocation6_spill] sm:$0xff] %v5747_v50  ;;  %v3197_v37 = vmul.f32 %v5708_v26, %v5736_v2 }
 0xb33   :  { %4595 = vtanh.f32 %v3058_v8  ;;  %v3059_v24 = vmul.f32 0.5, %v3055_v9  ;;  %v5751_v9 = vadd.f32 %v3222_v57, %v3221_v52  ;;  %v3200_v34 = vmul.f32 %v5691_v16, %v5745_v47  ;;  %v2969_v57 = vld [vmem:[#allocation2 + $0x2f0] sm:$0xff] }
 0xb34   :  { %4597 = vtanh.f32 %v3061_v14  ;;  %v5757_v14 = vadd.f32 %v3237_v11, %v3236_v60  ;;  %v3245_v45 = vsel %vm423_vm2, %v3195_v6, 0.0  ;;  %v5780_v11 = vld [vmem:[#allocation3 + $0xa0] sm:$0xff] }
 0xb35   :  { %4599 = vtanh.f32 %v3059_v24  ;;  %v4357_v35 = vpop.f32.mrb[112].mxu1  ;;  %v3259_v6 = vsel %vm423_vm2, %v3200_v34, 0.0  ;;  %v3258_v34 = vsel %vm423_vm2, %v3199_v15, 0.0 }
 0xb36   :  { %v3076_v44 = vadd.f32 %v4357_v35, %v2965_v31  ;;  %v3023_v21 = vpop.f32.mrb[113].mxu1 }
 0xb37   :  { %v3074_v48 = vadd.f32 %v3023_v21, %v2963_v7  ;;  %v4358_v62 = vpop.f32.mrb[114].mxu1  ;;  %v3247_v7 = vadd.f32 %v3246_v5, %v3245_v45  ;;  %v5782_v5 = vld [vmem:[#allocation3 + $0xc8] sm:$0xff] }
 0xb38   :  { %v3080_v3 = vmul.f32 0.5, %v3076_v44  ;;  %v3077_v55 = vadd.f32 %v4358_v62, %v2966_v39  ;;  %v3026_v29 = vpop.f32.mrb[115].mxu1  ;;  %v5765_v44 = vmul.f32 %v5722_v40, %v5747_v50  ;;  %v3212_v15 = vmul.f32 %v5691_v16, %v5782_v5 }
 0xb39   :  { %v3078_v1 = vmul.f32 0.5, %v3074_v48  ;;  %v3075_v30 = vadd.f32 %v3026_v29, %v2964_v27  ;;  %v5773_v27 = vld [vmem:[#allocation3 + $0xa8] sm:$0xff]  ;;  %v3248_v29 = vsel %vm423_vm2, %v3197_v37, 0.0 }
 0xb3a   :  { %4601 = vtanh.f32 %v3080_v3  ;;  %v3081_v59 = vmul.f32 0.5, %v3077_v55 }
 0xb3b   :  { %4603 = vtanh.f32 %v3078_v1  ;;  %v3079_v0 = vmul.f32 0.5, %v3075_v30 }
 0xb3c   :  { %v4594_v8 = vpop.eup %4593  ;;  %4605 = vtanh.f32 %v3081_v59 }
 0xb3d   :  { %v4596_v24 = vpop.eup %4595  ;;  %v3068_v58 = vadd.f32 1.0, %v4594_v8  ;;  %4607 = vtanh.f32 %v3079_v0  ;;  %v4361_v38 = vpop.f32.mrb[116].mxu1  ;;  %v5786_v8 = vadd.f32 %v3248_v29, %v3247_v7  ;;  %v5803_v29 = vld [vmem:[#allocation3 + $0xb0] sm:$0xff] }
 0xb3e   :  { %v4598_v31 = vpop.eup %4597  ;;  %v3066_v35 = vadd.f32 1.0, %v4596_v24  ;;  %v3096_v4 = vadd.f32 %v4361_v38, %v5342_v42  ;;  %v3039_v46 = vpop.f32.mrb[117].mxu1  ;;  %v2967_v24 = vld [vmem:[#allocation2 + $0x2e0] sm:$0xff]  ;;  %v3208_v38 = vmul.f32 %v5691_v16, %v5773_v27  ;;  %6027 = vst [vmem:[#allocation9_spill] sm:$0xff] %v5803_v29 }
 0xb3f   :  { %v4600_v21 = vpop.eup %4599  ;;  %v3069_v48 = vadd.f32 1.0, %v4598_v31  ;;  %v3072_v39 = vmul.f32 0.5, %v3068_v58  ;;  %v3094_v62 = vadd.f32 %v3039_v46, %v5330_v28  ;;  %v4362_v13 = vpop.f32.mrb[118].mxu1  ;;  %v5777_v28 = vld [vmem:[#allocation3 + $0x88] sm:$0xff]  ;;  %v5793_v46 = vld [vmem:[#allocation3 + $0xc0] sm:$0xff] }
 0xb40   :  { %v3067_v52 = vadd.f32 1.0, %v4600_v21  ;;  %v3070_v3 = vmul.f32 0.5, %v3066_v35  ;;  %v3097_v42 = vadd.f32 %v4362_v13, %v5345_v63  ;;  %v3042_v55 = vpop.f32.mrb[119].mxu1  ;;  %v3201_v63 = vmul.f32 %v5708_v26, %v5768_v51  ;;  %v2970_v35 = vld [vmem:[#allocation2 + $0x2f8] sm:$0xff]  ;;  %v5797_v13 = vld [vmem:[#allocation3 + $0x90] sm:$0xff] }
 0xb41   :  { %v3100_v60 = vmul.f32 %v3096_v4, %v3072_v39  ;;  %v3073_v1 = vmul.f32 0.5, %v3069_v48  ;;  %v3095_v30 = vadd.f32 %v3042_v55, %v5340_v36  ;;  %v5788_v36 = vld [vmem:[#allocation3 + $0x80] sm:$0xff]  ;;  %v3204_v7 = vmul.f32 %v5691_v16, %v5777_v28  ;;  %6026 = vst [vmem:[#allocation8_spill] sm:$0xff] %v5797_v13 }
 0xb42   :  { %v3098_v59 = vmul.f32 %v3094_v62, %v3070_v3  ;;  %v3071_v0 = vmul.f32 0.5, %v3067_v52  ;;  %v3260_v21 = vadd.f32 %v3259_v6, %v3258_v34  ;;  %v2968_v62 = vld [vmem:[#allocation2 + $0x2e8] sm:$0xff]  ;;  %v3207_v52 = vmul.f32 %v5689_v54, %v5780_v11  ;;  %v5807_v6 = vld [vmem:[#allocation3 + $0x98] sm:$0xff] }
 0xb43   :  { %v3104_v37 = vadd.f32 %v3100_v60, %v2969_v57  ;;  %v3101_v58 = vmul.f32 %v3097_v42, %v3073_v1  ;;  %v3203_v60 = vmul.f32 %v5689_v54, %v5788_v36  ;;  %6028 = vst [vmem:[#allocation10_spill] sm:$0xff] %v5807_v6  ;;  %v3211_v57 = vmul.f32 %v5689_v54, %v5793_v46 }
 0xb44   :  { %v4602_v45 = vpop.eup %4601  ;;  %v3102_v31 = vadd.f32 %v3098_v59, %v2967_v24  ;;  %v3099_v4 = vmul.f32 %v3095_v30, %v3071_v0  ;;  %v3285_v59 = vsel %vm423_vm2, %v3208_v38, 0.0  ;;  %v3205_v24 = vmul.f32 %v5708_v26, %v5797_v13 }
 0xb45   :  { %v4604_v48 = vpop.eup %4603  ;;  %4609 = vtanh.f32 %v3104_v37  ;;  %v3105_v39 = vadd.f32 %v3101_v58, %v2970_v35  ;;  %v3088_v42 = vadd.f32 1.0, %v4602_v45  ;;  %v5812_v37 = vld [vmem:[#allocation3 + $0xd0] sm:$0xff]  ;;  %v3272_v58 = vsel %vm423_vm2, %v3204_v7, 0.0  ;;  %v5817_v45 = vld [vmem:[#allocation3 + $0x78] sm:$0xff] }
 0xb46   :  { %v4606_v3 = vpop.eup %4605  ;;  %4611 = vtanh.f32 %v3102_v31  ;;  %v3103_v55 = vadd.f32 %v3099_v4, %v2968_v62  ;;  %v3086_v30 = vadd.f32 1.0, %v4604_v48  ;;  %6029 = vst [vmem:[#allocation11_spill] sm:$0xff] %v5812_v37  ;;  %6030 = vst [vmem:[#allocation12_spill] sm:$0xff] %v5817_v45  ;;  %v3209_v31 = vmul.f32 %v5708_v26, %v5803_v29  ;;  %v5823_v48 = vld [vmem:[#allocation3 + $0xb8] sm:$0xff] }
 0xb47   :  { %v4608_v1 = vpop.eup %4607  ;;  %4613 = vtanh.f32 %v3105_v39  ;;  %v3089_v0 = vadd.f32 1.0, %v4606_v3  ;;  %v3284_v35 = vsel %vm423_vm2, %v3207_v52, 0.0  ;;  %v3298_v4 = vsel %vm423_vm2, %v3212_v15, 0.0  ;;  %6031 = vst [vmem:[#allocation13_spill] sm:$0xff] %v5823_v48  ;;  %v5831_v52 = vld [vmem:[#allocation3 + $0xd8] sm:$0xff] }
 0xb48   :  { %4615 = vtanh.f32 %v3103_v55  ;;  %v3087_v34 = vadd.f32 1.0, %v4608_v1  ;;  %v3092_v38 = vmul.f32 0.5, %v3088_v42  ;;  %v3206_v39 = vmul.f32 %v5722_v40, %v5807_v6  ;;  %6032 = vst [vmem:[#allocation14_spill] sm:$0xff] %v5831_v52 }
 0xb49   :  { %v3271_v62 = vsel %vm423_vm2, %v3203_v60, 0.0  ;;  %v3286_v3 = vadd.f32 %v3285_v59, %v3284_v35  ;;  %v3090_v7 = vmul.f32 0.5, %v3086_v30  ;;  %v3213_v55 = vmul.f32 %v5708_v26, %v5812_v37 }
 0xb4a   :  { %v3273_v1 = vadd.f32 %v3272_v58, %v3271_v62  ;;  %v3297_v19 = vsel %vm423_vm2, %v3211_v57, 0.0  ;;  %v3093_v29 = vmul.f32 0.5, %v3089_v0  ;;  %v3202_v15 = vmul.f32 %v5722_v40, %v5817_v45 }
 0xb4b   :  { %v3261_v42 = vsel %vm423_vm2, %v3201_v63, 0.0  ;;  %v3299_v13 = vadd.f32 %v3298_v4, %v3297_v19  ;;  %v3091_v6 = vmul.f32 0.5, %v3087_v34  ;;  %v3210_v60 = vmul.f32 %v5722_v40, %v5823_v48 }
 0xb4c   :  { %v3262_v30 = vadd.f32 %v3261_v42, %v3260_v21  ;;  %v3287_v59 = vsel %vm423_vm2, %v3209_v31, 0.0  ;;  %v3112_v35 = vsub.f32 1.0, %v3092_v38  ;;  %v3274_v58 = vsel %vm423_vm2, %v3205_v24, 0.0 }
 0xb4d   :  { %v3276_v57 = vsel %vm423_vm2, %v3206_v39, 0.0  ;;  %v3288_v0 = vadd.f32 %v3287_v59, %v3286_v3  ;;  %v3110_v37 = vsub.f32 1.0, %v3090_v7  ;;  %v3214_v45 = vmul.f32 %v5722_v40, %v5831_v52 }
 0xb4e   :  { %v3275_v63 = vadd.f32 %v3274_v58, %v3273_v1  ;;  %v3300_v19 = vsel %vm423_vm2, %v3213_v55, 0.0  ;;  %v3120_v4 = vmul.f32 %v3092_v38, %v5655_v49  ;;  %v3113_v21 = vsub.f32 1.0, %v3093_v29 }
 0xb4f   :  { %v4610_v62 = vpop.eup %4609  ;;  %v3301_v31 = vadd.f32 %v3300_v19, %v3299_v13  ;;  %v3118_v24 = vmul.f32 %v3090_v7, %v5658_v53  ;;  %v3111_v50 = vsub.f32 1.0, %v3091_v6  ;;  %v3289_v3 = vsel %vm423_vm2, %v3210_v60, 0.0 }
 0xb50   :  { %v4612_v34 = vpop.eup %4611  ;;  %v3116_v42 = vmul.f32 %v4610_v62, %v3112_v35  ;;  %v3121_v51 = vmul.f32 %v3093_v29, %v5660_v41  ;;  %v3290_v58 = vadd.f32 %v3289_v3, %v3288_v0  ;;  %v3119_v55 = vmul.f32 %v3091_v6, %v5664_v43 }
 0xb51   :  { %v4614_v48 = vpop.eup %4613  ;;  %v3114_v39 = vmul.f32 %v4612_v34, %v3110_v37  ;;  %v3302_v38 = vsel %vm423_vm2, %v3214_v45, 0.0  ;;  %v3224_v13 = vsel %vm423_vm2, %v5742_v56, 0.0  ;;  %v3277_v37 = vadd.f32 %v3276_v57, %v3275_v63 }
 0xb52   :  { %v4616_v59 = vpop.eup %4615  ;;  %v3124_v52 = vadd.f32 %v3120_v4, %v3116_v42  ;;  %v3117_v1 = vmul.f32 %v4614_v48, %v3113_v21  ;;  %v3303_v7 = vadd.f32 %v3302_v38, %v3301_v31  ;;  %v3225_v60 = vadd.f32 %v3224_v13, %v5751_v9 }
 0xb53   :  { %v3122_v32 = vadd.f32 %v3118_v24, %v3114_v39  ;;  %v3115_v49 = vmul.f32 %v4616_v59, %v3111_v50  ;;  %v3250_v43 = vsel %vm423_vm2, %v5765_v44, 0.0  ;;  %v3263_v50 = vsel %vm423_vm2, %v3202_v15, 0.0 }
 0xb54   :  { %3129 = vst.msk [vmem:[#allocation3 + $0xf0] sm:$0xff] %vm423_vm2, %v3124_v52  ;;  %v3125_v53 = vadd.f32 %v3121_v51, %v3117_v1  ;;  %v3251_v29 = vadd.f32 %v3250_v43, %v5786_v8  ;;  %v3264_v56 = vadd.f32 %v3263_v50, %v3262_v30  ;;  %v3291_v6 = vrot.slane %v3290_v58, 4 }
 0xb55   :  { %3127 = vst.msk [vmem:[#allocation3 + $0xe0] sm:$0xff] %vm423_vm2, %v3122_v32  ;;  %v3123_v41 = vadd.f32 %v3119_v55, %v3115_v49  ;;  %v3239_v51 = vrot.slane %v5757_v14, 4  ;;  %v3278_v45 = vrot.slane %v3277_v37, 4  ;;  %v3304_v9 = vrot.slane %v3303_v7, 4 }
 0xb56   :  { %3130 = vst.msk [vmem:[#allocation3 + $0xf8] sm:$0xff] %vm423_vm2, %v3125_v53  ;;  %v6033_v32 = vmov 0.0   ;;  %v3226_v48 = vrot.slane %v3225_v60, 4  ;;  %v3252_v52 = vrot.slane %v3251_v29, 4  ;;  %v3265_v44 = vrot.slane %v3264_v56, 4 }
 0xb57   :  { %3128 = vst.msk [vmem:[#allocation3 + $0xe8] sm:$0xff] %vm423_vm2, %v3123_v41  ;;  %4367 = vmatprep.mubr.msk.bf16.mxu0 %vm4650_vm3, %v6033_v32  ;;  %v3292_v35 = vadd.f32 %v3291_v6, %v3290_v58  ;;  %v3240_v8 = vadd.f32 %v3239_v51, %v5757_v14  ;;  %v3279_v30 = vadd.f32 %v3278_v45, %v3277_v37 }
 0xb58   :  { %v3305_v0 = vadd.f32 %v3304_v9, %v3303_v7  ;;  %v3227_v62 = vadd.f32 %v3226_v48, %v3225_v60  ;;  %v3253_v4 = vadd.f32 %v3252_v52, %v3251_v29  ;;  %v3266_v21 = vadd.f32 %v3265_v44, %v3264_v56 }
 0xb59   :  { %v3293_v42 = vrot.slane %v3292_v35, 2  ;;  %v3241_v14 = vrot.slane %v3240_v8, 2  ;;  %v3280_v39 = vrot.slane %v3279_v30, 2 }
 0xb5a   :  { %v3306_v3 = vrot.slane %v3305_v0, 2  ;;  %v3228_v59 = vrot.slane %v3227_v62, 2  ;;  %v3254_v55 = vrot.slane %v3253_v4, 2  ;;  %v3267_v49 = vrot.slane %v3266_v21, 2 }
 0xb5b   :  { %v5865_v57 = vld [vmem:[#allocation3 + $0xf0] sm:$0xff]  ;;  %v3294_v38 = vadd.f32 %v3293_v42, %v3292_v35  ;;  %v3242_v53 = vadd.f32 %v3241_v14, %v3240_v8  ;;  %v3281_v37 = vadd.f32 %v3280_v39, %v3279_v30  ;;  %v3325_v42 = vstv %s4372_s5 }
 0xb5c   :  { %v5863_v15 = vld [vmem:[#allocation3 + $0xe0] sm:$0xff]  ;;  %v3217_v24 = vmul.f32 %v5708_v26, %v5865_v57  ;;  %v3307_v26 = vadd.f32 %v3306_v3, %v3305_v0  ;;  %v3229_v60 = vadd.f32 %v3228_v59, %v3227_v62  ;;  %v3255_v43 = vadd.f32 %v3254_v55, %v3253_v4 }
 0xb5d   :  { %v3215_v63 = vmul.f32 %v5689_v54, %v5863_v15  ;;  %v5872_v34 = vld [vmem:[#allocation3 + $0xf8] sm:$0xff]  ;;  %v3268_v50 = vadd.f32 %v3267_v49, %v3266_v21  ;;  %v3243_v56 = vrot.slane %v3242_v53, 1  ;;  %v3282_v6 = vrot.slane %v3281_v37, 1 }
 0xb5e   :  { %v5870_v19 = vld [vmem:[#allocation3 + $0xe8] sm:$0xff]  ;;  %v3218_v54 = vmul.f32 %v5722_v40, %v5872_v34  ;;  %v3295_v40 = vrot.slane %v3294_v38, 1  ;;  %v3308_v51 = vrot.slane %v3307_v26, 1  ;;  %v3230_v9 = vrot.slane %v3229_v60, 1 }
 0xb5f   :  { %v3216_v31 = vmul.f32 %v5691_v16, %v5870_v19  ;;  %v3310_v1 = vsel %vm423_vm2, %v3215_v63, 0.0  ;;  %v3313_v16 = vsel %vm423_vm2, %v3217_v24, 0.0  ;;  %v3256_v48 = vrot.slane %v3255_v43, 1 }
 0xb60   :  { %v3315_v41 = vsel %vm423_vm2, %v3218_v54, 0.0  ;;  %v3269_v52 = vrot.slane %v3268_v50, 1  ;;  %v3296_v44 = vadd.f32 %v3295_v40, %v3294_v38  ;;  %v3244_v8 = vadd.f32 %v3243_v56, %v3242_v53 }
 0xb61   :  { %v3311_v58 = vsel %vm423_vm2, %v3216_v31, 0.0  ;;  %v3283_v30 = vadd.f32 %v3282_v6, %v3281_v37  ;;  %v3309_v0 = vadd.f32 %v3308_v51, %v3307_v26  ;;  %v3231_v63 = vadd.f32 %v3230_v9, %v3229_v60 }
 0xb62   :  { %v3312_v13 = vadd.f32 %v3311_v58, %v3310_v1  ;;  %v3257_v4 = vadd.f32 %v3256_v48, %v3255_v43  ;;  %v3270_v21 = vadd.f32 %v3269_v52, %v3268_v50  ;;  %v3331_v24 = vadd.f32 %v3325_v42, %v3296_v44 }
 0xb63   :  { %v3327_v39 = vadd.f32 %v3325_v42, %v3244_v8  ;;  %v3330_v3 = vadd.f32 %v3325_v42, %v3283_v30  ;;  %v3332_v59 = vadd.f32 %v3325_v42, %v3309_v0  ;;  %v3326_v54 = vadd.f32 %v3325_v42, %v3231_v63 }
 0xb64   :  { %v3314_v7 = vadd.f32 %v3313_v16, %v3312_v13  ;;  %v3328_v58 = vadd.f32 %v3325_v42, %v3257_v4  ;;  %v3329_v55 = vadd.f32 %v3325_v42, %v3270_v21  ;;  %v3340_v49 = vsel %vm423_vm2, %v3331_v24, -inf }
 0xb65   :  { %v3335_v13 = vsel %vm423_vm2, %v3327_v39, -inf  ;;  %v3338_v16 = vsel %vm423_vm2, %v3330_v3, -inf  ;;  %v3342_v53 = vsel %vm423_vm2, %v3332_v59, -inf  ;;  %v3334_v26 = vsel %vm423_vm2, %v3326_v54, -inf }
 0xb66   :  { %v3316_v29 = vadd.f32 %v3315_v41, %v3314_v7  ;;  %v3341_v37 = vmax.f32 %v3335_v13, %v3340_v49  ;;  %v3336_v7 = vsel %vm423_vm2, %v3328_v58, -inf  ;;  %v3337_v60 = vsel %vm423_vm2, %v3329_v55, -inf }
 0xb67   :  { %v3339_v43 = vmax.f32 %v3334_v26, %v3338_v16  ;;  %v3343_v50 = vmax.f32 %v3336_v7, %v3342_v53 }
 0xb68   :  { %v3317_v45 = vrot.slane %v3316_v29, 4 }
 0xb6a   :  { %v3318_v35 = vadd.f32 %v3317_v45, %v3316_v29  ;;  %v3346_v29 = vmax.f32 %v3339_v43, %v3341_v37 }
 0xb6c   :  { %v3319_v62 = vrot.slane %v3318_v35, 2 }
 0xb6e   :  { %v3320_v31 = vadd.f32 %v3319_v62, %v3318_v35 }
 0xb70   :  { %v3321_v14 = vrot.slane %v3320_v31, 1 }
 0xb72   :  { %v3322_v1 = vadd.f32 %v3321_v14, %v3320_v31 }
 0xb74   :  { %v3333_v38 = vadd.f32 %v3325_v42, %v3322_v1 }
 0xb76   :  { %v3344_v41 = vsel %vm423_vm2, %v3333_v38, -inf }
 0xb77   :  { %v3345_v40 = vmax.f32 %v3337_v60, %v3344_v41 }
 0xb79   :  { %v3347_v56 = vmax.f32 %v3343_v50, %v3345_v40 }
 0xb7b   :  { %v3348_v6 = vmax.f32 %v3346_v29, %v3347_v56 }
 0xb7d   :  { %v3349_v51 = vsub.f32 %v3326_v54, %v3348_v6  ;;  %v3350_v45 = vsub.f32 %v3327_v39, %v3348_v6  ;;  %v3351_v9 = vsub.f32 %v3328_v58, %v3348_v6  ;;  %v3352_v48 = vsub.f32 %v3329_v55, %v3348_v6 }
 0xb7e   :  { %v3353_v52 = vsub.f32 %v3330_v3, %v3348_v6  ;;  %v3354_v44 = vsub.f32 %v3331_v24, %v3348_v6  ;;  %v3355_v35 = vsub.f32 %v3332_v59, %v3348_v6  ;;  %v3356_v62 = vsub.f32 %v3333_v38, %v3348_v6 }
 0xb7f   :  { %v3357_v8 = vmul.f32 1.442695, %v3349_v51  ;;  %v3359_v30 = vmul.f32 1.442695, %v3350_v45  ;;  %v3361_v0 = vmul.f32 1.442695, %v3351_v9  ;;  %v3410_v6 = vlaneseq }
 0xb80   :  { %v3363_v63 = vmul.f32 1.442695, %v3352_v48  ;;  %v3365_v42 = vmul.f32 1.442695, %v3353_v52  ;;  %v3367_v4 = vmul.f32 1.442695, %v3354_v44 }
 0xb81   :  { %4617 = vpow2.f32 %v3357_v8  ;;  %v3369_v21 = vmul.f32 1.442695, %v3355_v35  ;;  %v3371_v31 = vmul.f32 1.442695, %v3356_v62  ;;  %v3411_v9 = vshrl.u32 %v3410_v6, 7 }
 0xb82   :  { %4619 = vpow2.f32 %v3359_v30 }
 0xb83   :  { %4621 = vpow2.f32 %v3361_v0  ;;  %v3412_v44 = vsub.s32 0, %v3411_v9 }
 0xb84   :  { %4623 = vpow2.f32 %v3363_v63 }
 0xb85   :  { %4625 = vpow2.f32 %v3365_v42 }
 0xb86   :  { %4627 = vpow2.f32 %v3367_v4 }
 0xb87   :  { %4629 = vpow2.f32 %v3369_v21 }
 0xb88   :  { %4631 = vpow2.f32 %v3371_v31 }
 0xb8b   :  { %v4618_v14 = vpop.eup %4617 }
 0xb8c   :  { %v4620_v24 = vpop.eup %4619 }
 0xb8d   :  { %v4622_v39 = vpop.eup %4621  ;;  %v3381_v3 = vrot.slane %v4620_v24, 7 }
 0xb8e   :  { %v4624_v59 = vpop.eup %4623  ;;  %v3384_v54 = vrot.slane %v4622_v39, 6 }
 0xb8f   :  { %v4626_v1 = vpop.eup %4625  ;;  %v3383_v58 = vsel %vm3382_vm4, %v3381_v3, %v4618_v14  ;;  %v3387_v55 = vrot.slane %v4624_v59, 5 }
 0xb90   :  { %v4628_v49 = vpop.eup %4627  ;;  %v3386_v38 = vsel %vm3385_vm5, %v3384_v54, %v3383_v58  ;;  %v3390_v13 = vrot.slane %v4626_v1, 4 }
 0xb91   :  { %v4630_v16 = vpop.eup %4629  ;;  %v3389_v53 = vsel %vm3388_vm6, %v3387_v55, %v3386_v38  ;;  %v3393_v37 = vrot.slane %v4628_v49, 3 }
 0xb92   :  { %v4632_v26 = vpop.eup %4631  ;;  %v3392_v7 = vsel %vm3391_vm7, %v3390_v13, %v3389_v53  ;;  %v3396_v60 = vrot.slane %v4630_v16, 2 }
 0xb93   :  { %v3395_v41 = vsel %vm3394_vm8, %v3393_v37, %v3392_v7  ;;  %v3399_v43 = vrot.slane %v4632_v26, 1 }
 0xb94   :  { %v3398_v50 = vsel %vm3397_vm9, %v3396_v60, %v3395_v41 }
 0xb95   :  { %v3401_v40 = vsel %vm3400_vm10, %v3399_v43, %v3398_v50 }
 0xb96   :  { %v3403_v29 = vsel %vm423_vm2, %v3401_v40, 0.0 }
 0xb97   :  { %v3404_v56 = vrot.slane %v3403_v29, 4 }
 0xb99   :  { %v3405_v51 = vadd.f32 %v3404_v56, %v3403_v29 }
 0xb9b   :  { %v3406_v45 = vrot.slane %v3405_v51, 2 }
 0xb9d   :  { %v3407_v48 = vadd.f32 %v3406_v45, %v3405_v51 }
 0xb9f   :  { %v3408_v52 = vrot.slane %v3407_v48, 1 }
 0xba1   :  { %v3409_v35 = vadd.f32 %v3408_v52, %v3407_v48 }
 0xba3   :  { %v3413_v8 = vrot.slane %v3409_v35, %v3412_v44 }
 0xba5   :  { %4633 = vrcp.f32 %v3413_v8 }
 0xbaf   :  { %v4634_v30 = vpop.eup %4633 }
 0xbb0   :  { %v3415_v0 = vmul.f32 %v4634_v30, %v4618_v14  ;;  %v3416_v62 = vmul.f32 %v4634_v30, %v4620_v24  ;;  %v3417_v63 = vmul.f32 %v4634_v30, %v4622_v39  ;;  %v3418_v42 = vmul.f32 %v4634_v30, %v4624_v59 }
 0xbb1   :  { %v3419_v4 = vmul.f32 %v4634_v30, %v4626_v1  ;;  %v3420_v54 = vmul.f32 %v4634_v30, %v4628_v49  ;;  %v3421_v58 = vmul.f32 %v4634_v30, %v4630_v16  ;;  %v3422_v55 = vmul.f32 %v4634_v30, %v4632_v26 }
 0xbb2   :  { %v3426_v21 = vrot.slane %v3415_v0, %v3412_v44  ;;  %v3430_v31 = vrot.slane %v3416_v62, %v3412_v44  ;;  %v3434_v3 = vrot.slane %v3417_v63, %v3412_v44  ;;  %v5893_v38 = vrot.slane %v3418_v42, %v3412_v44  ;;  %v6034_v62 = vld [vmem:[#allocation5_spill] sm:$0xff]  ;;  %v6035_v63 = vld [vmem:[#allocation7_spill] sm:$0xff] }
 0xbb3   :  { %v5897_v37 = vrot.slane %v3419_v4, %v3412_v44  ;;  %v5902_v59 = vrot.slane %v3420_v54, %v3412_v44  ;;  %v5904_v1 = vrot.slane %v3421_v58, %v3412_v44  ;;  %v5906_v49 = vrot.slane %v3422_v55, %v3412_v44 }
 0xbb4   :  { %v3455_v13 = vmul.f32 %v3426_v21, %v5699_v10  ;;  %v3459_v53 = vmul.f32 %v3430_v31, %v5693_v18  ;;  %v3456_v14 = vmul.f32 %v3426_v21, %v5697_v61  ;;  %v3460_v24 = vmul.f32 %v3430_v31, %v5687_v12 }
 0xbb5   :  { %v3463_v39 = vmul.f32 %v3434_v3, %v5727_v22  ;;  %v3464_v16 = vmul.f32 %v3434_v3, %v5719_v33  ;;  %v3467_v10 = vmul.f32 %v5893_v38, %v5753_v25  ;;  %v3468_v12 = vmul.f32 %v5893_v38, %v5745_v47 }
 0xbb6   :  { %v3487_v18 = vsel %vm423_vm2, %v3455_v13, 0.0  ;;  %v3488_v26 = vsel %vm423_vm2, %v3459_v53, 0.0  ;;  %v3471_v22 = vmul.f32 %v5897_v37, %v5788_v36  ;;  %v3502_v60 = vsel %vm423_vm2, %v3456_v14, 0.0  ;;  %v6036_v14 = vld [vmem:[#allocation6_spill] sm:$0xff] }
 0xbb7   :  { %v3489_v61 = vadd.f32 %v3488_v26, %v3487_v18  ;;  %v3490_v7 = vsel %vm423_vm2, %v3463_v39, 0.0  ;;  %v3503_v33 = vsel %vm423_vm2, %v3460_v24, 0.0  ;;  %v3472_v25 = vmul.f32 %v5897_v37, %v5777_v28  ;;  %v6037_v39 = vld [vmem:[#allocation8_spill] sm:$0xff] }
 0xbb8   :  { %v3475_v41 = vmul.f32 %v5902_v59, %v5780_v11  ;;  %v3504_v50 = vadd.f32 %v3503_v33, %v3502_v60  ;;  %v3479_v47 = vmul.f32 %v5904_v1, %v5793_v46  ;;  %v3483_v36 = vmul.f32 %v5906_v49, %v5863_v15  ;;  %v6038_v26 = vld [vmem:[#allocation12_spill] sm:$0xff] }
 0xbb9   :  { %v3491_v43 = vadd.f32 %v3490_v7, %v3489_v61  ;;  %v3492_v40 = vsel %vm423_vm2, %v3467_v10, 0.0  ;;  %v3505_v29 = vsel %vm423_vm2, %v3464_v16, 0.0  ;;  %v3476_v56 = vmul.f32 %v5902_v59, %v5773_v27  ;;  %v6039_v61 = vld [vmem:[#allocation9_spill] sm:$0xff] }
 0xbba   :  { %v3480_v28 = vmul.f32 %v5904_v1, %v5782_v5  ;;  %v3506_v11 = vadd.f32 %v3505_v29, %v3504_v50  ;;  %v3494_v51 = vsel %vm423_vm2, %v3471_v22, 0.0  ;;  %v3507_v45 = vsel %vm423_vm2, %v3468_v12, 0.0  ;;  %v6041_v50 = vld [vmem:[#allocation11_spill] sm:$0xff] }
 0xbbb   :  { %v3493_v6 = vadd.f32 %v3492_v40, %v3491_v43  ;;  %v3457_v46 = vmul.f32 %v3426_v21, %v5712_v20  ;;  %v3461_v15 = vmul.f32 %v3430_v31, %v5703_v17  ;;  %v3484_v9 = vmul.f32 %v5906_v49, %v5870_v19 }
 0xbbc   :  { %v3496_v52 = vsel %vm423_vm2, %v3475_v41, 0.0  ;;  %v3508_v27 = vadd.f32 %v3507_v45, %v3506_v11  ;;  %v3498_v44 = vsel %vm423_vm2, %v3479_v47, 0.0  ;;  %v3500_v5 = vsel %vm423_vm2, %v3483_v36, 0.0  ;;  %v6040_v41 = vld [vmem:[#allocation10_spill] sm:$0xff] }
 0xbbd   :  { %v3495_v48 = vadd.f32 %v3494_v51, %v3493_v6  ;;  %v3509_v35 = vsel %vm423_vm2, %v3472_v25, 0.0  ;;  %v3465_v8 = vmul.f32 %v3434_v3, %v5736_v2  ;;  %v3511_v20 = vsel %vm423_vm2, %v3476_v56, 0.0 }
 0xbbe   :  { %v3510_v0 = vadd.f32 %v3509_v35, %v3508_v27  ;;  %v3458_v17 = vmul.f32 %v3426_v21, %v5729_v23  ;;  %v3462_v19 = vmul.f32 %v3430_v31, %v6034_v62  ;;  %v3469_v42 = vmul.f32 %v5893_v38, %v6035_v63  ;;  %v3561_v63 = vpop.permute.xlu1 %3560 }
 0xbbf   :  { %v3497_v30 = vadd.f32 %v3496_v52, %v3495_v48  ;;  %v3517_v4 = vsel %vm423_vm2, %v3457_v46, 0.0  ;;  %v3518_v54 = vsel %vm423_vm2, %v3461_v15, 0.0  ;;  %v3513_v13 = vsel %vm423_vm2, %v3480_v28, 0.0  ;;  %v6042_v28 = vld [vmem:[#allocation13_spill] sm:$0xff]  ;;  %v6043_v46 = vld [vmem:[#allocation14_spill] sm:$0xff] }
 0xbc0   :  { %v3512_v55 = vadd.f32 %v3511_v20, %v3510_v0  ;;  %v3519_v2 = vadd.f32 %v3518_v54, %v3517_v4  ;;  %v3515_v53 = vsel %vm423_vm2, %v3484_v9, 0.0  ;;  %v3466_v24 = vmul.f32 %v3434_v3, %v6036_v14 }
 0xbc1   :  { %v3499_v58 = vadd.f32 %v3498_v44, %v3497_v30  ;;  %v3473_v23 = vmul.f32 %v5897_v37, %v6037_v39  ;;  %v3520_v21 = vsel %vm423_vm2, %v3465_v8, 0.0  ;;  %v3532_v18 = vsel %vm423_vm2, %v3458_v17, 0.0  ;;  %v4424_v17 = vld [vmem:[%s6009_s9] sm:$0x1f]  }
 0xbc2   :  { %v3514_v16 = vadd.f32 %v3513_v13, %v3512_v55  ;;  %v3521_v10 = vadd.f32 %v3520_v21, %v3519_v2  ;;  %v3470_v12 = vmul.f32 %v5893_v38, %v6038_v26  ;;  %v3477_v22 = vmul.f32 %v5902_v59, %v6039_v61 }
 0xbc3   :  { %v3501_v31 = vadd.f32 %v3500_v5, %v3499_v58  ;;  %v3522_v7 = vsel %vm423_vm2, %v3469_v42, 0.0  ;;  %v3533_v3 = vsel %vm423_vm2, %v3462_v19, 0.0  ;;  %v3474_v43 = vmul.f32 %v5897_v37, %v6040_v41 }
 0xbc4   :  { %v3516_v60 = vadd.f32 %v3515_v53, %v3514_v16  ;;  %v3523_v33 = vadd.f32 %v3522_v7, %v3521_v10  ;;  %v3534_v25 = vadd.f32 %v3533_v3, %v3532_v18  ;;  %v3481_v47 = vmul.f32 %v5904_v1, %v6041_v50 }
 0xbc5   :  { %v3524_v36 = vsel %vm423_vm2, %v3473_v23, 0.0  ;;  %v3535_v38 = vsel %vm423_vm2, %v3466_v24, 0.0  ;;  %v3478_v6 = vmul.f32 %v5902_v59, %v6042_v28  ;;  %v3526_v11 = vsel %vm423_vm2, %v3477_v22, 0.0 }
 0xbc6   :  { %v3549_v40 = vpack.c.bf16 %v3516_v60, %v3501_v31  ;;  %v3525_v29 = vadd.f32 %v3524_v36, %v3523_v33  ;;  %v3536_v56 = vadd.f32 %v3535_v38, %v3534_v25  ;;  %v3537_v51 = vsel %vm423_vm2, %v3470_v12, 0.0 }
 0xbc7   :  { %v3482_v15 = vmul.f32 %v5904_v1, %v6043_v46  ;;  %v3485_v9 = vmul.f32 %v5906_v49, %v5865_v57  ;;  %v3528_v48 = vsel %vm423_vm2, %v3481_v47, 0.0  ;;  %v3539_v52 = vsel %vm423_vm2, %v3474_v43, 0.0 }
 0xbc8   :  { %4364 = vmatpush3.bf16.msra.mxu0 %v3549_v40  ;;  %v3527_v45 = vadd.f32 %v3526_v11, %v3525_v29  ;;  %v3538_v37 = vadd.f32 %v3537_v51, %v3536_v56  ;;  %v3486_v44 = vmul.f32 %v5906_v49, %v5872_v34  ;;  %v3541_v5 = vsel %vm423_vm2, %v3478_v6, 0.0  ;;  %v3556_v34 = vpop.permute.xlu0 %3555 }
 0xbc9   :  { %4365 = vmatprep.subr.bf16.mxu0 %v6033_v32  ;;  %v3530_v32 = vsel %vm423_vm2, %v3485_v9, 0.0  ;;  %v3543_v8 = vsel %vm423_vm2, %v3482_v15, 0.0 }
 0xbca   :  { %v3529_v59 = vadd.f32 %v3528_v48, %v3527_v45  ;;  %v3540_v27 = vadd.f32 %v3539_v52, %v3538_v37  ;;  %v3545_v57 = vsel %vm423_vm2, %v3486_v44, 0.0 }
 0xbcc   :  { %v3542_v35 = vadd.f32 %v3541_v5, %v3540_v27  ;;  %v3531_v1 = vadd.f32 %v3530_v32, %v3529_v59 }
 0xbce   :  { %v3544_v30 = vadd.f32 %v3543_v8, %v3542_v35 }
 0xbd0   :  { %v3546_v0 = vadd.f32 %v3545_v57, %v3544_v30 }
 0xbd2   :  { %v3550_v20 = vpack.c.bf16 %v3546_v0, %v3531_v1 }
 0xbd4   :  { %4366 = vmatpush3.bf16.msra.mxu0 %v3550_v20 }
 0xbd7   :  { %4368 = vmatmul.mubr.msk.bf16.vlgmr.msra.gmra.mrb[104].mxu0 %vm323_vm1, %v4424_v17 }
 0xcaa   :  { %v3605_v49 = vpop.f32.mrb[104].mxu0 }
 0xcab   :  { %v3606_v62 = vadd.f32 %v3605_v49, %v3556_v34  ;;  %v4369_v19 = vpop.f32.mrb[105].mxu0 }
 0xcac   :  { %v3608_v42 = vpop.f32.mrb[106].mxu0 }
 0xcad   :  { %3612 = vst.msk [vmem:[%s6010_s11] sm:$0xff] %vm423_vm2, %v3606_v62  ;;  %v3609_v4 = vadd.f32 %v3608_v42, %v3561_v63  ;;  %v4370_v54 = vpop.f32.mrb[107].mxu0 }
 0xcaf   :  { %3614 = vst.msk [vmem:[%s6010_s11 + $0x8] sm:$0x3] %vm3613_vm11, %v3609_v4 }

</bundles_post_ra>
